<compile_context>
chip_gen: v5e
topology: v5e:2x2
jax: 0.10.0
libtpu: 0.0.40
codegen_flags: <defaults>
</compile_context>

<pallas_src>
import math

import jax
import jax.numpy as jnp
from jax import lax
from jax.experimental import pallas as pl
from jax.experimental.pallas import tpu as pltpu


def _make_sa_kernel(Bt, C, HW, W, K, pad, out_dtype):
    """Builds the kernel body for fixed (trace-time) shape parameters."""
    CSTEP = 8  # sublane-sized channel chunks

    def kernel(x_ref, mw_ref, o_ref):
        # x_ref : (Bt, C, HW)  lane-dense per-step block (native dtype)
        # mw_ref: (2, K*K, HW) resident: conv weight * column-validity mask
        # o_ref : (Bt, C, HW)

        # ---- channel stats: stream C in 8-sublane chunks, accumulate in f32 ----
        c_sum = jnp.zeros((Bt, HW), jnp.float32)
        c_max = jnp.full((Bt, HW), -jnp.inf, dtype=jnp.float32)
        for c0 in range(0, C, CSTEP):
            c1 = min(C, c0 + CSTEP)
            blk = x_ref[:, c0:c1, :]
            c_sum = c_sum + jnp.sum(blk.astype(jnp.float32), axis=1)
            c_max = jnp.maximum(c_max, jnp.max(blk, axis=1).astype(jnp.float32))
        avg = c_sum * (1.0 / C)

        # ---- 7x7 conv over the two pooled maps, exact f32 (no MXU) ----
        def shift_flat(s, d):
            # result[:, p] = s[:, p + d] if 0 <= p + d < HW else 0
            if d == 0:
                return s
            z = jnp.zeros((Bt, abs(d)), jnp.float32)
            if d > 0:
                return jnp.concatenate([s[:, d:], z], axis=1)
            return jnp.concatenate([z, s[:, :HW + d]], axis=1)

        conv = jnp.zeros((Bt, HW), jnp.float32)
        for ky in range(K):
            for kx in range(K):
                d = (ky - pad) * W + (kx - pad)
                if abs(d) >= HW:          # degenerate tiny-map safety
                    continue
                t = ky * K + kx
                conv = (conv
                        + shift_flat(avg, d) * mw_ref[0, t:t + 1, :]
                        + shift_flat(c_max, d) * mw_ref[1, t:t + 1, :])

        # sigmoid: exp on the EUP; divide is only (Bt, HW) elements.
        attn = 1.0 / (1.0 + jnp.exp(-conv))
        scale = attn.astype(out_dtype)[:, None, :]          # (Bt, 1, HW), hoisted

        # ---- scale + store, native dtype, chunked (no block-sized temps) ----
        for c0 in range(0, C, CSTEP):
            c1 = min(C, c0 + CSTEP)
            o_ref[:, c0:c1, :] = x_ref[:, c0:c1, :] * scale

    return kernel


def spatial_attention(x, conv_weight):
    """x: (B, C, H, W). conv_weight: (2, K, K) = Conv2d(2,1,K,bias=False).weight
    with the output-channel dim squeezed.  Returns (B, C, H, W)."""
    B, C, H, W = x.shape
    Cw, K, K2 = conv_weight.shape
    assert Cw == 2 and K == K2
    pad = K // 2
    HW = H * W

    # Lane-dense view of x (zero-copy for contiguous NCHW).
    x2 = x.reshape(B, C, HW)

    # Precompute masked conv weights (tiny, VMEM-resident, exact f32):
    #   MW[c, ky*K+kx, p] = w[c,ky,kx] * [0 <= (p % W) + kx - pad < W]
    p_idx = jnp.arange(HW)
    wcol = p_idx % W
    kxs = jnp.arange(K)
    off = wcol[None, :] + kxs[:, None] - pad                    # (K, HW)
    colmask = ((off >= 0) & (off < W)).astype(jnp.float32)      # (K, HW)
    MW = (conv_weight.astype(jnp.float32)[:, :, :, None]
          * colmask[None, None, :, :]).reshape(2, K * K, HW)    # (2, K*K, HW)

    # Batch packing / grid sizing: blocks of a few MiB, but keep several grid
    # steps when possible (pipelining + megacore sharding of the batch axis).
    itemsize = jnp.dtype(x.dtype).itemsize
    per_batch = C * HW * itemsize
    bt_vmem = max(1, (2 * 1024 * 1024) // per_batch)   # ~2 MiB per block
    bt_steps = max(1, B // 4)                          # aim for >=4 steps
    Bt = int(max(1, min(B, bt_vmem, bt_steps)))
    while B % Bt:                                      # must tile B exactly
        Bt -= 1
    grid = (B // Bt,)

    # VMEM budget: double-buffered in/out blocks + resident MW + small temps.
    blk_bytes = Bt * per_batch
    mw_bytes = int(MW.size) * 4
    vmem_limit = 4 * blk_bytes + 2 * mw_bytes + 16 * Bt * HW * 4 + (8 << 20)
    vmem_limit = int(min(max(vmem_limit, 16 << 20), 64 << 20))

    kernel = _make_sa_kernel(Bt, C, HW, W, K, pad, x.dtype)

    out = pl.pallas_call(
        kernel,
        out_shape=jax.ShapeDtypeStruct((B, C, HW), x.dtype),
        grid_spec=pltpu.PrefetchScalarGridSpec(
            num_scalar_prefetch=0,
            grid=grid,
            in_specs=[
                pl.BlockSpec((Bt, C, HW), lambda b: (b, 0, 0)),     # x block
                pl.BlockSpec((2, K * K, HW), lambda b: (0, 0, 0)),  # resident
            ],
            out_specs=pl.BlockSpec((Bt, C, HW), lambda b: (b, 0, 0)),
        ),
        compiler_params=pltpu.CompilerParams(
            dimension_semantics=("parallel",),   # shard batch steps over TCs
            vmem_limit_bytes=vmem_limit,
        ),
    )(x2, MW)
    return out.reshape(B, C, H, W)


def _reference(x, conv_weight):
    """Direct translation of the PyTorch SA module."""
    avg = jnp.mean(x, axis=1, keepdims=True)
    mx = jnp.max(x, axis=1, keepdims=True)
    s = jnp.concatenate([avg, mx], axis=1)
    p = conv_weight.shape[-1] // 2
    conv = lax.conv_general_dilated(
        s, conv_weight[None].astype(jnp.float32),
        window_strides=(1, 1),
        padding=((p, p), (p, p)),
        dimension_numbers=("NCHW", "OIHW", "NCHW"),
        precision=lax.Precision.HIGHEST)
    return x * jax.nn.sigmoid(conv)


if __name__ == "__main__":
    key = jax.random.PRNGKey(0)
    B, C, H, W = 2, 4, 16, 16
    K = 7

    k_x, k_w = jax.random.split(key, 2)
    x = jax.random.normal(k_x, (B, C, H, W), dtype=jnp.float32)

    # Deterministic conv weight: Conv2d(2, 1, 7, bias=False) -> shape (2, 7, 7).
    lim = 1.0 / math.sqrt(2 * K * K)
    conv_weight = jax.random.uniform(k_w, (2, K, K), jnp.float32, -lim, lim)

    out = spatial_attention(x, conv_weight)
    out = jax.block_until_ready(out)

    ref = _reference(x, conv_weight)
    assert out.shape == (B, C, H, W)
    max_err = float(jnp.max(jnp.abs(out - ref)))
    assert jnp.allclose(out, ref, atol=2e-3, rtol=2e-3), f"max_err={max_err}"

    print("KERNEL_OK")
</pallas_src>

<mosaic_0001>
module attributes {stable_mosaic.version = 11 : i64} {
  func.func @kernel(%arg0: i32, %arg1: memref<1x4x256xf32, #tpu.memory_space<vmem>>, %arg2: memref<2x49x256xf32, #tpu.memory_space<vmem>>, %arg3: memref<1x4x256xf32, #tpu.memory_space<vmem>>) attributes {dimension_semantics = [#tpu.dimension_semantics<parallel>], iteration_bounds = array<i64: 2>, scalar_prefetch = 0 : i64, scratch_operands = 0 : i64, tpu.core_type = #tpu.core_type<tc>, window_params = [{transform_indices = @transform_0, window_bounds = array<i64: 1, 4, 256>}, {pipeline_mode = #tpu.pipeline_mode<synchronous>, transform_indices = @transform_1, window_bounds = array<i64: 2, 49, 256>}, {transform_indices = @transform_2, window_bounds = array<i64: 1, 4, 256>}]} {
    %cst = arith.constant 0.000000e+00 : f32
    %0 = vector.broadcast %cst : f32 to vector<1x256xf32>
    %cst_0 = arith.constant 0xFF800000 : f32
    %1 = vector.broadcast %cst_0 : f32 to vector<1x256xf32>
    %c0 = arith.constant 0 : index
    %c0_1 = arith.constant 0 : index
    %c0_2 = arith.constant 0 : index
    %2 = vector.load %arg1[%c0, %c0_1, %c0_2] : memref<1x4x256xf32, #tpu.memory_space<vmem>>, vector<1x4x256xf32>
    %cst_3 = arith.constant dense<0.000000e+00> : vector<1x256xf32>
    %3 = vector.multi_reduction <add>, %2, %cst_3 [1] : vector<1x4x256xf32> to vector<1x256xf32>
    %4 = arith.addf %0, %3 : vector<1x256xf32>
    %cst_4 = arith.constant dense<0xFF800000> : vector<1x256xf32>
    %5 = vector.multi_reduction <maximumf>, %2, %cst_4 [1] : vector<1x4x256xf32> to vector<1x256xf32>
    %6 = arith.maximumf %1, %5 : vector<1x256xf32>
    %cst_5 = arith.constant 2.500000e-01 : f32
    %7 = vector.broadcast %cst_5 : f32 to vector<1x256xf32>
    %8 = arith.mulf %4, %7 : vector<1x256xf32>
    %cst_6 = arith.constant 0.000000e+00 : f32
    %9 = vector.broadcast %cst_6 : f32 to vector<1x256xf32>
    %cst_7 = arith.constant 0.000000e+00 : f32
    %10 = vector.broadcast %cst_7 : f32 to vector<1x51xf32>
    %11 = vector.extract_strided_slice %8 {offsets = [0, 0], sizes = [1, 205], strides = [1, 1]} : vector<1x256xf32> to vector<1x205xf32>
    %12 = tpu.concatenate %10, %11 in 1 : vector<1x51xf32>, vector<1x205xf32> -> vector<1x256xf32>
    %c0_8 = arith.constant 0 : index
    %c0_9 = arith.constant 0 : index
    %c0_10 = arith.constant 0 : index
    %13 = vector.load %arg2[%c0_8, %c0_9, %c0_10] : memref<2x49x256xf32, #tpu.memory_space<vmem>>, vector<1x1x256xf32>
    %14 = vector.shape_cast %13 : vector<1x1x256xf32> to vector<1x256xf32>
    %15 = arith.mulf %12, %14 : vector<1x256xf32>
    %16 = arith.addf %9, %15 : vector<1x256xf32>
    %cst_11 = arith.constant 0.000000e+00 : f32
    %17 = vector.broadcast %cst_11 : f32 to vector<1x51xf32>
    %18 = vector.extract_strided_slice %6 {offsets = [0, 0], sizes = [1, 205], strides = [1, 1]} : vector<1x256xf32> to vector<1x205xf32>
    %19 = tpu.concatenate %17, %18 in 1 : vector<1x51xf32>, vector<1x205xf32> -> vector<1x256xf32>
    %c1 = arith.constant 1 : index
    %c0_12 = arith.constant 0 : index
    %c0_13 = arith.constant 0 : index
    %20 = vector.load %arg2[%c1, %c0_12, %c0_13] : memref<2x49x256xf32, #tpu.memory_space<vmem>>, vector<1x1x256xf32>
    %21 = vector.shape_cast %20 : vector<1x1x256xf32> to vector<1x256xf32>
    %22 = arith.mulf %19, %21 : vector<1x256xf32>
    %23 = arith.addf %16, %22 : vector<1x256xf32>
    %cst_14 = arith.constant 0.000000e+00 : f32
    %24 = vector.broadcast %cst_14 : f32 to vector<1x50xf32>
    %25 = vector.extract_strided_slice %8 {offsets = [0, 0], sizes = [1, 206], strides = [1, 1]} : vector<1x256xf32> to vector<1x206xf32>
    %26 = tpu.concatenate %24, %25 in 1 : vector<1x50xf32>, vector<1x206xf32> -> vector<1x256xf32>
    %c0_15 = arith.constant 0 : index
    %c1_16 = arith.constant 1 : index
    %c0_17 = arith.constant 0 : index
    %27 = vector.load %arg2[%c0_15, %c1_16, %c0_17] : memref<2x49x256xf32, #tpu.memory_space<vmem>>, vector<1x1x256xf32>
    %28 = vector.shape_cast %27 : vector<1x1x256xf32> to vector<1x256xf32>
    %29 = arith.mulf %26, %28 : vector<1x256xf32>
    %30 = arith.addf %23, %29 : vector<1x256xf32>
    %cst_18 = arith.constant 0.000000e+00 : f32
    %31 = vector.broadcast %cst_18 : f32 to vector<1x50xf32>
    %32 = vector.extract_strided_slice %6 {offsets = [0, 0], sizes = [1, 206], strides = [1, 1]} : vector<1x256xf32> to vector<1x206xf32>
    %33 = tpu.concatenate %31, %32 in 1 : vector<1x50xf32>, vector<1x206xf32> -> vector<1x256xf32>
    %c1_19 = arith.constant 1 : index
    %c1_20 = arith.constant 1 : index
    %c0_21 = arith.constant 0 : index
    %34 = vector.load %arg2[%c1_19, %c1_20, %c0_21] : memref<2x49x256xf32, #tpu.memory_space<vmem>>, vector<1x1x256xf32>
    %35 = vector.shape_cast %34 : vector<1x1x256xf32> to vector<1x256xf32>
    %36 = arith.mulf %33, %35 : vector<1x256xf32>
    %37 = arith.addf %30, %36 : vector<1x256xf32>
    %cst_22 = arith.constant 0.000000e+00 : f32
    %38 = vector.broadcast %cst_22 : f32 to vector<1x49xf32>
    %39 = vector.extract_strided_slice %8 {offsets = [0, 0], sizes = [1, 207], strides = [1, 1]} : vector<1x256xf32> to vector<1x207xf32>
    %40 = tpu.concatenate %38, %39 in 1 : vector<1x49xf32>, vector<1x207xf32> -> vector<1x256xf32>
    %c0_23 = arith.constant 0 : index
    %c2 = arith.constant 2 : index
    %c0_24 = arith.constant 0 : index
    %41 = vector.load %arg2[%c0_23, %c2, %c0_24] : memref<2x49x256xf32, #tpu.memory_space<vmem>>, vector<1x1x256xf32>
    %42 = vector.shape_cast %41 : vector<1x1x256xf32> to vector<1x256xf32>
    %43 = arith.mulf %40, %42 : vector<1x256xf32>
    %44 = arith.addf %37, %43 : vector<1x256xf32>
    %cst_25 = arith.constant 0.000000e+00 : f32
    %45 = vector.broadcast %cst_25 : f32 to vector<1x49xf32>
    %46 = vector.extract_strided_slice %6 {offsets = [0, 0], sizes = [1, 207], strides = [1, 1]} : vector<1x256xf32> to vector<1x207xf32>
    %47 = tpu.concatenate %45, %46 in 1 : vector<1x49xf32>, vector<1x207xf32> -> vector<1x256xf32>
    %c1_26 = arith.constant 1 : index
    %c2_27 = arith.constant 2 : index
    %c0_28 = arith.constant 0 : index
    %48 = vector.load %arg2[%c1_26, %c2_27, %c0_28] : memref<2x49x256xf32, #tpu.memory_space<vmem>>, vector<1x1x256xf32>
    %49 = vector.shape_cast %48 : vector<1x1x256xf32> to vector<1x256xf32>
    %50 = arith.mulf %47, %49 : vector<1x256xf32>
    %51 = arith.addf %44, %50 : vector<1x256xf32>
    %cst_29 = arith.constant 0.000000e+00 : f32
    %52 = vector.broadcast %cst_29 : f32 to vector<1x48xf32>
    %53 = vector.extract_strided_slice %8 {offsets = [0, 0], sizes = [1, 208], strides = [1, 1]} : vector<1x256xf32> to vector<1x208xf32>
    %54 = tpu.concatenate %52, %53 in 1 : vector<1x48xf32>, vector<1x208xf32> -> vector<1x256xf32>
    %c0_30 = arith.constant 0 : index
    %c3 = arith.constant 3 : index
    %c0_31 = arith.constant 0 : index
    %55 = vector.load %arg2[%c0_30, %c3, %c0_31] : memref<2x49x256xf32, #tpu.memory_space<vmem>>, vector<1x1x256xf32>
    %56 = vector.shape_cast %55 : vector<1x1x256xf32> to vector<1x256xf32>
    %57 = arith.mulf %54, %56 : vector<1x256xf32>
    %58 = arith.addf %51, %57 : vector<1x256xf32>
    %cst_32 = arith.constant 0.000000e+00 : f32
    %59 = vector.broadcast %cst_32 : f32 to vector<1x48xf32>
    %60 = vector.extract_strided_slice %6 {offsets = [0, 0], sizes = [1, 208], strides = [1, 1]} : vector<1x256xf32> to vector<1x208xf32>
    %61 = tpu.concatenate %59, %60 in 1 : vector<1x48xf32>, vector<1x208xf32> -> vector<1x256xf32>
    %c1_33 = arith.constant 1 : index
    %c3_34 = arith.constant 3 : index
    %c0_35 = arith.constant 0 : index
    %62 = vector.load %arg2[%c1_33, %c3_34, %c0_35] : memref<2x49x256xf32, #tpu.memory_space<vmem>>, vector<1x1x256xf32>
    %63 = vector.shape_cast %62 : vector<1x1x256xf32> to vector<1x256xf32>
    %64 = arith.mulf %61, %63 : vector<1x256xf32>
    %65 = arith.addf %58, %64 : vector<1x256xf32>
    %cst_36 = arith.constant 0.000000e+00 : f32
    %66 = vector.broadcast %cst_36 : f32 to vector<1x47xf32>
    %67 = vector.extract_strided_slice %8 {offsets = [0, 0], sizes = [1, 209], strides = [1, 1]} : vector<1x256xf32> to vector<1x209xf32>
    %68 = tpu.concatenate %66, %67 in 1 : vector<1x47xf32>, vector<1x209xf32> -> vector<1x256xf32>
    %c0_37 = arith.constant 0 : index
    %c4 = arith.constant 4 : index
    %c0_38 = arith.constant 0 : index
    %69 = vector.load %arg2[%c0_37, %c4, %c0_38] : memref<2x49x256xf32, #tpu.memory_space<vmem>>, vector<1x1x256xf32>
    %70 = vector.shape_cast %69 : vector<1x1x256xf32> to vector<1x256xf32>
    %71 = arith.mulf %68, %70 : vector<1x256xf32>
    %72 = arith.addf %65, %71 : vector<1x256xf32>
    %cst_39 = arith.constant 0.000000e+00 : f32
    %73 = vector.broadcast %cst_39 : f32 to vector<1x47xf32>
    %74 = vector.extract_strided_slice %6 {offsets = [0, 0], sizes = [1, 209], strides = [1, 1]} : vector<1x256xf32> to vector<1x209xf32>
    %75 = tpu.concatenate %73, %74 in 1 : vector<1x47xf32>, vector<1x209xf32> -> vector<1x256xf32>
    %c1_40 = arith.constant 1 : index
    %c4_41 = arith.constant 4 : index
    %c0_42 = arith.constant 0 : index
    %76 = vector.load %arg2[%c1_40, %c4_41, %c0_42] : memref<2x49x256xf32, #tpu.memory_space<vmem>>, vector<1x1x256xf32>
    %77 = vector.shape_cast %76 : vector<1x1x256xf32> to vector<1x256xf32>
    %78 = arith.mulf %75, %77 : vector<1x256xf32>
    %79 = arith.addf %72, %78 : vector<1x256xf32>
    %cst_43 = arith.constant 0.000000e+00 : f32
    %80 = vector.broadcast %cst_43 : f32 to vector<1x46xf32>
    %81 = vector.extract_strided_slice %8 {offsets = [0, 0], sizes = [1, 210], strides = [1, 1]} : vector<1x256xf32> to vector<1x210xf32>
    %82 = tpu.concatenate %80, %81 in 1 : vector<1x46xf32>, vector<1x210xf32> -> vector<1x256xf32>
    %c0_44 = arith.constant 0 : index
    %c5 = arith.constant 5 : index
    %c0_45 = arith.constant 0 : index
    %83 = vector.load %arg2[%c0_44, %c5, %c0_45] : memref<2x49x256xf32, #tpu.memory_space<vmem>>, vector<1x1x256xf32>
    %84 = vector.shape_cast %83 : vector<1x1x256xf32> to vector<1x256xf32>
    %85 = arith.mulf %82, %84 : vector<1x256xf32>
    %86 = arith.addf %79, %85 : vector<1x256xf32>
    %cst_46 = arith.constant 0.000000e+00 : f32
    %87 = vector.broadcast %cst_46 : f32 to vector<1x46xf32>
    %88 = vector.extract_strided_slice %6 {offsets = [0, 0], sizes = [1, 210], strides = [1, 1]} : vector<1x256xf32> to vector<1x210xf32>
    %89 = tpu.concatenate %87, %88 in 1 : vector<1x46xf32>, vector<1x210xf32> -> vector<1x256xf32>
    %c1_47 = arith.constant 1 : index
    %c5_48 = arith.constant 5 : index
    %c0_49 = arith.constant 0 : index
    %90 = vector.load %arg2[%c1_47, %c5_48, %c0_49] : memref<2x49x256xf32, #tpu.memory_space<vmem>>, vector<1x1x256xf32>
    %91 = vector.shape_cast %90 : vector<1x1x256xf32> to vector<1x256xf32>
    %92 = arith.mulf %89, %91 : vector<1x256xf32>
    %93 = arith.addf %86, %92 : vector<1x256xf32>
    %cst_50 = arith.constant 0.000000e+00 : f32
    %94 = vector.broadcast %cst_50 : f32 to vector<1x45xf32>
    %95 = vector.extract_strided_slice %8 {offsets = [0, 0], sizes = [1, 211], strides = [1, 1]} : vector<1x256xf32> to vector<1x211xf32>
    %96 = tpu.concatenate %94, %95 in 1 : vector<1x45xf32>, vector<1x211xf32> -> vector<1x256xf32>
    %c0_51 = arith.constant 0 : index
    %c6 = arith.constant 6 : index
    %c0_52 = arith.constant 0 : index
    %97 = vector.load %arg2[%c0_51, %c6, %c0_52] : memref<2x49x256xf32, #tpu.memory_space<vmem>>, vector<1x1x256xf32>
    %98 = vector.shape_cast %97 : vector<1x1x256xf32> to vector<1x256xf32>
    %99 = arith.mulf %96, %98 : vector<1x256xf32>
    %100 = arith.addf %93, %99 : vector<1x256xf32>
    %cst_53 = arith.constant 0.000000e+00 : f32
    %101 = vector.broadcast %cst_53 : f32 to vector<1x45xf32>
    %102 = vector.extract_strided_slice %6 {offsets = [0, 0], sizes = [1, 211], strides = [1, 1]} : vector<1x256xf32> to vector<1x211xf32>
    %103 = tpu.concatenate %101, %102 in 1 : vector<1x45xf32>, vector<1x211xf32> -> vector<1x256xf32>
    %c1_54 = arith.constant 1 : index
    %c6_55 = arith.constant 6 : index
    %c0_56 = arith.constant 0 : index
    %104 = vector.load %arg2[%c1_54, %c6_55, %c0_56] : memref<2x49x256xf32, #tpu.memory_space<vmem>>, vector<1x1x256xf32>
    %105 = vector.shape_cast %104 : vector<1x1x256xf32> to vector<1x256xf32>
    %106 = arith.mulf %103, %105 : vector<1x256xf32>
    %107 = arith.addf %100, %106 : vector<1x256xf32>
    %cst_57 = arith.constant 0.000000e+00 : f32
    %108 = vector.broadcast %cst_57 : f32 to vector<1x35xf32>
    %109 = vector.extract_strided_slice %8 {offsets = [0, 0], sizes = [1, 221], strides = [1, 1]} : vector<1x256xf32> to vector<1x221xf32>
    %110 = tpu.concatenate %108, %109 in 1 : vector<1x35xf32>, vector<1x221xf32> -> vector<1x256xf32>
    %c0_58 = arith.constant 0 : index
    %c7 = arith.constant 7 : index
    %c0_59 = arith.constant 0 : index
    %111 = vector.load %arg2[%c0_58, %c7, %c0_59] : memref<2x49x256xf32, #tpu.memory_space<vmem>>, vector<1x1x256xf32>
    %112 = vector.shape_cast %111 : vector<1x1x256xf32> to vector<1x256xf32>
    %113 = arith.mulf %110, %112 : vector<1x256xf32>
    %114 = arith.addf %107, %113 : vector<1x256xf32>
    %cst_60 = arith.constant 0.000000e+00 : f32
    %115 = vector.broadcast %cst_60 : f32 to vector<1x35xf32>
    %116 = vector.extract_strided_slice %6 {offsets = [0, 0], sizes = [1, 221], strides = [1, 1]} : vector<1x256xf32> to vector<1x221xf32>
    %117 = tpu.concatenate %115, %116 in 1 : vector<1x35xf32>, vector<1x221xf32> -> vector<1x256xf32>
    %c1_61 = arith.constant 1 : index
    %c7_62 = arith.constant 7 : index
    %c0_63 = arith.constant 0 : index
    %118 = vector.load %arg2[%c1_61, %c7_62, %c0_63] : memref<2x49x256xf32, #tpu.memory_space<vmem>>, vector<1x1x256xf32>
    %119 = vector.shape_cast %118 : vector<1x1x256xf32> to vector<1x256xf32>
    %120 = arith.mulf %117, %119 : vector<1x256xf32>
    %121 = arith.addf %114, %120 : vector<1x256xf32>
    %cst_64 = arith.constant 0.000000e+00 : f32
    %122 = vector.broadcast %cst_64 : f32 to vector<1x34xf32>
    %123 = vector.extract_strided_slice %8 {offsets = [0, 0], sizes = [1, 222], strides = [1, 1]} : vector<1x256xf32> to vector<1x222xf32>
    %124 = tpu.concatenate %122, %123 in 1 : vector<1x34xf32>, vector<1x222xf32> -> vector<1x256xf32>
    %c0_65 = arith.constant 0 : index
    %c8 = arith.constant 8 : index
    %c0_66 = arith.constant 0 : index
    %125 = vector.load %arg2[%c0_65, %c8, %c0_66] : memref<2x49x256xf32, #tpu.memory_space<vmem>>, vector<1x1x256xf32>
    %126 = vector.shape_cast %125 : vector<1x1x256xf32> to vector<1x256xf32>
    %127 = arith.mulf %124, %126 : vector<1x256xf32>
    %128 = arith.addf %121, %127 : vector<1x256xf32>
    %cst_67 = arith.constant 0.000000e+00 : f32
    %129 = vector.broadcast %cst_67 : f32 to vector<1x34xf32>
    %130 = vector.extract_strided_slice %6 {offsets = [0, 0], sizes = [1, 222], strides = [1, 1]} : vector<1x256xf32> to vector<1x222xf32>
    %131 = tpu.concatenate %129, %130 in 1 : vector<1x34xf32>, vector<1x222xf32> -> vector<1x256xf32>
    %c1_68 = arith.constant 1 : index
    %c8_69 = arith.constant 8 : index
    %c0_70 = arith.constant 0 : index
    %132 = vector.load %arg2[%c1_68, %c8_69, %c0_70] : memref<2x49x256xf32, #tpu.memory_space<vmem>>, vector<1x1x256xf32>
    %133 = vector.shape_cast %132 : vector<1x1x256xf32> to vector<1x256xf32>
    %134 = arith.mulf %131, %133 : vector<1x256xf32>
    %135 = arith.addf %128, %134 : vector<1x256xf32>
    %cst_71 = arith.constant 0.000000e+00 : f32
    %136 = vector.broadcast %cst_71 : f32 to vector<1x33xf32>
    %137 = vector.extract_strided_slice %8 {offsets = [0, 0], sizes = [1, 223], strides = [1, 1]} : vector<1x256xf32> to vector<1x223xf32>
    %138 = tpu.concatenate %136, %137 in 1 : vector<1x33xf32>, vector<1x223xf32> -> vector<1x256xf32>
    %c0_72 = arith.constant 0 : index
    %c9 = arith.constant 9 : index
    %c0_73 = arith.constant 0 : index
    %139 = vector.load %arg2[%c0_72, %c9, %c0_73] : memref<2x49x256xf32, #tpu.memory_space<vmem>>, vector<1x1x256xf32>
    %140 = vector.shape_cast %139 : vector<1x1x256xf32> to vector<1x256xf32>
    %141 = arith.mulf %138, %140 : vector<1x256xf32>
    %142 = arith.addf %135, %141 : vector<1x256xf32>
    %cst_74 = arith.constant 0.000000e+00 : f32
    %143 = vector.broadcast %cst_74 : f32 to vector<1x33xf32>
    %144 = vector.extract_strided_slice %6 {offsets = [0, 0], sizes = [1, 223], strides = [1, 1]} : vector<1x256xf32> to vector<1x223xf32>
    %145 = tpu.concatenate %143, %144 in 1 : vector<1x33xf32>, vector<1x223xf32> -> vector<1x256xf32>
    %c1_75 = arith.constant 1 : index
    %c9_76 = arith.constant 9 : index
    %c0_77 = arith.constant 0 : index
    %146 = vector.load %arg2[%c1_75, %c9_76, %c0_77] : memref<2x49x256xf32, #tpu.memory_space<vmem>>, vector<1x1x256xf32>
    %147 = vector.shape_cast %146 : vector<1x1x256xf32> to vector<1x256xf32>
    %148 = arith.mulf %145, %147 : vector<1x256xf32>
    %149 = arith.addf %142, %148 : vector<1x256xf32>
    %cst_78 = arith.constant 0.000000e+00 : f32
    %150 = vector.broadcast %cst_78 : f32 to vector<1x32xf32>
    %151 = vector.extract_strided_slice %8 {offsets = [0, 0], sizes = [1, 224], strides = [1, 1]} : vector<1x256xf32> to vector<1x224xf32>
    %152 = tpu.concatenate %150, %151 in 1 : vector<1x32xf32>, vector<1x224xf32> -> vector<1x256xf32>
    %c0_79 = arith.constant 0 : index
    %c10 = arith.constant 10 : index
    %c0_80 = arith.constant 0 : index
    %153 = vector.load %arg2[%c0_79, %c10, %c0_80] : memref<2x49x256xf32, #tpu.memory_space<vmem>>, vector<1x1x256xf32>
    %154 = vector.shape_cast %153 : vector<1x1x256xf32> to vector<1x256xf32>
    %155 = arith.mulf %152, %154 : vector<1x256xf32>
    %156 = arith.addf %149, %155 : vector<1x256xf32>
    %cst_81 = arith.constant 0.000000e+00 : f32
    %157 = vector.broadcast %cst_81 : f32 to vector<1x32xf32>
    %158 = vector.extract_strided_slice %6 {offsets = [0, 0], sizes = [1, 224], strides = [1, 1]} : vector<1x256xf32> to vector<1x224xf32>
    %159 = tpu.concatenate %157, %158 in 1 : vector<1x32xf32>, vector<1x224xf32> -> vector<1x256xf32>
    %c1_82 = arith.constant 1 : index
    %c10_83 = arith.constant 10 : index
    %c0_84 = arith.constant 0 : index
    %160 = vector.load %arg2[%c1_82, %c10_83, %c0_84] : memref<2x49x256xf32, #tpu.memory_space<vmem>>, vector<1x1x256xf32>
    %161 = vector.shape_cast %160 : vector<1x1x256xf32> to vector<1x256xf32>
    %162 = arith.mulf %159, %161 : vector<1x256xf32>
    %163 = arith.addf %156, %162 : vector<1x256xf32>
    %cst_85 = arith.constant 0.000000e+00 : f32
    %164 = vector.broadcast %cst_85 : f32 to vector<1x31xf32>
    %165 = vector.extract_strided_slice %8 {offsets = [0, 0], sizes = [1, 225], strides = [1, 1]} : vector<1x256xf32> to vector<1x225xf32>
    %166 = tpu.concatenate %164, %165 in 1 : vector<1x31xf32>, vector<1x225xf32> -> vector<1x256xf32>
    %c0_86 = arith.constant 0 : index
    %c11 = arith.constant 11 : index
    %c0_87 = arith.constant 0 : index
    %167 = vector.load %arg2[%c0_86, %c11, %c0_87] : memref<2x49x256xf32, #tpu.memory_space<vmem>>, vector<1x1x256xf32>
    %168 = vector.shape_cast %167 : vector<1x1x256xf32> to vector<1x256xf32>
    %169 = arith.mulf %166, %168 : vector<1x256xf32>
    %170 = arith.addf %163, %169 : vector<1x256xf32>
    %cst_88 = arith.constant 0.000000e+00 : f32
    %171 = vector.broadcast %cst_88 : f32 to vector<1x31xf32>
    %172 = vector.extract_strided_slice %6 {offsets = [0, 0], sizes = [1, 225], strides = [1, 1]} : vector<1x256xf32> to vector<1x225xf32>
    %173 = tpu.concatenate %171, %172 in 1 : vector<1x31xf32>, vector<1x225xf32> -> vector<1x256xf32>
    %c1_89 = arith.constant 1 : index
    %c11_90 = arith.constant 11 : index
    %c0_91 = arith.constant 0 : index
    %174 = vector.load %arg2[%c1_89, %c11_90, %c0_91] : memref<2x49x256xf32, #tpu.memory_space<vmem>>, vector<1x1x256xf32>
    %175 = vector.shape_cast %174 : vector<1x1x256xf32> to vector<1x256xf32>
    %176 = arith.mulf %173, %175 : vector<1x256xf32>
    %177 = arith.addf %170, %176 : vector<1x256xf32>
    %cst_92 = arith.constant 0.000000e+00 : f32
    %178 = vector.broadcast %cst_92 : f32 to vector<1x30xf32>
    %179 = vector.extract_strided_slice %8 {offsets = [0, 0], sizes = [1, 226], strides = [1, 1]} : vector<1x256xf32> to vector<1x226xf32>
    %180 = tpu.concatenate %178, %179 in 1 : vector<1x30xf32>, vector<1x226xf32> -> vector<1x256xf32>
    %c0_93 = arith.constant 0 : index
    %c12 = arith.constant 12 : index
    %c0_94 = arith.constant 0 : index
    %181 = vector.load %arg2[%c0_93, %c12, %c0_94] : memref<2x49x256xf32, #tpu.memory_space<vmem>>, vector<1x1x256xf32>
    %182 = vector.shape_cast %181 : vector<1x1x256xf32> to vector<1x256xf32>
    %183 = arith.mulf %180, %182 : vector<1x256xf32>
    %184 = arith.addf %177, %183 : vector<1x256xf32>
    %cst_95 = arith.constant 0.000000e+00 : f32
    %185 = vector.broadcast %cst_95 : f32 to vector<1x30xf32>
    %186 = vector.extract_strided_slice %6 {offsets = [0, 0], sizes = [1, 226], strides = [1, 1]} : vector<1x256xf32> to vector<1x226xf32>
    %187 = tpu.concatenate %185, %186 in 1 : vector<1x30xf32>, vector<1x226xf32> -> vector<1x256xf32>
    %c1_96 = arith.constant 1 : index
    %c12_97 = arith.constant 12 : index
    %c0_98 = arith.constant 0 : index
    %188 = vector.load %arg2[%c1_96, %c12_97, %c0_98] : memref<2x49x256xf32, #tpu.memory_space<vmem>>, vector<1x1x256xf32>
    %189 = vector.shape_cast %188 : vector<1x1x256xf32> to vector<1x256xf32>
    %190 = arith.mulf %187, %189 : vector<1x256xf32>
    %191 = arith.addf %184, %190 : vector<1x256xf32>
    %cst_99 = arith.constant 0.000000e+00 : f32
    %192 = vector.broadcast %cst_99 : f32 to vector<1x29xf32>
    %193 = vector.extract_strided_slice %8 {offsets = [0, 0], sizes = [1, 227], strides = [1, 1]} : vector<1x256xf32> to vector<1x227xf32>
    %194 = tpu.concatenate %192, %193 in 1 : vector<1x29xf32>, vector<1x227xf32> -> vector<1x256xf32>
    %c0_100 = arith.constant 0 : index
    %c13 = arith.constant 13 : index
    %c0_101 = arith.constant 0 : index
    %195 = vector.load %arg2[%c0_100, %c13, %c0_101] : memref<2x49x256xf32, #tpu.memory_space<vmem>>, vector<1x1x256xf32>
    %196 = vector.shape_cast %195 : vector<1x1x256xf32> to vector<1x256xf32>
    %197 = arith.mulf %194, %196 : vector<1x256xf32>
    %198 = arith.addf %191, %197 : vector<1x256xf32>
    %cst_102 = arith.constant 0.000000e+00 : f32
    %199 = vector.broadcast %cst_102 : f32 to vector<1x29xf32>
    %200 = vector.extract_strided_slice %6 {offsets = [0, 0], sizes = [1, 227], strides = [1, 1]} : vector<1x256xf32> to vector<1x227xf32>
    %201 = tpu.concatenate %199, %200 in 1 : vector<1x29xf32>, vector<1x227xf32> -> vector<1x256xf32>
    %c1_103 = arith.constant 1 : index
    %c13_104 = arith.constant 13 : index
    %c0_105 = arith.constant 0 : index
    %202 = vector.load %arg2[%c1_103, %c13_104, %c0_105] : memref<2x49x256xf32, #tpu.memory_space<vmem>>, vector<1x1x256xf32>
    %203 = vector.shape_cast %202 : vector<1x1x256xf32> to vector<1x256xf32>
    %204 = arith.mulf %201, %203 : vector<1x256xf32>
    %205 = arith.addf %198, %204 : vector<1x256xf32>
    %cst_106 = arith.constant 0.000000e+00 : f32
    %206 = vector.broadcast %cst_106 : f32 to vector<1x19xf32>
    %207 = vector.extract_strided_slice %8 {offsets = [0, 0], sizes = [1, 237], strides = [1, 1]} : vector<1x256xf32> to vector<1x237xf32>
    %208 = tpu.concatenate %206, %207 in 1 : vector<1x19xf32>, vector<1x237xf32> -> vector<1x256xf32>
    %c0_107 = arith.constant 0 : index
    %c14 = arith.constant 14 : index
    %c0_108 = arith.constant 0 : index
    %209 = vector.load %arg2[%c0_107, %c14, %c0_108] : memref<2x49x256xf32, #tpu.memory_space<vmem>>, vector<1x1x256xf32>
    %210 = vector.shape_cast %209 : vector<1x1x256xf32> to vector<1x256xf32>
    %211 = arith.mulf %208, %210 : vector<1x256xf32>
    %212 = arith.addf %205, %211 : vector<1x256xf32>
    %cst_109 = arith.constant 0.000000e+00 : f32
    %213 = vector.broadcast %cst_109 : f32 to vector<1x19xf32>
    %214 = vector.extract_strided_slice %6 {offsets = [0, 0], sizes = [1, 237], strides = [1, 1]} : vector<1x256xf32> to vector<1x237xf32>
    %215 = tpu.concatenate %213, %214 in 1 : vector<1x19xf32>, vector<1x237xf32> -> vector<1x256xf32>
    %c1_110 = arith.constant 1 : index
    %c14_111 = arith.constant 14 : index
    %c0_112 = arith.constant 0 : index
    %216 = vector.load %arg2[%c1_110, %c14_111, %c0_112] : memref<2x49x256xf32, #tpu.memory_space<vmem>>, vector<1x1x256xf32>
    %217 = vector.shape_cast %216 : vector<1x1x256xf32> to vector<1x256xf32>
    %218 = arith.mulf %215, %217 : vector<1x256xf32>
    %219 = arith.addf %212, %218 : vector<1x256xf32>
    %cst_113 = arith.constant 0.000000e+00 : f32
    %220 = vector.broadcast %cst_113 : f32 to vector<1x18xf32>
    %221 = vector.extract_strided_slice %8 {offsets = [0, 0], sizes = [1, 238], strides = [1, 1]} : vector<1x256xf32> to vector<1x238xf32>
    %222 = tpu.concatenate %220, %221 in 1 : vector<1x18xf32>, vector<1x238xf32> -> vector<1x256xf32>
    %c0_114 = arith.constant 0 : index
    %c15 = arith.constant 15 : index
    %c0_115 = arith.constant 0 : index
    %223 = vector.load %arg2[%c0_114, %c15, %c0_115] : memref<2x49x256xf32, #tpu.memory_space<vmem>>, vector<1x1x256xf32>
    %224 = vector.shape_cast %223 : vector<1x1x256xf32> to vector<1x256xf32>
    %225 = arith.mulf %222, %224 : vector<1x256xf32>
    %226 = arith.addf %219, %225 : vector<1x256xf32>
    %cst_116 = arith.constant 0.000000e+00 : f32
    %227 = vector.broadcast %cst_116 : f32 to vector<1x18xf32>
    %228 = vector.extract_strided_slice %6 {offsets = [0, 0], sizes = [1, 238], strides = [1, 1]} : vector<1x256xf32> to vector<1x238xf32>
    %229 = tpu.concatenate %227, %228 in 1 : vector<1x18xf32>, vector<1x238xf32> -> vector<1x256xf32>
    %c1_117 = arith.constant 1 : index
    %c15_118 = arith.constant 15 : index
    %c0_119 = arith.constant 0 : index
    %230 = vector.load %arg2[%c1_117, %c15_118, %c0_119] : memref<2x49x256xf32, #tpu.memory_space<vmem>>, vector<1x1x256xf32>
    %231 = vector.shape_cast %230 : vector<1x1x256xf32> to vector<1x256xf32>
    %232 = arith.mulf %229, %231 : vector<1x256xf32>
    %233 = arith.addf %226, %232 : vector<1x256xf32>
    %cst_120 = arith.constant 0.000000e+00 : f32
    %234 = vector.broadcast %cst_120 : f32 to vector<1x17xf32>
    %235 = vector.extract_strided_slice %8 {offsets = [0, 0], sizes = [1, 239], strides = [1, 1]} : vector<1x256xf32> to vector<1x239xf32>
    %236 = tpu.concatenate %234, %235 in 1 : vector<1x17xf32>, vector<1x239xf32> -> vector<1x256xf32>
    %c0_121 = arith.constant 0 : index
    %c16 = arith.constant 16 : index
    %c0_122 = arith.constant 0 : index
    %237 = vector.load %arg2[%c0_121, %c16, %c0_122] : memref<2x49x256xf32, #tpu.memory_space<vmem>>, vector<1x1x256xf32>
    %238 = vector.shape_cast %237 : vector<1x1x256xf32> to vector<1x256xf32>
    %239 = arith.mulf %236, %238 : vector<1x256xf32>
    %240 = arith.addf %233, %239 : vector<1x256xf32>
    %cst_123 = arith.constant 0.000000e+00 : f32
    %241 = vector.broadcast %cst_123 : f32 to vector<1x17xf32>
    %242 = vector.extract_strided_slice %6 {offsets = [0, 0], sizes = [1, 239], strides = [1, 1]} : vector<1x256xf32> to vector<1x239xf32>
    %243 = tpu.concatenate %241, %242 in 1 : vector<1x17xf32>, vector<1x239xf32> -> vector<1x256xf32>
    %c1_124 = arith.constant 1 : index
    %c16_125 = arith.constant 16 : index
    %c0_126 = arith.constant 0 : index
    %244 = vector.load %arg2[%c1_124, %c16_125, %c0_126] : memref<2x49x256xf32, #tpu.memory_space<vmem>>, vector<1x1x256xf32>
    %245 = vector.shape_cast %244 : vector<1x1x256xf32> to vector<1x256xf32>
    %246 = arith.mulf %243, %245 : vector<1x256xf32>
    %247 = arith.addf %240, %246 : vector<1x256xf32>
    %cst_127 = arith.constant 0.000000e+00 : f32
    %248 = vector.broadcast %cst_127 : f32 to vector<1x16xf32>
    %249 = vector.extract_strided_slice %8 {offsets = [0, 0], sizes = [1, 240], strides = [1, 1]} : vector<1x256xf32> to vector<1x240xf32>
    %250 = tpu.concatenate %248, %249 in 1 : vector<1x16xf32>, vector<1x240xf32> -> vector<1x256xf32>
    %c0_128 = arith.constant 0 : index
    %c17 = arith.constant 17 : index
    %c0_129 = arith.constant 0 : index
    %251 = vector.load %arg2[%c0_128, %c17, %c0_129] : memref<2x49x256xf32, #tpu.memory_space<vmem>>, vector<1x1x256xf32>
    %252 = vector.shape_cast %251 : vector<1x1x256xf32> to vector<1x256xf32>
    %253 = arith.mulf %250, %252 : vector<1x256xf32>
    %254 = arith.addf %247, %253 : vector<1x256xf32>
    %cst_130 = arith.constant 0.000000e+00 : f32
    %255 = vector.broadcast %cst_130 : f32 to vector<1x16xf32>
    %256 = vector.extract_strided_slice %6 {offsets = [0, 0], sizes = [1, 240], strides = [1, 1]} : vector<1x256xf32> to vector<1x240xf32>
    %257 = tpu.concatenate %255, %256 in 1 : vector<1x16xf32>, vector<1x240xf32> -> vector<1x256xf32>
    %c1_131 = arith.constant 1 : index
    %c17_132 = arith.constant 17 : index
    %c0_133 = arith.constant 0 : index
    %258 = vector.load %arg2[%c1_131, %c17_132, %c0_133] : memref<2x49x256xf32, #tpu.memory_space<vmem>>, vector<1x1x256xf32>
    %259 = vector.shape_cast %258 : vector<1x1x256xf32> to vector<1x256xf32>
    %260 = arith.mulf %257, %259 : vector<1x256xf32>
    %261 = arith.addf %254, %260 : vector<1x256xf32>
    %cst_134 = arith.constant 0.000000e+00 : f32
    %262 = vector.broadcast %cst_134 : f32 to vector<1x15xf32>
    %263 = vector.extract_strided_slice %8 {offsets = [0, 0], sizes = [1, 241], strides = [1, 1]} : vector<1x256xf32> to vector<1x241xf32>
    %264 = tpu.concatenate %262, %263 in 1 : vector<1x15xf32>, vector<1x241xf32> -> vector<1x256xf32>
    %c0_135 = arith.constant 0 : index
    %c18 = arith.constant 18 : index
    %c0_136 = arith.constant 0 : index
    %265 = vector.load %arg2[%c0_135, %c18, %c0_136] : memref<2x49x256xf32, #tpu.memory_space<vmem>>, vector<1x1x256xf32>
    %266 = vector.shape_cast %265 : vector<1x1x256xf32> to vector<1x256xf32>
    %267 = arith.mulf %264, %266 : vector<1x256xf32>
    %268 = arith.addf %261, %267 : vector<1x256xf32>
    %cst_137 = arith.constant 0.000000e+00 : f32
    %269 = vector.broadcast %cst_137 : f32 to vector<1x15xf32>
    %270 = vector.extract_strided_slice %6 {offsets = [0, 0], sizes = [1, 241], strides = [1, 1]} : vector<1x256xf32> to vector<1x241xf32>
    %271 = tpu.concatenate %269, %270 in 1 : vector<1x15xf32>, vector<1x241xf32> -> vector<1x256xf32>
    %c1_138 = arith.constant 1 : index
    %c18_139 = arith.constant 18 : index
    %c0_140 = arith.constant 0 : index
    %272 = vector.load %arg2[%c1_138, %c18_139, %c0_140] : memref<2x49x256xf32, #tpu.memory_space<vmem>>, vector<1x1x256xf32>
    %273 = vector.shape_cast %272 : vector<1x1x256xf32> to vector<1x256xf32>
    %274 = arith.mulf %271, %273 : vector<1x256xf32>
    %275 = arith.addf %268, %274 : vector<1x256xf32>
    %cst_141 = arith.constant 0.000000e+00 : f32
    %276 = vector.broadcast %cst_141 : f32 to vector<1x14xf32>
    %277 = vector.extract_strided_slice %8 {offsets = [0, 0], sizes = [1, 242], strides = [1, 1]} : vector<1x256xf32> to vector<1x242xf32>
    %278 = tpu.concatenate %276, %277 in 1 : vector<1x14xf32>, vector<1x242xf32> -> vector<1x256xf32>
    %c0_142 = arith.constant 0 : index
    %c19 = arith.constant 19 : index
    %c0_143 = arith.constant 0 : index
    %279 = vector.load %arg2[%c0_142, %c19, %c0_143] : memref<2x49x256xf32, #tpu.memory_space<vmem>>, vector<1x1x256xf32>
    %280 = vector.shape_cast %279 : vector<1x1x256xf32> to vector<1x256xf32>
    %281 = arith.mulf %278, %280 : vector<1x256xf32>
    %282 = arith.addf %275, %281 : vector<1x256xf32>
    %cst_144 = arith.constant 0.000000e+00 : f32
    %283 = vector.broadcast %cst_144 : f32 to vector<1x14xf32>
    %284 = vector.extract_strided_slice %6 {offsets = [0, 0], sizes = [1, 242], strides = [1, 1]} : vector<1x256xf32> to vector<1x242xf32>
    %285 = tpu.concatenate %283, %284 in 1 : vector<1x14xf32>, vector<1x242xf32> -> vector<1x256xf32>
    %c1_145 = arith.constant 1 : index
    %c19_146 = arith.constant 19 : index
    %c0_147 = arith.constant 0 : index
    %286 = vector.load %arg2[%c1_145, %c19_146, %c0_147] : memref<2x49x256xf32, #tpu.memory_space<vmem>>, vector<1x1x256xf32>
    %287 = vector.shape_cast %286 : vector<1x1x256xf32> to vector<1x256xf32>
    %288 = arith.mulf %285, %287 : vector<1x256xf32>
    %289 = arith.addf %282, %288 : vector<1x256xf32>
    %cst_148 = arith.constant 0.000000e+00 : f32
    %290 = vector.broadcast %cst_148 : f32 to vector<1x13xf32>
    %291 = vector.extract_strided_slice %8 {offsets = [0, 0], sizes = [1, 243], strides = [1, 1]} : vector<1x256xf32> to vector<1x243xf32>
    %292 = tpu.concatenate %290, %291 in 1 : vector<1x13xf32>, vector<1x243xf32> -> vector<1x256xf32>
    %c0_149 = arith.constant 0 : index
    %c20 = arith.constant 20 : index
    %c0_150 = arith.constant 0 : index
    %293 = vector.load %arg2[%c0_149, %c20, %c0_150] : memref<2x49x256xf32, #tpu.memory_space<vmem>>, vector<1x1x256xf32>
    %294 = vector.shape_cast %293 : vector<1x1x256xf32> to vector<1x256xf32>
    %295 = arith.mulf %292, %294 : vector<1x256xf32>
    %296 = arith.addf %289, %295 : vector<1x256xf32>
    %cst_151 = arith.constant 0.000000e+00 : f32
    %297 = vector.broadcast %cst_151 : f32 to vector<1x13xf32>
    %298 = vector.extract_strided_slice %6 {offsets = [0, 0], sizes = [1, 243], strides = [1, 1]} : vector<1x256xf32> to vector<1x243xf32>
    %299 = tpu.concatenate %297, %298 in 1 : vector<1x13xf32>, vector<1x243xf32> -> vector<1x256xf32>
    %c1_152 = arith.constant 1 : index
    %c20_153 = arith.constant 20 : index
    %c0_154 = arith.constant 0 : index
    %300 = vector.load %arg2[%c1_152, %c20_153, %c0_154] : memref<2x49x256xf32, #tpu.memory_space<vmem>>, vector<1x1x256xf32>
    %301 = vector.shape_cast %300 : vector<1x1x256xf32> to vector<1x256xf32>
    %302 = arith.mulf %299, %301 : vector<1x256xf32>
    %303 = arith.addf %296, %302 : vector<1x256xf32>
    %cst_155 = arith.constant 0.000000e+00 : f32
    %304 = vector.broadcast %cst_155 : f32 to vector<1x3xf32>
    %305 = vector.extract_strided_slice %8 {offsets = [0, 0], sizes = [1, 253], strides = [1, 1]} : vector<1x256xf32> to vector<1x253xf32>
    %306 = tpu.concatenate %304, %305 in 1 : vector<1x3xf32>, vector<1x253xf32> -> vector<1x256xf32>
    %c0_156 = arith.constant 0 : index
    %c21 = arith.constant 21 : index
    %c0_157 = arith.constant 0 : index
    %307 = vector.load %arg2[%c0_156, %c21, %c0_157] : memref<2x49x256xf32, #tpu.memory_space<vmem>>, vector<1x1x256xf32>
    %308 = vector.shape_cast %307 : vector<1x1x256xf32> to vector<1x256xf32>
    %309 = arith.mulf %306, %308 : vector<1x256xf32>
    %310 = arith.addf %303, %309 : vector<1x256xf32>
    %cst_158 = arith.constant 0.000000e+00 : f32
    %311 = vector.broadcast %cst_158 : f32 to vector<1x3xf32>
    %312 = vector.extract_strided_slice %6 {offsets = [0, 0], sizes = [1, 253], strides = [1, 1]} : vector<1x256xf32> to vector<1x253xf32>
    %313 = tpu.concatenate %311, %312 in 1 : vector<1x3xf32>, vector<1x253xf32> -> vector<1x256xf32>
    %c1_159 = arith.constant 1 : index
    %c21_160 = arith.constant 21 : index
    %c0_161 = arith.constant 0 : index
    %314 = vector.load %arg2[%c1_159, %c21_160, %c0_161] : memref<2x49x256xf32, #tpu.memory_space<vmem>>, vector<1x1x256xf32>
    %315 = vector.shape_cast %314 : vector<1x1x256xf32> to vector<1x256xf32>
    %316 = arith.mulf %313, %315 : vector<1x256xf32>
    %317 = arith.addf %310, %316 : vector<1x256xf32>
    %cst_162 = arith.constant 0.000000e+00 : f32
    %318 = vector.broadcast %cst_162 : f32 to vector<1x2xf32>
    %319 = vector.extract_strided_slice %8 {offsets = [0, 0], sizes = [1, 254], strides = [1, 1]} : vector<1x256xf32> to vector<1x254xf32>
    %320 = tpu.concatenate %318, %319 in 1 : vector<1x2xf32>, vector<1x254xf32> -> vector<1x256xf32>
    %c0_163 = arith.constant 0 : index
    %c22 = arith.constant 22 : index
    %c0_164 = arith.constant 0 : index
    %321 = vector.load %arg2[%c0_163, %c22, %c0_164] : memref<2x49x256xf32, #tpu.memory_space<vmem>>, vector<1x1x256xf32>
    %322 = vector.shape_cast %321 : vector<1x1x256xf32> to vector<1x256xf32>
    %323 = arith.mulf %320, %322 : vector<1x256xf32>
    %324 = arith.addf %317, %323 : vector<1x256xf32>
    %cst_165 = arith.constant 0.000000e+00 : f32
    %325 = vector.broadcast %cst_165 : f32 to vector<1x2xf32>
    %326 = vector.extract_strided_slice %6 {offsets = [0, 0], sizes = [1, 254], strides = [1, 1]} : vector<1x256xf32> to vector<1x254xf32>
    %327 = tpu.concatenate %325, %326 in 1 : vector<1x2xf32>, vector<1x254xf32> -> vector<1x256xf32>
    %c1_166 = arith.constant 1 : index
    %c22_167 = arith.constant 22 : index
    %c0_168 = arith.constant 0 : index
    %328 = vector.load %arg2[%c1_166, %c22_167, %c0_168] : memref<2x49x256xf32, #tpu.memory_space<vmem>>, vector<1x1x256xf32>
    %329 = vector.shape_cast %328 : vector<1x1x256xf32> to vector<1x256xf32>
    %330 = arith.mulf %327, %329 : vector<1x256xf32>
    %331 = arith.addf %324, %330 : vector<1x256xf32>
    %cst_169 = arith.constant 0.000000e+00 : f32
    %332 = vector.broadcast %cst_169 : f32 to vector<1x1xf32>
    %333 = vector.extract_strided_slice %8 {offsets = [0, 0], sizes = [1, 255], strides = [1, 1]} : vector<1x256xf32> to vector<1x255xf32>
    %334 = tpu.concatenate %332, %333 in 1 : vector<1x1xf32>, vector<1x255xf32> -> vector<1x256xf32>
    %c0_170 = arith.constant 0 : index
    %c23 = arith.constant 23 : index
    %c0_171 = arith.constant 0 : index
    %335 = vector.load %arg2[%c0_170, %c23, %c0_171] : memref<2x49x256xf32, #tpu.memory_space<vmem>>, vector<1x1x256xf32>
    %336 = vector.shape_cast %335 : vector<1x1x256xf32> to vector<1x256xf32>
    %337 = arith.mulf %334, %336 : vector<1x256xf32>
    %338 = arith.addf %331, %337 : vector<1x256xf32>
    %cst_172 = arith.constant 0.000000e+00 : f32
    %339 = vector.broadcast %cst_172 : f32 to vector<1x1xf32>
    %340 = vector.extract_strided_slice %6 {offsets = [0, 0], sizes = [1, 255], strides = [1, 1]} : vector<1x256xf32> to vector<1x255xf32>
    %341 = tpu.concatenate %339, %340 in 1 : vector<1x1xf32>, vector<1x255xf32> -> vector<1x256xf32>
    %c1_173 = arith.constant 1 : index
    %c23_174 = arith.constant 23 : index
    %c0_175 = arith.constant 0 : index
    %342 = vector.load %arg2[%c1_173, %c23_174, %c0_175] : memref<2x49x256xf32, #tpu.memory_space<vmem>>, vector<1x1x256xf32>
    %343 = vector.shape_cast %342 : vector<1x1x256xf32> to vector<1x256xf32>
    %344 = arith.mulf %341, %343 : vector<1x256xf32>
    %345 = arith.addf %338, %344 : vector<1x256xf32>
    %c0_176 = arith.constant 0 : index
    %c24 = arith.constant 24 : index
    %c0_177 = arith.constant 0 : index
    %346 = vector.load %arg2[%c0_176, %c24, %c0_177] : memref<2x49x256xf32, #tpu.memory_space<vmem>>, vector<1x1x256xf32>
    %347 = vector.shape_cast %346 : vector<1x1x256xf32> to vector<1x256xf32>
    %348 = arith.mulf %8, %347 : vector<1x256xf32>
    %349 = arith.addf %345, %348 : vector<1x256xf32>
    %c1_178 = arith.constant 1 : index
    %c24_179 = arith.constant 24 : index
    %c0_180 = arith.constant 0 : index
    %350 = vector.load %arg2[%c1_178, %c24_179, %c0_180] : memref<2x49x256xf32, #tpu.memory_space<vmem>>, vector<1x1x256xf32>
    %351 = vector.shape_cast %350 : vector<1x1x256xf32> to vector<1x256xf32>
    %352 = arith.mulf %6, %351 : vector<1x256xf32>
    %353 = arith.addf %349, %352 : vector<1x256xf32>
    %cst_181 = arith.constant 0.000000e+00 : f32
    %354 = vector.broadcast %cst_181 : f32 to vector<1x1xf32>
    %355 = vector.extract_strided_slice %8 {offsets = [0, 1], sizes = [1, 255], strides = [1, 1]} : vector<1x256xf32> to vector<1x255xf32>
    %356 = tpu.concatenate %355, %354 in 1 : vector<1x255xf32>, vector<1x1xf32> -> vector<1x256xf32>
    %c0_182 = arith.constant 0 : index
    %c25 = arith.constant 25 : index
    %c0_183 = arith.constant 0 : index
    %357 = vector.load %arg2[%c0_182, %c25, %c0_183] : memref<2x49x256xf32, #tpu.memory_space<vmem>>, vector<1x1x256xf32>
    %358 = vector.shape_cast %357 : vector<1x1x256xf32> to vector<1x256xf32>
    %359 = arith.mulf %356, %358 : vector<1x256xf32>
    %360 = arith.addf %353, %359 : vector<1x256xf32>
    %cst_184 = arith.constant 0.000000e+00 : f32
    %361 = vector.broadcast %cst_184 : f32 to vector<1x1xf32>
    %362 = vector.extract_strided_slice %6 {offsets = [0, 1], sizes = [1, 255], strides = [1, 1]} : vector<1x256xf32> to vector<1x255xf32>
    %363 = tpu.concatenate %362, %361 in 1 : vector<1x255xf32>, vector<1x1xf32> -> vector<1x256xf32>
    %c1_185 = arith.constant 1 : index
    %c25_186 = arith.constant 25 : index
    %c0_187 = arith.constant 0 : index
    %364 = vector.load %arg2[%c1_185, %c25_186, %c0_187] : memref<2x49x256xf32, #tpu.memory_space<vmem>>, vector<1x1x256xf32>
    %365 = vector.shape_cast %364 : vector<1x1x256xf32> to vector<1x256xf32>
    %366 = arith.mulf %363, %365 : vector<1x256xf32>
    %367 = arith.addf %360, %366 : vector<1x256xf32>
    %cst_188 = arith.constant 0.000000e+00 : f32
    %368 = vector.broadcast %cst_188 : f32 to vector<1x2xf32>
    %369 = vector.extract_strided_slice %8 {offsets = [0, 2], sizes = [1, 254], strides = [1, 1]} : vector<1x256xf32> to vector<1x254xf32>
    %370 = tpu.concatenate %369, %368 in 1 : vector<1x254xf32>, vector<1x2xf32> -> vector<1x256xf32>
    %c0_189 = arith.constant 0 : index
    %c26 = arith.constant 26 : index
    %c0_190 = arith.constant 0 : index
    %371 = vector.load %arg2[%c0_189, %c26, %c0_190] : memref<2x49x256xf32, #tpu.memory_space<vmem>>, vector<1x1x256xf32>
    %372 = vector.shape_cast %371 : vector<1x1x256xf32> to vector<1x256xf32>
    %373 = arith.mulf %370, %372 : vector<1x256xf32>
    %374 = arith.addf %367, %373 : vector<1x256xf32>
    %cst_191 = arith.constant 0.000000e+00 : f32
    %375 = vector.broadcast %cst_191 : f32 to vector<1x2xf32>
    %376 = vector.extract_strided_slice %6 {offsets = [0, 2], sizes = [1, 254], strides = [1, 1]} : vector<1x256xf32> to vector<1x254xf32>
    %377 = tpu.concatenate %376, %375 in 1 : vector<1x254xf32>, vector<1x2xf32> -> vector<1x256xf32>
    %c1_192 = arith.constant 1 : index
    %c26_193 = arith.constant 26 : index
    %c0_194 = arith.constant 0 : index
    %378 = vector.load %arg2[%c1_192, %c26_193, %c0_194] : memref<2x49x256xf32, #tpu.memory_space<vmem>>, vector<1x1x256xf32>
    %379 = vector.shape_cast %378 : vector<1x1x256xf32> to vector<1x256xf32>
    %380 = arith.mulf %377, %379 : vector<1x256xf32>
    %381 = arith.addf %374, %380 : vector<1x256xf32>
    %cst_195 = arith.constant 0.000000e+00 : f32
    %382 = vector.broadcast %cst_195 : f32 to vector<1x3xf32>
    %383 = vector.extract_strided_slice %8 {offsets = [0, 3], sizes = [1, 253], strides = [1, 1]} : vector<1x256xf32> to vector<1x253xf32>
    %384 = tpu.concatenate %383, %382 in 1 : vector<1x253xf32>, vector<1x3xf32> -> vector<1x256xf32>
    %c0_196 = arith.constant 0 : index
    %c27 = arith.constant 27 : index
    %c0_197 = arith.constant 0 : index
    %385 = vector.load %arg2[%c0_196, %c27, %c0_197] : memref<2x49x256xf32, #tpu.memory_space<vmem>>, vector<1x1x256xf32>
    %386 = vector.shape_cast %385 : vector<1x1x256xf32> to vector<1x256xf32>
    %387 = arith.mulf %384, %386 : vector<1x256xf32>
    %388 = arith.addf %381, %387 : vector<1x256xf32>
    %cst_198 = arith.constant 0.000000e+00 : f32
    %389 = vector.broadcast %cst_198 : f32 to vector<1x3xf32>
    %390 = vector.extract_strided_slice %6 {offsets = [0, 3], sizes = [1, 253], strides = [1, 1]} : vector<1x256xf32> to vector<1x253xf32>
    %391 = tpu.concatenate %390, %389 in 1 : vector<1x253xf32>, vector<1x3xf32> -> vector<1x256xf32>
    %c1_199 = arith.constant 1 : index
    %c27_200 = arith.constant 27 : index
    %c0_201 = arith.constant 0 : index
    %392 = vector.load %arg2[%c1_199, %c27_200, %c0_201] : memref<2x49x256xf32, #tpu.memory_space<vmem>>, vector<1x1x256xf32>
    %393 = vector.shape_cast %392 : vector<1x1x256xf32> to vector<1x256xf32>
    %394 = arith.mulf %391, %393 : vector<1x256xf32>
    %395 = arith.addf %388, %394 : vector<1x256xf32>
    %cst_202 = arith.constant 0.000000e+00 : f32
    %396 = vector.broadcast %cst_202 : f32 to vector<1x13xf32>
    %397 = vector.extract_strided_slice %8 {offsets = [0, 13], sizes = [1, 243], strides = [1, 1]} : vector<1x256xf32> to vector<1x243xf32>
    %398 = tpu.concatenate %397, %396 in 1 : vector<1x243xf32>, vector<1x13xf32> -> vector<1x256xf32>
    %c0_203 = arith.constant 0 : index
    %c28 = arith.constant 28 : index
    %c0_204 = arith.constant 0 : index
    %399 = vector.load %arg2[%c0_203, %c28, %c0_204] : memref<2x49x256xf32, #tpu.memory_space<vmem>>, vector<1x1x256xf32>
    %400 = vector.shape_cast %399 : vector<1x1x256xf32> to vector<1x256xf32>
    %401 = arith.mulf %398, %400 : vector<1x256xf32>
    %402 = arith.addf %395, %401 : vector<1x256xf32>
    %cst_205 = arith.constant 0.000000e+00 : f32
    %403 = vector.broadcast %cst_205 : f32 to vector<1x13xf32>
    %404 = vector.extract_strided_slice %6 {offsets = [0, 13], sizes = [1, 243], strides = [1, 1]} : vector<1x256xf32> to vector<1x243xf32>
    %405 = tpu.concatenate %404, %403 in 1 : vector<1x243xf32>, vector<1x13xf32> -> vector<1x256xf32>
    %c1_206 = arith.constant 1 : index
    %c28_207 = arith.constant 28 : index
    %c0_208 = arith.constant 0 : index
    %406 = vector.load %arg2[%c1_206, %c28_207, %c0_208] : memref<2x49x256xf32, #tpu.memory_space<vmem>>, vector<1x1x256xf32>
    %407 = vector.shape_cast %406 : vector<1x1x256xf32> to vector<1x256xf32>
    %408 = arith.mulf %405, %407 : vector<1x256xf32>
    %409 = arith.addf %402, %408 : vector<1x256xf32>
    %cst_209 = arith.constant 0.000000e+00 : f32
    %410 = vector.broadcast %cst_209 : f32 to vector<1x14xf32>
    %411 = vector.extract_strided_slice %8 {offsets = [0, 14], sizes = [1, 242], strides = [1, 1]} : vector<1x256xf32> to vector<1x242xf32>
    %412 = tpu.concatenate %411, %410 in 1 : vector<1x242xf32>, vector<1x14xf32> -> vector<1x256xf32>
    %c0_210 = arith.constant 0 : index
    %c29 = arith.constant 29 : index
    %c0_211 = arith.constant 0 : index
    %413 = vector.load %arg2[%c0_210, %c29, %c0_211] : memref<2x49x256xf32, #tpu.memory_space<vmem>>, vector<1x1x256xf32>
    %414 = vector.shape_cast %413 : vector<1x1x256xf32> to vector<1x256xf32>
    %415 = arith.mulf %412, %414 : vector<1x256xf32>
    %416 = arith.addf %409, %415 : vector<1x256xf32>
    %cst_212 = arith.constant 0.000000e+00 : f32
    %417 = vector.broadcast %cst_212 : f32 to vector<1x14xf32>
    %418 = vector.extract_strided_slice %6 {offsets = [0, 14], sizes = [1, 242], strides = [1, 1]} : vector<1x256xf32> to vector<1x242xf32>
    %419 = tpu.concatenate %418, %417 in 1 : vector<1x242xf32>, vector<1x14xf32> -> vector<1x256xf32>
    %c1_213 = arith.constant 1 : index
    %c29_214 = arith.constant 29 : index
    %c0_215 = arith.constant 0 : index
    %420 = vector.load %arg2[%c1_213, %c29_214, %c0_215] : memref<2x49x256xf32, #tpu.memory_space<vmem>>, vector<1x1x256xf32>
    %421 = vector.shape_cast %420 : vector<1x1x256xf32> to vector<1x256xf32>
    %422 = arith.mulf %419, %421 : vector<1x256xf32>
    %423 = arith.addf %416, %422 : vector<1x256xf32>
    %cst_216 = arith.constant 0.000000e+00 : f32
    %424 = vector.broadcast %cst_216 : f32 to vector<1x15xf32>
    %425 = vector.extract_strided_slice %8 {offsets = [0, 15], sizes = [1, 241], strides = [1, 1]} : vector<1x256xf32> to vector<1x241xf32>
    %426 = tpu.concatenate %425, %424 in 1 : vector<1x241xf32>, vector<1x15xf32> -> vector<1x256xf32>
    %c0_217 = arith.constant 0 : index
    %c30 = arith.constant 30 : index
    %c0_218 = arith.constant 0 : index
    %427 = vector.load %arg2[%c0_217, %c30, %c0_218] : memref<2x49x256xf32, #tpu.memory_space<vmem>>, vector<1x1x256xf32>
    %428 = vector.shape_cast %427 : vector<1x1x256xf32> to vector<1x256xf32>
    %429 = arith.mulf %426, %428 : vector<1x256xf32>
    %430 = arith.addf %423, %429 : vector<1x256xf32>
    %cst_219 = arith.constant 0.000000e+00 : f32
    %431 = vector.broadcast %cst_219 : f32 to vector<1x15xf32>
    %432 = vector.extract_strided_slice %6 {offsets = [0, 15], sizes = [1, 241], strides = [1, 1]} : vector<1x256xf32> to vector<1x241xf32>
    %433 = tpu.concatenate %432, %431 in 1 : vector<1x241xf32>, vector<1x15xf32> -> vector<1x256xf32>
    %c1_220 = arith.constant 1 : index
    %c30_221 = arith.constant 30 : index
    %c0_222 = arith.constant 0 : index
    %434 = vector.load %arg2[%c1_220, %c30_221, %c0_222] : memref<2x49x256xf32, #tpu.memory_space<vmem>>, vector<1x1x256xf32>
    %435 = vector.shape_cast %434 : vector<1x1x256xf32> to vector<1x256xf32>
    %436 = arith.mulf %433, %435 : vector<1x256xf32>
    %437 = arith.addf %430, %436 : vector<1x256xf32>
    %cst_223 = arith.constant 0.000000e+00 : f32
    %438 = vector.broadcast %cst_223 : f32 to vector<1x16xf32>
    %439 = vector.extract_strided_slice %8 {offsets = [0, 16], sizes = [1, 240], strides = [1, 1]} : vector<1x256xf32> to vector<1x240xf32>
    %440 = tpu.concatenate %439, %438 in 1 : vector<1x240xf32>, vector<1x16xf32> -> vector<1x256xf32>
    %c0_224 = arith.constant 0 : index
    %c31 = arith.constant 31 : index
    %c0_225 = arith.constant 0 : index
    %441 = vector.load %arg2[%c0_224, %c31, %c0_225] : memref<2x49x256xf32, #tpu.memory_space<vmem>>, vector<1x1x256xf32>
    %442 = vector.shape_cast %441 : vector<1x1x256xf32> to vector<1x256xf32>
    %443 = arith.mulf %440, %442 : vector<1x256xf32>
    %444 = arith.addf %437, %443 : vector<1x256xf32>
    %cst_226 = arith.constant 0.000000e+00 : f32
    %445 = vector.broadcast %cst_226 : f32 to vector<1x16xf32>
    %446 = vector.extract_strided_slice %6 {offsets = [0, 16], sizes = [1, 240], strides = [1, 1]} : vector<1x256xf32> to vector<1x240xf32>
    %447 = tpu.concatenate %446, %445 in 1 : vector<1x240xf32>, vector<1x16xf32> -> vector<1x256xf32>
    %c1_227 = arith.constant 1 : index
    %c31_228 = arith.constant 31 : index
    %c0_229 = arith.constant 0 : index
    %448 = vector.load %arg2[%c1_227, %c31_228, %c0_229] : memref<2x49x256xf32, #tpu.memory_space<vmem>>, vector<1x1x256xf32>
    %449 = vector.shape_cast %448 : vector<1x1x256xf32> to vector<1x256xf32>
    %450 = arith.mulf %447, %449 : vector<1x256xf32>
    %451 = arith.addf %444, %450 : vector<1x256xf32>
    %cst_230 = arith.constant 0.000000e+00 : f32
    %452 = vector.broadcast %cst_230 : f32 to vector<1x17xf32>
    %453 = vector.extract_strided_slice %8 {offsets = [0, 17], sizes = [1, 239], strides = [1, 1]} : vector<1x256xf32> to vector<1x239xf32>
    %454 = tpu.concatenate %453, %452 in 1 : vector<1x239xf32>, vector<1x17xf32> -> vector<1x256xf32>
    %c0_231 = arith.constant 0 : index
    %c32 = arith.constant 32 : index
    %c0_232 = arith.constant 0 : index
    %455 = vector.load %arg2[%c0_231, %c32, %c0_232] : memref<2x49x256xf32, #tpu.memory_space<vmem>>, vector<1x1x256xf32>
    %456 = vector.shape_cast %455 : vector<1x1x256xf32> to vector<1x256xf32>
    %457 = arith.mulf %454, %456 : vector<1x256xf32>
    %458 = arith.addf %451, %457 : vector<1x256xf32>
    %cst_233 = arith.constant 0.000000e+00 : f32
    %459 = vector.broadcast %cst_233 : f32 to vector<1x17xf32>
    %460 = vector.extract_strided_slice %6 {offsets = [0, 17], sizes = [1, 239], strides = [1, 1]} : vector<1x256xf32> to vector<1x239xf32>
    %461 = tpu.concatenate %460, %459 in 1 : vector<1x239xf32>, vector<1x17xf32> -> vector<1x256xf32>
    %c1_234 = arith.constant 1 : index
    %c32_235 = arith.constant 32 : index
    %c0_236 = arith.constant 0 : index
    %462 = vector.load %arg2[%c1_234, %c32_235, %c0_236] : memref<2x49x256xf32, #tpu.memory_space<vmem>>, vector<1x1x256xf32>
    %463 = vector.shape_cast %462 : vector<1x1x256xf32> to vector<1x256xf32>
    %464 = arith.mulf %461, %463 : vector<1x256xf32>
    %465 = arith.addf %458, %464 : vector<1x256xf32>
    %cst_237 = arith.constant 0.000000e+00 : f32
    %466 = vector.broadcast %cst_237 : f32 to vector<1x18xf32>
    %467 = vector.extract_strided_slice %8 {offsets = [0, 18], sizes = [1, 238], strides = [1, 1]} : vector<1x256xf32> to vector<1x238xf32>
    %468 = tpu.concatenate %467, %466 in 1 : vector<1x238xf32>, vector<1x18xf32> -> vector<1x256xf32>
    %c0_238 = arith.constant 0 : index
    %c33 = arith.constant 33 : index
    %c0_239 = arith.constant 0 : index
    %469 = vector.load %arg2[%c0_238, %c33, %c0_239] : memref<2x49x256xf32, #tpu.memory_space<vmem>>, vector<1x1x256xf32>
    %470 = vector.shape_cast %469 : vector<1x1x256xf32> to vector<1x256xf32>
    %471 = arith.mulf %468, %470 : vector<1x256xf32>
    %472 = arith.addf %465, %471 : vector<1x256xf32>
    %cst_240 = arith.constant 0.000000e+00 : f32
    %473 = vector.broadcast %cst_240 : f32 to vector<1x18xf32>
    %474 = vector.extract_strided_slice %6 {offsets = [0, 18], sizes = [1, 238], strides = [1, 1]} : vector<1x256xf32> to vector<1x238xf32>
    %475 = tpu.concatenate %474, %473 in 1 : vector<1x238xf32>, vector<1x18xf32> -> vector<1x256xf32>
    %c1_241 = arith.constant 1 : index
    %c33_242 = arith.constant 33 : index
    %c0_243 = arith.constant 0 : index
    %476 = vector.load %arg2[%c1_241, %c33_242, %c0_243] : memref<2x49x256xf32, #tpu.memory_space<vmem>>, vector<1x1x256xf32>
    %477 = vector.shape_cast %476 : vector<1x1x256xf32> to vector<1x256xf32>
    %478 = arith.mulf %475, %477 : vector<1x256xf32>
    %479 = arith.addf %472, %478 : vector<1x256xf32>
    %cst_244 = arith.constant 0.000000e+00 : f32
    %480 = vector.broadcast %cst_244 : f32 to vector<1x19xf32>
    %481 = vector.extract_strided_slice %8 {offsets = [0, 19], sizes = [1, 237], strides = [1, 1]} : vector<1x256xf32> to vector<1x237xf32>
    %482 = tpu.concatenate %481, %480 in 1 : vector<1x237xf32>, vector<1x19xf32> -> vector<1x256xf32>
    %c0_245 = arith.constant 0 : index
    %c34 = arith.constant 34 : index
    %c0_246 = arith.constant 0 : index
    %483 = vector.load %arg2[%c0_245, %c34, %c0_246] : memref<2x49x256xf32, #tpu.memory_space<vmem>>, vector<1x1x256xf32>
    %484 = vector.shape_cast %483 : vector<1x1x256xf32> to vector<1x256xf32>
    %485 = arith.mulf %482, %484 : vector<1x256xf32>
    %486 = arith.addf %479, %485 : vector<1x256xf32>
    %cst_247 = arith.constant 0.000000e+00 : f32
    %487 = vector.broadcast %cst_247 : f32 to vector<1x19xf32>
    %488 = vector.extract_strided_slice %6 {offsets = [0, 19], sizes = [1, 237], strides = [1, 1]} : vector<1x256xf32> to vector<1x237xf32>
    %489 = tpu.concatenate %488, %487 in 1 : vector<1x237xf32>, vector<1x19xf32> -> vector<1x256xf32>
    %c1_248 = arith.constant 1 : index
    %c34_249 = arith.constant 34 : index
    %c0_250 = arith.constant 0 : index
    %490 = vector.load %arg2[%c1_248, %c34_249, %c0_250] : memref<2x49x256xf32, #tpu.memory_space<vmem>>, vector<1x1x256xf32>
    %491 = vector.shape_cast %490 : vector<1x1x256xf32> to vector<1x256xf32>
    %492 = arith.mulf %489, %491 : vector<1x256xf32>
    %493 = arith.addf %486, %492 : vector<1x256xf32>
    %cst_251 = arith.constant 0.000000e+00 : f32
    %494 = vector.broadcast %cst_251 : f32 to vector<1x29xf32>
    %495 = vector.extract_strided_slice %8 {offsets = [0, 29], sizes = [1, 227], strides = [1, 1]} : vector<1x256xf32> to vector<1x227xf32>
    %496 = tpu.concatenate %495, %494 in 1 : vector<1x227xf32>, vector<1x29xf32> -> vector<1x256xf32>
    %c0_252 = arith.constant 0 : index
    %c35 = arith.constant 35 : index
    %c0_253 = arith.constant 0 : index
    %497 = vector.load %arg2[%c0_252, %c35, %c0_253] : memref<2x49x256xf32, #tpu.memory_space<vmem>>, vector<1x1x256xf32>
    %498 = vector.shape_cast %497 : vector<1x1x256xf32> to vector<1x256xf32>
    %499 = arith.mulf %496, %498 : vector<1x256xf32>
    %500 = arith.addf %493, %499 : vector<1x256xf32>
    %cst_254 = arith.constant 0.000000e+00 : f32
    %501 = vector.broadcast %cst_254 : f32 to vector<1x29xf32>
    %502 = vector.extract_strided_slice %6 {offsets = [0, 29], sizes = [1, 227], strides = [1, 1]} : vector<1x256xf32> to vector<1x227xf32>
    %503 = tpu.concatenate %502, %501 in 1 : vector<1x227xf32>, vector<1x29xf32> -> vector<1x256xf32>
    %c1_255 = arith.constant 1 : index
    %c35_256 = arith.constant 35 : index
    %c0_257 = arith.constant 0 : index
    %504 = vector.load %arg2[%c1_255, %c35_256, %c0_257] : memref<2x49x256xf32, #tpu.memory_space<vmem>>, vector<1x1x256xf32>
    %505 = vector.shape_cast %504 : vector<1x1x256xf32> to vector<1x256xf32>
    %506 = arith.mulf %503, %505 : vector<1x256xf32>
    %507 = arith.addf %500, %506 : vector<1x256xf32>
    %cst_258 = arith.constant 0.000000e+00 : f32
    %508 = vector.broadcast %cst_258 : f32 to vector<1x30xf32>
    %509 = vector.extract_strided_slice %8 {offsets = [0, 30], sizes = [1, 226], strides = [1, 1]} : vector<1x256xf32> to vector<1x226xf32>
    %510 = tpu.concatenate %509, %508 in 1 : vector<1x226xf32>, vector<1x30xf32> -> vector<1x256xf32>
    %c0_259 = arith.constant 0 : index
    %c36 = arith.constant 36 : index
    %c0_260 = arith.constant 0 : index
    %511 = vector.load %arg2[%c0_259, %c36, %c0_260] : memref<2x49x256xf32, #tpu.memory_space<vmem>>, vector<1x1x256xf32>
    %512 = vector.shape_cast %511 : vector<1x1x256xf32> to vector<1x256xf32>
    %513 = arith.mulf %510, %512 : vector<1x256xf32>
    %514 = arith.addf %507, %513 : vector<1x256xf32>
    %cst_261 = arith.constant 0.000000e+00 : f32
    %515 = vector.broadcast %cst_261 : f32 to vector<1x30xf32>
    %516 = vector.extract_strided_slice %6 {offsets = [0, 30], sizes = [1, 226], strides = [1, 1]} : vector<1x256xf32> to vector<1x226xf32>
    %517 = tpu.concatenate %516, %515 in 1 : vector<1x226xf32>, vector<1x30xf32> -> vector<1x256xf32>
    %c1_262 = arith.constant 1 : index
    %c36_263 = arith.constant 36 : index
    %c0_264 = arith.constant 0 : index
    %518 = vector.load %arg2[%c1_262, %c36_263, %c0_264] : memref<2x49x256xf32, #tpu.memory_space<vmem>>, vector<1x1x256xf32>
    %519 = vector.shape_cast %518 : vector<1x1x256xf32> to vector<1x256xf32>
    %520 = arith.mulf %517, %519 : vector<1x256xf32>
    %521 = arith.addf %514, %520 : vector<1x256xf32>
    %cst_265 = arith.constant 0.000000e+00 : f32
    %522 = vector.broadcast %cst_265 : f32 to vector<1x31xf32>
    %523 = vector.extract_strided_slice %8 {offsets = [0, 31], sizes = [1, 225], strides = [1, 1]} : vector<1x256xf32> to vector<1x225xf32>
    %524 = tpu.concatenate %523, %522 in 1 : vector<1x225xf32>, vector<1x31xf32> -> vector<1x256xf32>
    %c0_266 = arith.constant 0 : index
    %c37 = arith.constant 37 : index
    %c0_267 = arith.constant 0 : index
    %525 = vector.load %arg2[%c0_266, %c37, %c0_267] : memref<2x49x256xf32, #tpu.memory_space<vmem>>, vector<1x1x256xf32>
    %526 = vector.shape_cast %525 : vector<1x1x256xf32> to vector<1x256xf32>
    %527 = arith.mulf %524, %526 : vector<1x256xf32>
    %528 = arith.addf %521, %527 : vector<1x256xf32>
    %cst_268 = arith.constant 0.000000e+00 : f32
    %529 = vector.broadcast %cst_268 : f32 to vector<1x31xf32>
    %530 = vector.extract_strided_slice %6 {offsets = [0, 31], sizes = [1, 225], strides = [1, 1]} : vector<1x256xf32> to vector<1x225xf32>
    %531 = tpu.concatenate %530, %529 in 1 : vector<1x225xf32>, vector<1x31xf32> -> vector<1x256xf32>
    %c1_269 = arith.constant 1 : index
    %c37_270 = arith.constant 37 : index
    %c0_271 = arith.constant 0 : index
    %532 = vector.load %arg2[%c1_269, %c37_270, %c0_271] : memref<2x49x256xf32, #tpu.memory_space<vmem>>, vector<1x1x256xf32>
    %533 = vector.shape_cast %532 : vector<1x1x256xf32> to vector<1x256xf32>
    %534 = arith.mulf %531, %533 : vector<1x256xf32>
    %535 = arith.addf %528, %534 : vector<1x256xf32>
    %cst_272 = arith.constant 0.000000e+00 : f32
    %536 = vector.broadcast %cst_272 : f32 to vector<1x32xf32>
    %537 = vector.extract_strided_slice %8 {offsets = [0, 32], sizes = [1, 224], strides = [1, 1]} : vector<1x256xf32> to vector<1x224xf32>
    %538 = tpu.concatenate %537, %536 in 1 : vector<1x224xf32>, vector<1x32xf32> -> vector<1x256xf32>
    %c0_273 = arith.constant 0 : index
    %c38 = arith.constant 38 : index
    %c0_274 = arith.constant 0 : index
    %539 = vector.load %arg2[%c0_273, %c38, %c0_274] : memref<2x49x256xf32, #tpu.memory_space<vmem>>, vector<1x1x256xf32>
    %540 = vector.shape_cast %539 : vector<1x1x256xf32> to vector<1x256xf32>
    %541 = arith.mulf %538, %540 : vector<1x256xf32>
    %542 = arith.addf %535, %541 : vector<1x256xf32>
    %cst_275 = arith.constant 0.000000e+00 : f32
    %543 = vector.broadcast %cst_275 : f32 to vector<1x32xf32>
    %544 = vector.extract_strided_slice %6 {offsets = [0, 32], sizes = [1, 224], strides = [1, 1]} : vector<1x256xf32> to vector<1x224xf32>
    %545 = tpu.concatenate %544, %543 in 1 : vector<1x224xf32>, vector<1x32xf32> -> vector<1x256xf32>
    %c1_276 = arith.constant 1 : index
    %c38_277 = arith.constant 38 : index
    %c0_278 = arith.constant 0 : index
    %546 = vector.load %arg2[%c1_276, %c38_277, %c0_278] : memref<2x49x256xf32, #tpu.memory_space<vmem>>, vector<1x1x256xf32>
    %547 = vector.shape_cast %546 : vector<1x1x256xf32> to vector<1x256xf32>
    %548 = arith.mulf %545, %547 : vector<1x256xf32>
    %549 = arith.addf %542, %548 : vector<1x256xf32>
    %cst_279 = arith.constant 0.000000e+00 : f32
    %550 = vector.broadcast %cst_279 : f32 to vector<1x33xf32>
    %551 = vector.extract_strided_slice %8 {offsets = [0, 33], sizes = [1, 223], strides = [1, 1]} : vector<1x256xf32> to vector<1x223xf32>
    %552 = tpu.concatenate %551, %550 in 1 : vector<1x223xf32>, vector<1x33xf32> -> vector<1x256xf32>
    %c0_280 = arith.constant 0 : index
    %c39 = arith.constant 39 : index
    %c0_281 = arith.constant 0 : index
    %553 = vector.load %arg2[%c0_280, %c39, %c0_281] : memref<2x49x256xf32, #tpu.memory_space<vmem>>, vector<1x1x256xf32>
    %554 = vector.shape_cast %553 : vector<1x1x256xf32> to vector<1x256xf32>
    %555 = arith.mulf %552, %554 : vector<1x256xf32>
    %556 = arith.addf %549, %555 : vector<1x256xf32>
    %cst_282 = arith.constant 0.000000e+00 : f32
    %557 = vector.broadcast %cst_282 : f32 to vector<1x33xf32>
    %558 = vector.extract_strided_slice %6 {offsets = [0, 33], sizes = [1, 223], strides = [1, 1]} : vector<1x256xf32> to vector<1x223xf32>
    %559 = tpu.concatenate %558, %557 in 1 : vector<1x223xf32>, vector<1x33xf32> -> vector<1x256xf32>
    %c1_283 = arith.constant 1 : index
    %c39_284 = arith.constant 39 : index
    %c0_285 = arith.constant 0 : index
    %560 = vector.load %arg2[%c1_283, %c39_284, %c0_285] : memref<2x49x256xf32, #tpu.memory_space<vmem>>, vector<1x1x256xf32>
    %561 = vector.shape_cast %560 : vector<1x1x256xf32> to vector<1x256xf32>
    %562 = arith.mulf %559, %561 : vector<1x256xf32>
    %563 = arith.addf %556, %562 : vector<1x256xf32>
    %cst_286 = arith.constant 0.000000e+00 : f32
    %564 = vector.broadcast %cst_286 : f32 to vector<1x34xf32>
    %565 = vector.extract_strided_slice %8 {offsets = [0, 34], sizes = [1, 222], strides = [1, 1]} : vector<1x256xf32> to vector<1x222xf32>
    %566 = tpu.concatenate %565, %564 in 1 : vector<1x222xf32>, vector<1x34xf32> -> vector<1x256xf32>
    %c0_287 = arith.constant 0 : index
    %c40 = arith.constant 40 : index
    %c0_288 = arith.constant 0 : index
    %567 = vector.load %arg2[%c0_287, %c40, %c0_288] : memref<2x49x256xf32, #tpu.memory_space<vmem>>, vector<1x1x256xf32>
    %568 = vector.shape_cast %567 : vector<1x1x256xf32> to vector<1x256xf32>
    %569 = arith.mulf %566, %568 : vector<1x256xf32>
    %570 = arith.addf %563, %569 : vector<1x256xf32>
    %cst_289 = arith.constant 0.000000e+00 : f32
    %571 = vector.broadcast %cst_289 : f32 to vector<1x34xf32>
    %572 = vector.extract_strided_slice %6 {offsets = [0, 34], sizes = [1, 222], strides = [1, 1]} : vector<1x256xf32> to vector<1x222xf32>
    %573 = tpu.concatenate %572, %571 in 1 : vector<1x222xf32>, vector<1x34xf32> -> vector<1x256xf32>
    %c1_290 = arith.constant 1 : index
    %c40_291 = arith.constant 40 : index
    %c0_292 = arith.constant 0 : index
    %574 = vector.load %arg2[%c1_290, %c40_291, %c0_292] : memref<2x49x256xf32, #tpu.memory_space<vmem>>, vector<1x1x256xf32>
    %575 = vector.shape_cast %574 : vector<1x1x256xf32> to vector<1x256xf32>
    %576 = arith.mulf %573, %575 : vector<1x256xf32>
    %577 = arith.addf %570, %576 : vector<1x256xf32>
    %cst_293 = arith.constant 0.000000e+00 : f32
    %578 = vector.broadcast %cst_293 : f32 to vector<1x35xf32>
    %579 = vector.extract_strided_slice %8 {offsets = [0, 35], sizes = [1, 221], strides = [1, 1]} : vector<1x256xf32> to vector<1x221xf32>
    %580 = tpu.concatenate %579, %578 in 1 : vector<1x221xf32>, vector<1x35xf32> -> vector<1x256xf32>
    %c0_294 = arith.constant 0 : index
    %c41 = arith.constant 41 : index
    %c0_295 = arith.constant 0 : index
    %581 = vector.load %arg2[%c0_294, %c41, %c0_295] : memref<2x49x256xf32, #tpu.memory_space<vmem>>, vector<1x1x256xf32>
    %582 = vector.shape_cast %581 : vector<1x1x256xf32> to vector<1x256xf32>
    %583 = arith.mulf %580, %582 : vector<1x256xf32>
    %584 = arith.addf %577, %583 : vector<1x256xf32>
    %cst_296 = arith.constant 0.000000e+00 : f32
    %585 = vector.broadcast %cst_296 : f32 to vector<1x35xf32>
    %586 = vector.extract_strided_slice %6 {offsets = [0, 35], sizes = [1, 221], strides = [1, 1]} : vector<1x256xf32> to vector<1x221xf32>
    %587 = tpu.concatenate %586, %585 in 1 : vector<1x221xf32>, vector<1x35xf32> -> vector<1x256xf32>
    %c1_297 = arith.constant 1 : index
    %c41_298 = arith.constant 41 : index
    %c0_299 = arith.constant 0 : index
    %588 = vector.load %arg2[%c1_297, %c41_298, %c0_299] : memref<2x49x256xf32, #tpu.memory_space<vmem>>, vector<1x1x256xf32>
    %589 = vector.shape_cast %588 : vector<1x1x256xf32> to vector<1x256xf32>
    %590 = arith.mulf %587, %589 : vector<1x256xf32>
    %591 = arith.addf %584, %590 : vector<1x256xf32>
    %cst_300 = arith.constant 0.000000e+00 : f32
    %592 = vector.broadcast %cst_300 : f32 to vector<1x45xf32>
    %593 = vector.extract_strided_slice %8 {offsets = [0, 45], sizes = [1, 211], strides = [1, 1]} : vector<1x256xf32> to vector<1x211xf32>
    %594 = tpu.concatenate %593, %592 in 1 : vector<1x211xf32>, vector<1x45xf32> -> vector<1x256xf32>
    %c0_301 = arith.constant 0 : index
    %c42 = arith.constant 42 : index
    %c0_302 = arith.constant 0 : index
    %595 = vector.load %arg2[%c0_301, %c42, %c0_302] : memref<2x49x256xf32, #tpu.memory_space<vmem>>, vector<1x1x256xf32>
    %596 = vector.shape_cast %595 : vector<1x1x256xf32> to vector<1x256xf32>
    %597 = arith.mulf %594, %596 : vector<1x256xf32>
    %598 = arith.addf %591, %597 : vector<1x256xf32>
    %cst_303 = arith.constant 0.000000e+00 : f32
    %599 = vector.broadcast %cst_303 : f32 to vector<1x45xf32>
    %600 = vector.extract_strided_slice %6 {offsets = [0, 45], sizes = [1, 211], strides = [1, 1]} : vector<1x256xf32> to vector<1x211xf32>
    %601 = tpu.concatenate %600, %599 in 1 : vector<1x211xf32>, vector<1x45xf32> -> vector<1x256xf32>
    %c1_304 = arith.constant 1 : index
    %c42_305 = arith.constant 42 : index
    %c0_306 = arith.constant 0 : index
    %602 = vector.load %arg2[%c1_304, %c42_305, %c0_306] : memref<2x49x256xf32, #tpu.memory_space<vmem>>, vector<1x1x256xf32>
    %603 = vector.shape_cast %602 : vector<1x1x256xf32> to vector<1x256xf32>
    %604 = arith.mulf %601, %603 : vector<1x256xf32>
    %605 = arith.addf %598, %604 : vector<1x256xf32>
    %cst_307 = arith.constant 0.000000e+00 : f32
    %606 = vector.broadcast %cst_307 : f32 to vector<1x46xf32>
    %607 = vector.extract_strided_slice %8 {offsets = [0, 46], sizes = [1, 210], strides = [1, 1]} : vector<1x256xf32> to vector<1x210xf32>
    %608 = tpu.concatenate %607, %606 in 1 : vector<1x210xf32>, vector<1x46xf32> -> vector<1x256xf32>
    %c0_308 = arith.constant 0 : index
    %c43 = arith.constant 43 : index
    %c0_309 = arith.constant 0 : index
    %609 = vector.load %arg2[%c0_308, %c43, %c0_309] : memref<2x49x256xf32, #tpu.memory_space<vmem>>, vector<1x1x256xf32>
    %610 = vector.shape_cast %609 : vector<1x1x256xf32> to vector<1x256xf32>
    %611 = arith.mulf %608, %610 : vector<1x256xf32>
    %612 = arith.addf %605, %611 : vector<1x256xf32>
    %cst_310 = arith.constant 0.000000e+00 : f32
    %613 = vector.broadcast %cst_310 : f32 to vector<1x46xf32>
    %614 = vector.extract_strided_slice %6 {offsets = [0, 46], sizes = [1, 210], strides = [1, 1]} : vector<1x256xf32> to vector<1x210xf32>
    %615 = tpu.concatenate %614, %613 in 1 : vector<1x210xf32>, vector<1x46xf32> -> vector<1x256xf32>
    %c1_311 = arith.constant 1 : index
    %c43_312 = arith.constant 43 : index
    %c0_313 = arith.constant 0 : index
    %616 = vector.load %arg2[%c1_311, %c43_312, %c0_313] : memref<2x49x256xf32, #tpu.memory_space<vmem>>, vector<1x1x256xf32>
    %617 = vector.shape_cast %616 : vector<1x1x256xf32> to vector<1x256xf32>
    %618 = arith.mulf %615, %617 : vector<1x256xf32>
    %619 = arith.addf %612, %618 : vector<1x256xf32>
    %cst_314 = arith.constant 0.000000e+00 : f32
    %620 = vector.broadcast %cst_314 : f32 to vector<1x47xf32>
    %621 = vector.extract_strided_slice %8 {offsets = [0, 47], sizes = [1, 209], strides = [1, 1]} : vector<1x256xf32> to vector<1x209xf32>
    %622 = tpu.concatenate %621, %620 in 1 : vector<1x209xf32>, vector<1x47xf32> -> vector<1x256xf32>
    %c0_315 = arith.constant 0 : index
    %c44 = arith.constant 44 : index
    %c0_316 = arith.constant 0 : index
    %623 = vector.load %arg2[%c0_315, %c44, %c0_316] : memref<2x49x256xf32, #tpu.memory_space<vmem>>, vector<1x1x256xf32>
    %624 = vector.shape_cast %623 : vector<1x1x256xf32> to vector<1x256xf32>
    %625 = arith.mulf %622, %624 : vector<1x256xf32>
    %626 = arith.addf %619, %625 : vector<1x256xf32>
    %cst_317 = arith.constant 0.000000e+00 : f32
    %627 = vector.broadcast %cst_317 : f32 to vector<1x47xf32>
    %628 = vector.extract_strided_slice %6 {offsets = [0, 47], sizes = [1, 209], strides = [1, 1]} : vector<1x256xf32> to vector<1x209xf32>
    %629 = tpu.concatenate %628, %627 in 1 : vector<1x209xf32>, vector<1x47xf32> -> vector<1x256xf32>
    %c1_318 = arith.constant 1 : index
    %c44_319 = arith.constant 44 : index
    %c0_320 = arith.constant 0 : index
    %630 = vector.load %arg2[%c1_318, %c44_319, %c0_320] : memref<2x49x256xf32, #tpu.memory_space<vmem>>, vector<1x1x256xf32>
    %631 = vector.shape_cast %630 : vector<1x1x256xf32> to vector<1x256xf32>
    %632 = arith.mulf %629, %631 : vector<1x256xf32>
    %633 = arith.addf %626, %632 : vector<1x256xf32>
    %cst_321 = arith.constant 0.000000e+00 : f32
    %634 = vector.broadcast %cst_321 : f32 to vector<1x48xf32>
    %635 = vector.extract_strided_slice %8 {offsets = [0, 48], sizes = [1, 208], strides = [1, 1]} : vector<1x256xf32> to vector<1x208xf32>
    %636 = tpu.concatenate %635, %634 in 1 : vector<1x208xf32>, vector<1x48xf32> -> vector<1x256xf32>
    %c0_322 = arith.constant 0 : index
    %c45 = arith.constant 45 : index
    %c0_323 = arith.constant 0 : index
    %637 = vector.load %arg2[%c0_322, %c45, %c0_323] : memref<2x49x256xf32, #tpu.memory_space<vmem>>, vector<1x1x256xf32>
    %638 = vector.shape_cast %637 : vector<1x1x256xf32> to vector<1x256xf32>
    %639 = arith.mulf %636, %638 : vector<1x256xf32>
    %640 = arith.addf %633, %639 : vector<1x256xf32>
    %cst_324 = arith.constant 0.000000e+00 : f32
    %641 = vector.broadcast %cst_324 : f32 to vector<1x48xf32>
    %642 = vector.extract_strided_slice %6 {offsets = [0, 48], sizes = [1, 208], strides = [1, 1]} : vector<1x256xf32> to vector<1x208xf32>
    %643 = tpu.concatenate %642, %641 in 1 : vector<1x208xf32>, vector<1x48xf32> -> vector<1x256xf32>
    %c1_325 = arith.constant 1 : index
    %c45_326 = arith.constant 45 : index
    %c0_327 = arith.constant 0 : index
    %644 = vector.load %arg2[%c1_325, %c45_326, %c0_327] : memref<2x49x256xf32, #tpu.memory_space<vmem>>, vector<1x1x256xf32>
    %645 = vector.shape_cast %644 : vector<1x1x256xf32> to vector<1x256xf32>
    %646 = arith.mulf %643, %645 : vector<1x256xf32>
    %647 = arith.addf %640, %646 : vector<1x256xf32>
    %cst_328 = arith.constant 0.000000e+00 : f32
    %648 = vector.broadcast %cst_328 : f32 to vector<1x49xf32>
    %649 = vector.extract_strided_slice %8 {offsets = [0, 49], sizes = [1, 207], strides = [1, 1]} : vector<1x256xf32> to vector<1x207xf32>
    %650 = tpu.concatenate %649, %648 in 1 : vector<1x207xf32>, vector<1x49xf32> -> vector<1x256xf32>
    %c0_329 = arith.constant 0 : index
    %c46 = arith.constant 46 : index
    %c0_330 = arith.constant 0 : index
    %651 = vector.load %arg2[%c0_329, %c46, %c0_330] : memref<2x49x256xf32, #tpu.memory_space<vmem>>, vector<1x1x256xf32>
    %652 = vector.shape_cast %651 : vector<1x1x256xf32> to vector<1x256xf32>
    %653 = arith.mulf %650, %652 : vector<1x256xf32>
    %654 = arith.addf %647, %653 : vector<1x256xf32>
    %cst_331 = arith.constant 0.000000e+00 : f32
    %655 = vector.broadcast %cst_331 : f32 to vector<1x49xf32>
    %656 = vector.extract_strided_slice %6 {offsets = [0, 49], sizes = [1, 207], strides = [1, 1]} : vector<1x256xf32> to vector<1x207xf32>
    %657 = tpu.concatenate %656, %655 in 1 : vector<1x207xf32>, vector<1x49xf32> -> vector<1x256xf32>
    %c1_332 = arith.constant 1 : index
    %c46_333 = arith.constant 46 : index
    %c0_334 = arith.constant 0 : index
    %658 = vector.load %arg2[%c1_332, %c46_333, %c0_334] : memref<2x49x256xf32, #tpu.memory_space<vmem>>, vector<1x1x256xf32>
    %659 = vector.shape_cast %658 : vector<1x1x256xf32> to vector<1x256xf32>
    %660 = arith.mulf %657, %659 : vector<1x256xf32>
    %661 = arith.addf %654, %660 : vector<1x256xf32>
    %cst_335 = arith.constant 0.000000e+00 : f32
    %662 = vector.broadcast %cst_335 : f32 to vector<1x50xf32>
    %663 = vector.extract_strided_slice %8 {offsets = [0, 50], sizes = [1, 206], strides = [1, 1]} : vector<1x256xf32> to vector<1x206xf32>
    %664 = tpu.concatenate %663, %662 in 1 : vector<1x206xf32>, vector<1x50xf32> -> vector<1x256xf32>
    %c0_336 = arith.constant 0 : index
    %c47 = arith.constant 47 : index
    %c0_337 = arith.constant 0 : index
    %665 = vector.load %arg2[%c0_336, %c47, %c0_337] : memref<2x49x256xf32, #tpu.memory_space<vmem>>, vector<1x1x256xf32>
    %666 = vector.shape_cast %665 : vector<1x1x256xf32> to vector<1x256xf32>
    %667 = arith.mulf %664, %666 : vector<1x256xf32>
    %668 = arith.addf %661, %667 : vector<1x256xf32>
    %cst_338 = arith.constant 0.000000e+00 : f32
    %669 = vector.broadcast %cst_338 : f32 to vector<1x50xf32>
    %670 = vector.extract_strided_slice %6 {offsets = [0, 50], sizes = [1, 206], strides = [1, 1]} : vector<1x256xf32> to vector<1x206xf32>
    %671 = tpu.concatenate %670, %669 in 1 : vector<1x206xf32>, vector<1x50xf32> -> vector<1x256xf32>
    %c1_339 = arith.constant 1 : index
    %c47_340 = arith.constant 47 : index
    %c0_341 = arith.constant 0 : index
    %672 = vector.load %arg2[%c1_339, %c47_340, %c0_341] : memref<2x49x256xf32, #tpu.memory_space<vmem>>, vector<1x1x256xf32>
    %673 = vector.shape_cast %672 : vector<1x1x256xf32> to vector<1x256xf32>
    %674 = arith.mulf %671, %673 : vector<1x256xf32>
    %675 = arith.addf %668, %674 : vector<1x256xf32>
    %cst_342 = arith.constant 0.000000e+00 : f32
    %676 = vector.broadcast %cst_342 : f32 to vector<1x51xf32>
    %677 = vector.extract_strided_slice %8 {offsets = [0, 51], sizes = [1, 205], strides = [1, 1]} : vector<1x256xf32> to vector<1x205xf32>
    %678 = tpu.concatenate %677, %676 in 1 : vector<1x205xf32>, vector<1x51xf32> -> vector<1x256xf32>
    %c0_343 = arith.constant 0 : index
    %c48 = arith.constant 48 : index
    %c0_344 = arith.constant 0 : index
    %679 = vector.load %arg2[%c0_343, %c48, %c0_344] : memref<2x49x256xf32, #tpu.memory_space<vmem>>, vector<1x1x256xf32>
    %680 = vector.shape_cast %679 : vector<1x1x256xf32> to vector<1x256xf32>
    %681 = arith.mulf %678, %680 : vector<1x256xf32>
    %682 = arith.addf %675, %681 : vector<1x256xf32>
    %cst_345 = arith.constant 0.000000e+00 : f32
    %683 = vector.broadcast %cst_345 : f32 to vector<1x51xf32>
    %684 = vector.extract_strided_slice %6 {offsets = [0, 51], sizes = [1, 205], strides = [1, 1]} : vector<1x256xf32> to vector<1x205xf32>
    %685 = tpu.concatenate %684, %683 in 1 : vector<1x205xf32>, vector<1x51xf32> -> vector<1x256xf32>
    %c1_346 = arith.constant 1 : index
    %c48_347 = arith.constant 48 : index
    %c0_348 = arith.constant 0 : index
    %686 = vector.load %arg2[%c1_346, %c48_347, %c0_348] : memref<2x49x256xf32, #tpu.memory_space<vmem>>, vector<1x1x256xf32>
    %687 = vector.shape_cast %686 : vector<1x1x256xf32> to vector<1x256xf32>
    %688 = arith.mulf %685, %687 : vector<1x256xf32>
    %689 = arith.addf %682, %688 : vector<1x256xf32>
    %cst_349 = arith.constant 0.000000e+00 : f32
    %690 = vector.broadcast %cst_349 : f32 to vector<1x256xf32>
    %691 = arith.subf %690, %689 : vector<1x256xf32>
    %692 = math.exp %691 : vector<1x256xf32>
    %cst_350 = arith.constant 1.000000e+00 : f32
    %693 = vector.broadcast %cst_350 : f32 to vector<1x256xf32>
    %694 = arith.addf %693, %692 : vector<1x256xf32>
    %cst_351 = arith.constant 1.000000e+00 : f32
    %695 = vector.broadcast %cst_351 : f32 to vector<1x256xf32>
    %696 = arith.divf %695, %694 : vector<1x256xf32>
    %697 = vector.shape_cast %696 : vector<1x256xf32> to vector<1x1x256xf32>
    %c0_352 = arith.constant 0 : index
    %c0_353 = arith.constant 0 : index
    %c0_354 = arith.constant 0 : index
    %698 = vector.load %arg1[%c0_352, %c0_353, %c0_354] : memref<1x4x256xf32, #tpu.memory_space<vmem>>, vector<1x4x256xf32>
    %699 = vector.broadcast %697 : vector<1x1x256xf32> to vector<1x4x256xf32>
    %700 = arith.mulf %698, %699 : vector<1x4x256xf32>
    %c0_355 = arith.constant 0 : index
    %c0_356 = arith.constant 0 : index
    %c0_357 = arith.constant 0 : index
    %701 = vector.load %arg3[%c0_355, %c0_356, %c0_357] : memref<1x4x256xf32, #tpu.memory_space<vmem>>, vector<1x4x256xf32>
    tpu.vector_store %arg3[%c0_355, %c0_356, %c0_357], %700 {strides = array<i32>} : memref<1x4x256xf32, #tpu.memory_space<vmem>>, vector<1x4x256xf32>,
    return
  }
  func.func @transform_0(%arg0: i32) -> (i32, i32, i32) {
    %c0_i32 = arith.constant 0 : i32
    %c0_i32_0 = arith.constant 0 : i32
    %c0_i32_1 = arith.constant 0 : i32
    return %arg0, %c0_i32, %c0_i32_0 : i32, i32, i32
  }
  func.func @transform_1(%arg0: i32) -> (i32, i32, i32) {
    %c0_i32 = arith.constant 0 : i32
    %c0_i32_0 = arith.constant 0 : i32
    %c0_i32_1 = arith.constant 0 : i32
    %c0_i32_2 = arith.constant 0 : i32
    return %c0_i32, %c0_i32_0, %c0_i32_1 : i32, i32, i32
  }
  func.func @transform_2(%arg0: i32) -> (i32, i32, i32) {
    %c0_i32 = arith.constant 0 : i32
    %c0_i32_0 = arith.constant 0 : i32
    %c0_i32_1 = arith.constant 0 : i32
    return %arg0, %c0_i32, %c0_i32_0 : i32, i32, i32
  }
}

</mosaic_0001>

<bundles_post_ra>
// kernel: tpu_custom_call.1
= control target key start
LH: loop header
LB: loop body
LE: loop exit
PB: predicated region body
PF: predicated region fallthrough
CT: control target
= control target key end

     0   :  { %7 = vsyncpa [#allocation3], 0  ;;  %s3655_s0 = inlined_call_operand.vmem [shape: f32[2,4,256], index: 0, kind: input, shape index: {}]   ;;  %s3656_s1 = inlined_call_operand.vmem [shape: f32[2,49,256], index: 1, kind: input, shape index: {}]   ;;  %s3657_s2 = inlined_call_operand.hbm [shape: f32[2,4,256], index: 2, kind: output, shape index: {}]  }
   0x1   :  { %9 = vsyncpa [#allocation3 + $0x1], 0  ;;  %s2588_s9 = smov 0   ;;  %s2590_s10 = smov 0  }
   0x2   :  { %s2592_s11 = smov 0   ;;  %s2594_s12 = smov 0  }
   0x3 LB: > { %s2609_s13 = sadd.s32 4294967295, %s2523_s12   ;;  %s2255_s14 = sadd.s32 4294967294, %s2523_s12   ;;  %s2523_s12 = sphi %s2594_s12, %s3663_s12   ;;  %s2519_s11 = sphi %s2592_s11, %s3662_s11   ;;  %s2515_s10 = sphi %s2590_s10, %s3661_s10   ;;  %s2511_s9 = sphi %s2588_s9, %s3660_s9  }
   0x4   : > { %s2613_s15 = sadd.s32 1, %s2523_s12   ;;  %s69_s16 = sadd.s32 1, %s2519_s11 }
   0x5   : > { %s66_s17 = ssub.s32 %s2523_s12, %s2613_s15  ;;  %p79_p0 = scmp.ne.s32.totalorder %s2519_s11, %s2515_s10 }
   0x6   : > { %p67_p1 = scmp.eq.s32.totalorder %s66_s17, 0  ;;  %p80_p2 = scmp.eq.s32.totalorder %s2609_s13, 1 }
   0x7   : > { %p85_p3 = scmp.ne.s32.totalorder %s2515_s10, %s2511_s9  ;;  %p86_p4 = scmp.eq.s32.totalorder %s2255_s14, 1 }
   0x8   : > { %s2624_s18 = scalar_select %p67_p1, %s2519_s11, %s69_s16  }
   0x9   : > { %p2626_p5 = por %p80_p2, %p79_p0  ;;  %p2630_p6 = por %p86_p4, %p85_p3 }
   0xa   : > { %p2258_p7 = scmp.ge.s32.totalorder %s2523_s12, 1  ;;  %p115_p8 = scmp.lt.s32.totalorder %s2523_s12, 3 }
   0xc   : > { %p116_p9 = pnand %p2258_p7, %p115_p8 }
   0xd   : > { %p137_p10 = scmp.lt.s32.totalorder (!%p116_p9), %s2609_s13, 1  ;;  %s2525_s26 = smov (!%p116_p9), 48  }
   0xe   : > { %119 = sbr.rel (%p116_p9) target bundleno = 711 (0x2c7), region = 28  ;;  %s2526_s27 = smov (!%p116_p9), 51  }
   0xf   : > { %s2527_s28 = smov (!%p116_p9), 50   ;;  %s2528_s29 = smov (!%p116_p9), 49  }
  0x10   : > { %s2529_s30 = smov (!%p116_p9), 47   ;;  %s2530_s3 = smov (!%p116_p9), 46  }
  0x11   : > { %s2531_s4 = smov (!%p116_p9), 45   ;;  %s2532_s5 = smov (!%p116_p9), 35  }
  0x12   : > { %s2533_s6 = smov (!%p116_p9), 34   ;;  %s2534_s7 = smov (!%p116_p9), 33  }
  0x13   : > { %s138_s21 = scalar_select %p137_p10, %s2609_s13, 1  ;;  %vm149_vm0 = vcmask 1043456   ;;  %v2262_v59 = vld [vmem:[%s3656_s1 + $0x70] ss:$8 sm:$0x3]  ;;  %vm193_vm1 = vcmask 416768  }
  0x14   : > { %s2535_s8 = smov 32   ;;  %s2536_s14 = smov 31   ;;  %v222_v60 = vperm.slane %v2262_v59, 1  ;;  %v198_v61 = vld [vmem:[%s3656_s1] ss:$8 sm:$0x3] }
  0x15   : > { %s2364_s22 = sshll.u32 %s138_s21, 3  ;;  %s2537_s16 = smov 30   ;;  %v2263_v63 = vld [vmem:[%s3656_s1 + $0x1] ss:$8 sm:$0x3]  ;;  %vm233_vm2 = vcmask 408576  }
  0x16   : > { %s141_s25 = scalar_lea.vmem %s3655_s0, %s2364_s22  ;;  %s2538_s17 = smov 29   ;;  %vm272_vm3 = vcmask 400384   ;;  %vm311_vm4 = vcmask 392192   ;;  %vm350_vm5 = vcmask 384000   ;;  %vm389_vm6 = vcmask 375808  }
  0x17   : > { %v2641_v0 = vld [vmem:[%s141_s25] sm:$0xff]  ;;  %s2539_s21 = smov 19   ;;  %s2540_s22 = smov 18   ;;  %vm428_vm7 = vcmask 367616   ;;  %vm467_vm8 = vcmask 285696   ;;  %vm506_vm9 = vcmask 277504  }
  0x18   : > { %144 = vst [vmem:[#allocation1] ss:$2 sm:$0xff] %v2641_v0  ;;  %s2541_s25 = smov 17   ;;  %s2543_s24 = smov 15   ;;  %vm545_vm10 = vcmask 269312   ;;  %vm584_vm11 = vcmask 261120  }
  0x19   : > { %vm623_vm12 = vcmask 252928   ;;  %vm662_vm13 = vcmask 244736   ;;  %vm701_vm14 = vcmask 236544   ;;  %vm740_vm15 = vcmask 154624   ;;  %s2562_s23 = smov 96  }
  0x1f   : > { %v146_v1 = vld.sshfl [vmem:[#allocation1 + $0x8] sm:$0xff pattern:$0x75316420]  ;;  %v145_v2 = vld.sshfl [vmem:[#allocation1] sm:$0xff pattern:$0x75316420] }
  0x20   : > { %v157_v3 = vsel %vm149_vm0, %v146_v1, 0.0  ;;  %v150_v4 = vsel %vm149_vm0, %v145_v2, 0.0  ;;  %166 = vst [vmem:[#allocation1] ss:$2 sm:$0xff] %v2641_v0  ;;  %v221_v1 = vperm.slane %v2262_v59, 0  ;;  %v201_v2 = vperm.slane %v198_v61, 1 }
  0x21   : > { %v158_v5 = vrot.slane %v157_v3, 4  ;;  %v151_v6 = vrot.slane %v150_v4, 4 }
  0x23   : > { %v159_v7 = vadd.f32 %v158_v5, %v157_v3  ;;  %v152_v8 = vadd.f32 %v151_v6, %v150_v4 }
  0x25   : > { %v160_v9 = vrot.slane %v159_v7, 2  ;;  %v153_v10 = vrot.slane %v152_v8, 2 }
  0x27   : > { %v161_v11 = vadd.f32 %v160_v9, %v159_v7  ;;  %v154_v12 = vadd.f32 %v153_v10, %v152_v8  ;;  %v167_v13 = vld.sshfl [vmem:[#allocation1] sm:$0xff pattern:$0x75316420]  ;;  %v168_v14 = vld.sshfl [vmem:[#allocation1 + $0x8] sm:$0xff pattern:$0x75316420] }
  0x28   : > { %v171_v15 = vsel %vm149_vm0, %v167_v13, -inf  ;;  %v178_v16 = vsel %vm149_vm0, %v168_v14, -inf  ;;  %v2264_v7 = vld [vmem:[%s3656_s1 + $0x71] ss:$8 sm:$0x3]  ;;  %v200_v9 = vperm.slane %v198_v61, 0 }
  0x29   : > { %v162_v17 = vrot.slane %v161_v11, 1  ;;  %v155_v18 = vrot.slane %v154_v12, 1  ;;  %v172_v19 = vrot.slane %v171_v15, 4  ;;  %v179_v20 = vrot.slane %v178_v16, 4 }
  0x2b   : > { %v163_v21 = vadd.f32 %v162_v17, %v161_v11  ;;  %v156_v22 = vadd.f32 %v155_v18, %v154_v12  ;;  %v173_v23 = vmax.f32 %v171_v15, %v172_v19  ;;  %v180_v24 = vmax.f32 %v178_v16, %v179_v20 }
  0x2c   : > { %v242_v12 = vperm.slane %v2263_v63, 1  ;;  %v261_v15 = vperm.slane %v2264_v7, 1  ;;  %v241_v18 = vperm.slane %v2263_v63, 0 }
  0x2d   : > { %v2649_v25 = vmul.f32 0.25, %v163_v21  ;;  %v2651_v26 = vmul.f32 0.25, %v156_v22  ;;  %v174_v27 = vrot.slane %v173_v23, 2  ;;  %v181_v29 = vrot.slane %v180_v24, 2 }
  0x2e   : > { %v260_v21 = vperm.slane %v2264_v7, 0 }
  0x2f   : > { %309 = vrot.lane.b32.xlu1 %v2649_v25, %s2525_s26  ;;  %189 = vrot.lane.b32.xlu0 %v2651_v26, %s2526_s27  ;;  %v175_v28 = vmax.f32 %v173_v23, %v174_v27  ;;  %v182_v32 = vmax.f32 %v180_v24, %v181_v29  ;;  %v2265_v23 = vld [vmem:[%s3656_s1 + $0x2] ss:$8 sm:$0x3] }
  0x30   : > { %229 = vrot.lane.b32.xlu2 %v2651_v26, %s2527_s28 }
  0x31   : > { %v176_v30 = vrot.slane %v175_v28, 1  ;;  %v183_v33 = vrot.slane %v182_v32, 1 }
  0x33   : > { %v2656_v31 = vmax.f32 %v175_v28, %v176_v30  ;;  %v2661_v34 = vmax.f32 %v182_v32, %v183_v33 }
  0x37   : > { %210 = vrot.lane.b32.xlu1 %v2656_v31, %s2526_s27  ;;  %191 = vrot.lane.b32.xlu0 %v2649_v25, %s2526_s27 }
  0x38   : > { %231 = vrot.lane.b32.xlu2 %v2649_v25, %s2527_s28 }
  0x3f   : > { %212 = vrot.lane.b32.xlu1 %v2661_v34, %s2526_s27  ;;  %270 = vrot.lane.b32.xlu0 %v2649_v25, %s2528_s29  ;;  %s2556_s27 = smov 111  }
  0x40   : > { %268 = vrot.lane.b32.xlu2 %v2651_v26, %s2528_s29 }
  0x47   : > { %251 = vrot.lane.b32.xlu1 %v2661_v34, %s2527_s28  ;;  %307 = vrot.lane.b32.xlu0 %v2651_v26, %s2525_s26 }
  0x48   : > { %290 = vrot.lane.b32.xlu2 %v2661_v34, %s2528_s29 }
  0x4f   : > { %288 = vrot.lane.b32.xlu1 %v2656_v31, %s2528_s29  ;;  %249 = vrot.lane.b32.xlu0 %v2656_v31, %s2527_s28  ;;  %s2552_s28 = smov 115   ;;  %s2567_s29 = smov 82  }
  0x50   : > { %327 = vrot.lane.b32.xlu2 %v2656_v31, %s2525_s26 }
  0x57   : > { %346 = vrot.lane.b32.xlu1 %v2651_v26, %s2529_s30  ;;  %329 = vrot.lane.b32.xlu0 %v2661_v34, %s2525_s26  ;;  %s2563_s26 = smov 95  }
  0x58   : > { %348 = vrot.lane.b32.xlu2 %v2649_v25, %s2529_s30 }
  0x5f   : > { %368 = vrot.lane.b32.xlu1 %v2661_v34, %s2529_s30  ;;  %366 = vrot.lane.b32.xlu0 %v2656_v31, %s2529_s30  ;;  %s2560_s30 = smov 98  }
  0x60   : > { %385 = vrot.lane.b32.xlu2 %v2651_v26, %s2530_s3 }
  0x67   : > { %405 = vrot.lane.b32.xlu1 %v2656_v31, %s2530_s3  ;;  %387 = vrot.lane.b32.xlu0 %v2649_v25, %s2530_s3 }
  0x68   : > { %407 = vrot.lane.b32.xlu2 %v2661_v34, %s2530_s3  ;;  %s2544_s3 = smov 14  }
  0x6f   : > { %426 = vrot.lane.b32.xlu1 %v2649_v25, %s2531_s4  ;;  %424 = vrot.lane.b32.xlu0 %v2651_v26, %s2531_s4 }
  0x70   : > { %444 = vrot.lane.b32.xlu2 %v2656_v31, %s2531_s4 }
  0x77   : > { %463 = vrot.lane.b32.xlu1 %v2651_v26, %s2532_s5  ;;  %446 = vrot.lane.b32.xlu0 %v2661_v34, %s2531_s4  ;;  %s2546_s4 = smov 3  }
  0x78   : > { %465 = vrot.lane.b32.xlu2 %v2649_v25, %s2532_s5 }
  0x7f   : > { %485 = vrot.lane.b32.xlu1 %v2661_v34, %s2532_s5  ;;  %483 = vrot.lane.b32.xlu0 %v2656_v31, %s2532_s5  ;;  %s2564_s5 = smov 94  }
  0x80   : > { %502 = vrot.lane.b32.xlu2 %v2651_v26, %s2533_s6 }
  0x87   : > { %522 = vrot.lane.b32.xlu1 %v2656_v31, %s2533_s6  ;;  %504 = vrot.lane.b32.xlu0 %v2649_v25, %s2533_s6 }
  0x88   : > { %524 = vrot.lane.b32.xlu2 %v2661_v34, %s2533_s6  ;;  %s2542_s6 = smov 16  }
  0x8a   : > { %v2693_v35 = vpop.permute.xlu2 %229 }
  0x8b   : > { %v237_v22 = vsel %vm233_vm2, 0.0, %v2693_v35 }
  0x8f   : > { %543 = vrot.lane.b32.xlu1 %v2649_v25, %s2534_s7  ;;  %541 = vrot.lane.b32.xlu0 %v2651_v26, %s2534_s7 }
  0x90   : > { %561 = vrot.lane.b32.xlu2 %v2656_v31, %s2534_s7 }
  0x92   : > { %v2698_v36 = vpop.permute.xlu2 %231 }
  0x93   : > { %v234_v16 = vsel %vm233_vm2, %v2693_v35, %v2698_v36  ;;  %v245_v35 = vmul.f32 %v241_v18, %v237_v22 }
  0x94   : > { %v246_v27 = vmul.f32 %v242_v12, %v234_v16 }
  0x97   : > { %580 = vrot.lane.b32.xlu1 %v2651_v26, %s2535_s8  ;;  %563 = vrot.lane.b32.xlu0 %v2661_v34, %s2534_s7  ;;  %s2550_s7 = smov 126  }
  0x98   : > { %582 = vrot.lane.b32.xlu2 %v2649_v25, %s2535_s8 }
  0x9a   : > { %v2703_v37 = vpop.permute.xlu2 %268 }
  0x9f   : > { %602 = vrot.lane.b32.xlu1 %v2661_v34, %s2535_s8  ;;  %600 = vrot.lane.b32.xlu0 %v2656_v31, %s2535_s8  ;;  %s2554_s8 = smov 113  }
  0xa0   : > { %619 = vrot.lane.b32.xlu2 %v2651_v26, %s2536_s14 }
  0xa1   : > { %v2708_v38 = vpop.permute.xlu1 %309  ;;  %v2710_v39 = vpop.permute.xlu0 %189 }
  0xa2   : > { %v2712_v40 = vpop.permute.xlu2 %290  ;;  %v197_v11 = vsel %vm193_vm1, 0.0, %v2710_v39 }
  0xa3   : > { %v204_v19 = vmul.f32 %v200_v9, %v197_v11 }
  0xa7   : > { %639 = vrot.lane.b32.xlu1 %v2656_v31, %s2536_s14  ;;  %621 = vrot.lane.b32.xlu0 %v2649_v25, %s2536_s14 }
  0xa8   : > { %641 = vrot.lane.b32.xlu2 %v2661_v34, %s2536_s14  ;;  %s2561_s14 = smov 97  }
  0xa9   : > { %v211_v41 = vpop.permute.xlu1 %210  ;;  %v192_v42 = vpop.permute.xlu0 %191 }
  0xaa   : > { %v2717_v43 = vpop.permute.xlu2 %327  ;;  %v217_v5 = vsel %vm193_vm1, 0.0, %v211_v41  ;;  %v194_v6 = vsel %vm193_vm1, %v2710_v39, %v192_v42  ;;  %v281_v39 = vperm.slane %v2265_v23, 1 }
  0xab   : > { %v225_v13 = vmul.f32 %v221_v1, %v217_v5  ;;  %v205_v14 = vmul.f32 %v201_v2, %v194_v6 }
  0xad   : > { %v227_v28 = vadd.f32 %v225_v13, %v204_v19 }
  0xaf   : > { %660 = vrot.lane.b32.xlu1 %v2649_v25, %s2537_s16  ;;  %658 = vrot.lane.b32.xlu0 %v2651_v26, %s2537_s16 }
  0xb0   : > { %678 = vrot.lane.b32.xlu2 %v2656_v31, %s2537_s16 }
  0xb1   : > { %v213_v44 = vpop.permute.xlu1 %212  ;;  %v2722_v45 = vpop.permute.xlu0 %270 }
  0xb2   : > { %v2724_v46 = vpop.permute.xlu2 %348  ;;  %v214_v62 = vsel %vm193_vm1, %v211_v41, %v213_v44  ;;  %v273_v42 = vsel %vm272_vm3, %v2703_v37, %v2722_v45  ;;  %v2266_v44 = vld [vmem:[%s3656_s1 + $0x72] ss:$8 sm:$0x3]  ;;  %v2267_v45 = vld [vmem:[%s3656_s1 + $0x3] ss:$8 sm:$0x3] }
  0xb3   : > { %v226_v10 = vmul.f32 %v222_v60, %v214_v62  ;;  %v276_v60 = vsel %vm272_vm3, 0.0, %v2703_v37  ;;  %v285_v61 = vmul.f32 %v281_v39, %v273_v42  ;;  %v300_v62 = vperm.slane %v2266_v44, 1 }
  0xb4   : > { %v299_v37 = vperm.slane %v2266_v44, 0  ;;  %v320_v11 = vperm.slane %v2267_v45, 1  ;;  %vm779_vm1 = vcmask 146432  }
  0xb5   : > { %v228_v20 = vadd.f32 %v226_v10, %v205_v14  ;;  %v2268_v14 = vld [vmem:[%s3656_s1 + $0x73] ss:$8 sm:$0x3] }
  0xb6   : > { %v339_v18 = vperm.slane %v2268_v14, 1  ;;  %v338_v22 = vperm.slane %v2268_v14, 0 }
  0xb7   : > { %697 = vrot.lane.b32.xlu1 %v2651_v26, %s2538_s17  ;;  %680 = vrot.lane.b32.xlu0 %v2661_v34, %s2537_s16  ;;  %v248_v36 = vadd.f32 %v246_v27, %v228_v20  ;;  %s2565_s16 = smov 93  }
  0xb8   : > { %699 = vrot.lane.b32.xlu2 %v2649_v25, %s2538_s17 }
  0xb9   : > { %v252_v47 = vpop.permute.xlu1 %251  ;;  %v2729_v48 = vpop.permute.xlu0 %307 }
  0xba   : > { %v2731_v49 = vpop.permute.xlu2 %385 }
  0xbf   : > { %719 = vrot.lane.b32.xlu1 %v2661_v34, %s2538_s17  ;;  %717 = vrot.lane.b32.xlu0 %v2656_v31, %s2538_s17  ;;  %s2547_s17 = smov 2  }
  0xc0   : > { %736 = vrot.lane.b32.xlu2 %v2651_v26, %s2539_s21 }
  0xc1   : > { %v2736_v50 = vpop.permute.xlu1 %288  ;;  %v250_v51 = vpop.permute.xlu0 %249 }
  0xc2   : > { %v2738_v52 = vpop.permute.xlu2 %407  ;;  %v253_v17 = vsel %vm233_vm2, %v250_v51, %v252_v47  ;;  %v256_v24 = vsel %vm233_vm2, 0.0, %v250_v51  ;;  %v247_v47 = vadd.f32 %v245_v35, %v227_v28  ;;  %v280_v51 = vperm.slane %v2265_v23, 0 }
  0xc3   : > { %v265_v29 = vmul.f32 %v261_v15, %v253_v17  ;;  %v264_v41 = vmul.f32 %v260_v21, %v256_v24  ;;  %v292_v1 = vsel %vm272_vm3, %v2736_v50, %v2712_v40  ;;  %v295_v9 = vsel %vm272_vm3, 0.0, %v2736_v50 }
  0xc4   : > { %v284_v2 = vmul.f32 %v280_v51, %v276_v60  ;;  %v304_v12 = vmul.f32 %v300_v62, %v292_v1  ;;  %v312_v40 = vsel %vm311_vm4, %v2729_v48, %v2708_v38  ;;  %v319_v15 = vperm.slane %v2267_v45, 0  ;;  %v2269_v38 = vld [vmem:[%s3656_s1 + $0x4] ss:$8 sm:$0x3] }
  0xc5   : > { %v267_v59 = vadd.f32 %v265_v29, %v248_v36  ;;  %v266_v63 = vadd.f32 %v264_v41, %v247_v47  ;;  %v303_v16 = vmul.f32 %v299_v37, %v295_v9  ;;  %v315_v50 = vsel %vm311_vm4, 0.0, %v2729_v48  ;;  %v2270_v48 = vld [vmem:[%s3656_s1 + $0x74] ss:$8 sm:$0x3] }
  0xc6   : > { %v324_v20 = vmul.f32 %v320_v11, %v312_v40  ;;  %v334_v23 = vsel %vm311_vm4, 0.0, %v2717_v43  ;;  %v359_v39 = vperm.slane %v2269_v38, 1  ;;  %v378_v41 = vperm.slane %v2270_v48, 1 }
  0xc7   : > { %756 = vrot.lane.b32.xlu1 %v2656_v31, %s2539_s21  ;;  %738 = vrot.lane.b32.xlu0 %v2649_v25, %s2539_s21  ;;  %v287_v5 = vadd.f32 %v285_v61, %v267_v59  ;;  %v286_v13 = vadd.f32 %v284_v2, %v266_v63  ;;  %v342_v42 = vmul.f32 %v338_v22, %v334_v23  ;;  %v358_v44 = vperm.slane %v2269_v38, 0 }
  0xc8   : > { %758 = vrot.lane.b32.xlu2 %v2661_v34, %s2539_s21  ;;  %v377_v60 = vperm.slane %v2270_v48, 0  ;;  %s2545_s21 = smov 13   ;;  %vm818_vm2 = vcmask 138240   ;;  %vm857_vm3 = vcmask 130048  }
  0xc9   : > { %v2743_v53 = vpop.permute.xlu1 %346  ;;  %v2745_v54 = vpop.permute.xlu0 %329  ;;  %v306_v17 = vadd.f32 %v304_v12, %v287_v5  ;;  %v305_v21 = vadd.f32 %v303_v16, %v286_v13 }
  0xca   : > { %v2747_v55 = vpop.permute.xlu2 %444  ;;  %v331_v19 = vsel %vm311_vm4, %v2717_v43, %v2745_v54  ;;  %v323_v54 = vmul.f32 %v319_v15, %v315_v50  ;;  %v351_v47 = vsel %vm350_vm5, %v2743_v53, %v2724_v46  ;;  %v2271_v43 = vld [vmem:[%s3656_s1 + $0x5] ss:$8 sm:$0x3]  ;;  %v354_v62 = vsel %vm350_vm5, 0.0, %v2743_v53 }
  0xcb   : > { %v326_v24 = vadd.f32 %v324_v20, %v306_v17  ;;  %v343_v27 = vmul.f32 %v339_v18, %v331_v19  ;;  %v398_v61 = vperm.slane %v2271_v43, 1  ;;  %v363_v1 = vmul.f32 %v359_v39, %v351_v47  ;;  %v2274_v20 = vld [vmem:[%s3656_s1 + $0x76] ss:$8 sm:$0x3] }
  0xcc   : > { %v325_v36 = vadd.f32 %v323_v54, %v305_v21  ;;  %v397_v53 = vperm.slane %v2271_v43, 0  ;;  %v362_v37 = vmul.f32 %v358_v44, %v354_v62  ;;  %v456_v54 = vperm.slane %v2274_v20, 1  ;;  %v2275_v39 = vld [vmem:[%s3656_s1 + $0x7] ss:$8 sm:$0x3] }
  0xcd   : > { %v345_v59 = vadd.f32 %v343_v27, %v326_v24  ;;  %v455_v27 = vperm.slane %v2274_v20, 0  ;;  %vm896_vm4 = vcmask 121856  }
  0xce   : > { %v344_v45 = vadd.f32 %v342_v42, %v325_v36 }
  0xcf   : > { %777 = vrot.lane.b32.xlu1 %v2649_v25, %s2540_s22  ;;  %775 = vrot.lane.b32.xlu0 %v2651_v26, %s2540_s22  ;;  %v365_v5 = vadd.f32 %v363_v1, %v345_v59  ;;  %v476_v59 = vperm.slane %v2275_v39, 1  ;;  %v2277_v1 = vld [vmem:[%s3656_s1 + $0x10] ss:$8 sm:$0x3] }
  0xd0   : > { %795 = vrot.lane.b32.xlu2 %v2656_v31, %s2540_s22  ;;  %v364_v15 = vadd.f32 %v362_v37, %v344_v45 }
  0xd1   : > { %v2752_v56 = vpop.permute.xlu1 %368  ;;  %v2754_v57 = vpop.permute.xlu0 %366 }
  0xd2   : > { %v2756_v58 = vpop.permute.xlu2 %465  ;;  %v370_v51 = vsel %vm350_vm5, %v2754_v57, %v2752_v56  ;;  %v373_v63 = vsel %vm350_vm5, 0.0, %v2754_v57  ;;  %v2272_v56 = vld [vmem:[%s3656_s1 + $0x75] ss:$8 sm:$0x3]  ;;  %v393_v57 = vsel %vm389_vm6, 0.0, %v2731_v49  ;;  %vm935_vm5 = vcmask 113664  }
  0xd3   : > { %v382_v2 = vmul.f32 %v378_v41, %v370_v51  ;;  %v381_v9 = vmul.f32 %v377_v60, %v373_v63  ;;  %v416_v40 = vperm.slane %v2272_v56, 0  ;;  %v417_v16 = vperm.slane %v2272_v56, 1 }
  0xd4   : > { %v401_v18 = vmul.f32 %v397_v53, %v393_v57  ;;  %v475_v51 = vperm.slane %v2275_v39, 0 }
  0xd5   : > { %v383_v38 = vadd.f32 %v381_v9, %v364_v15 }
  0xd7   : > { %814 = vrot.lane.b32.xlu1 %v2651_v26, %s2541_s25  ;;  %797 = vrot.lane.b32.xlu0 %v2661_v34, %s2540_s22  ;;  %s2566_s22 = smov 83  }
  0xd8   : > { %816 = vrot.lane.b32.xlu2 %v2649_v25, %s2541_s25 }
  0xd9   : > { %v2771_v3 = vpop.permute.xlu1 %405  ;;  %v2773_v4 = vpop.permute.xlu0 %387 }
  0xda   : > { %v2781_v8 = vpop.permute.xlu2 %502  ;;  %v390_v46 = vsel %vm389_vm6, %v2731_v49, %v2773_v4  ;;  %v2273_v4 = vld [vmem:[%s3656_s1 + $0x6] ss:$8 sm:$0x3]  ;;  %v384_v49 = vadd.f32 %v382_v2, %v365_v5  ;;  %v412_v50 = vsel %vm389_vm6, 0.0, %v2771_v3  ;;  %v409_v19 = vsel %vm389_vm6, %v2771_v3, %v2738_v52 }
  0xdb   : > { %v402_v11 = vmul.f32 %v398_v61, %v390_v46  ;;  %v437_v17 = vperm.slane %v2273_v4, 1  ;;  %v436_v48 = vperm.slane %v2273_v4, 0  ;;  %v420_v52 = vmul.f32 %v416_v40, %v412_v50 }
  0xdc   : > { %v421_v3 = vmul.f32 %v417_v16, %v409_v19  ;;  %v515_v4 = vperm.slane %v2277_v1, 1  ;;  %vm974_vm6 = vcmask 105472  }
  0xdd   : > { %v404_v22 = vadd.f32 %v402_v11, %v384_v49  ;;  %v2278_v11 = vld [vmem:[%s3656_s1 + $0x80] ss:$8 sm:$0x3] }
  0xde   : > { %v533_v50 = vperm.slane %v2278_v11, 0 }
  0xdf   : > { %836 = vrot.lane.b32.xlu1 %v2661_v34, %s2541_s25  ;;  %834 = vrot.lane.b32.xlu0 %v2656_v31, %s2541_s25  ;;  %v423_v41 = vadd.f32 %v421_v3, %v404_v22  ;;  %s2548_s25 = smov 1  }
  0xe0   : > { %853 = vrot.lane.b32.xlu2 %v2651_v26, %s2542_s6 }
  0xe1   : > { %v2798_v30 = vpop.permute.xlu1 %426  ;;  %v2800_v32 = vpop.permute.xlu0 %424 }
  0xe2   : > { %v2802_v33 = vpop.permute.xlu2 %524  ;;  %v429_v21 = vsel %vm428_vm7, %v2800_v32, %v2798_v30  ;;  %v432_v23 = vsel %vm428_vm7, 0.0, %v2800_v32  ;;  %v451_v30 = vsel %vm428_vm7, 0.0, %v2747_v55  ;;  %v2276_v32 = vld [vmem:[%s3656_s1 + $0x77] ss:$8 sm:$0x3] }
  0xe3   : > { %v441_v36 = vmul.f32 %v437_v17, %v429_v21  ;;  %v440_v42 = vmul.f32 %v436_v48, %v432_v23  ;;  %v459_v61 = vmul.f32 %v455_v27, %v451_v30  ;;  %v495_v63 = vperm.slane %v2276_v32, 1  ;;  %v2280_v23 = vld [vmem:[%s3656_s1 + $0x81] ss:$8 sm:$0x3] }
  0xe4   : > { %v494_v57 = vperm.slane %v2276_v32, 0 }
  0xe5   : > { %v443_v62 = vadd.f32 %v441_v36, %v423_v41  ;;  %v573_v36 = vperm.slane %v2280_v23, 1 }
  0xe7   : > { %873 = vrot.lane.b32.xlu1 %v2656_v31, %s2542_s6  ;;  %855 = vrot.lane.b32.xlu0 %v2649_v25, %s2542_s6 }
  0xe8   : > { %875 = vrot.lane.b32.xlu2 %v2661_v34, %s2542_s6  ;;  %s2568_s6 = smov 81  }
  0xe9   : > { %v2821_v6 = vpop.permute.xlu1 %463  ;;  %v2823_v7 = vpop.permute.xlu0 %446 }
  0xea   : > { %v2827_v10 = vpop.permute.xlu2 %561  ;;  %v448_v24 = vsel %vm428_vm7, %v2747_v55, %v2823_v7  ;;  %v403_v7 = vadd.f32 %v401_v18, %v383_v38  ;;  %v471_v46 = vsel %vm467_vm8, 0.0, %v2821_v6  ;;  %v468_v45 = vsel %vm467_vm8, %v2821_v6, %v2756_v58 }
  0xeb   : > { %v460_v44 = vmul.f32 %v456_v54, %v448_v24  ;;  %v479_v58 = vmul.f32 %v475_v51, %v471_v46  ;;  %v480_v6 = vmul.f32 %v476_v59, %v468_v45  ;;  %vm1013_vm7 = vcmask 23552  }
  0xec   : > { %v422_v55 = vadd.f32 %v420_v52, %v403_v7 }
  0xed   : > { %v462_v53 = vadd.f32 %v460_v44, %v443_v62 }
  0xee   : > { %v442_v56 = vadd.f32 %v440_v42, %v422_v55  ;;  %v2282_v42 = vld [vmem:[%s3656_s1 + $0x82] ss:$8 sm:$0x3] }
  0xef   : > { %894 = vrot.lane.b32.xlu1 %v2649_v25, %s2543_s24  ;;  %892 = vrot.lane.b32.xlu0 %v2651_v26, %s2543_s24  ;;  %v482_v15 = vadd.f32 %v480_v6, %v462_v53 }
  0xf0   : > { %912 = vrot.lane.b32.xlu2 %v2656_v31, %s2543_s24  ;;  %v461_v40 = vadd.f32 %v459_v61, %v442_v56  ;;  %v568_v61 = vsel %vm545_vm10, 0.0, %v2827_v10 }
  0xf1   : > { %v2854_v28 = vpop.permute.xlu1 %485  ;;  %v2856_v29 = vpop.permute.xlu0 %483 }
  0xf2   : > { %v2858_v35 = vpop.permute.xlu2 %582  ;;  %v487_v2 = vsel %vm467_vm8, %v2856_v29, %v2854_v28  ;;  %v490_v37 = vsel %vm467_vm8, 0.0, %v2856_v29  ;;  %v514_v28 = vperm.slane %v2277_v1, 0  ;;  %v510_v29 = vsel %vm506_vm9, 0.0, %v2781_v8 }
  0xf3   : > { %v499_v9 = vmul.f32 %v495_v63, %v487_v2  ;;  %v498_v49 = vmul.f32 %v494_v57, %v490_v37  ;;  %v481_v20 = vadd.f32 %v479_v58, %v461_v40  ;;  %v612_v2 = vperm.slane %v2282_v42, 1 }
  0xf4   : > { %v518_v22 = vmul.f32 %v514_v28, %v510_v29  ;;  %v611_v58 = vperm.slane %v2282_v42, 0  ;;  %vm1052_vm8 = vcmask 15360  }
  0xf5   : > { %v501_v21 = vadd.f32 %v499_v9, %v482_v15  ;;  %v500_v52 = vadd.f32 %v498_v49, %v481_v20  ;;  %v2284_v9 = vld [vmem:[%s3656_s1 + $0x83] ss:$8 sm:$0x3] }
  0xf7   : > { %931 = vrot.lane.b32.xlu1 %v2651_v26, %s2544_s3  ;;  %914 = vrot.lane.b32.xlu0 %v2661_v34, %s2543_s24  ;;  %v520_v44 = vadd.f32 %v518_v22, %v500_v52  ;;  %v2285_v52 = vld [vmem:[%s3656_s1 + $0x14] ss:$8 sm:$0x3]  ;;  %s2555_s24 = smov 112  }
  0xf8   : > { %933 = vrot.lane.b32.xlu2 %v2649_v25, %s2544_s3 }
  0xf9   : > { %v2890_v12 = vpop.permute.xlu1 %522  ;;  %v505_v13 = vpop.permute.xlu0 %504 }
  0xfa   : > { %v2892_v14 = vpop.permute.xlu2 %619  ;;  %v507_v5 = vsel %vm506_vm9, %v2781_v8, %v505_v13  ;;  %v2279_v13 = vld [vmem:[%s3656_s1 + $0x11] ss:$8 sm:$0x3]  ;;  %v534_v8 = vperm.slane %v2278_v11, 1  ;;  %v529_v48 = vsel %vm506_vm9, 0.0, %v2890_v12  ;;  %v526_v54 = vsel %vm506_vm9, %v2890_v12, %v2802_v33 }
  0xfb   : > { %v519_v16 = vmul.f32 %v515_v4, %v507_v5  ;;  %v554_v38 = vperm.slane %v2279_v13, 1  ;;  %v553_v27 = vperm.slane %v2279_v13, 0  ;;  %v537_v32 = vmul.f32 %v533_v50, %v529_v48  ;;  %v2281_v33 = vld [vmem:[%s3656_s1 + $0x12] ss:$8 sm:$0x3] }
  0xfc   : > { %v538_v7 = vmul.f32 %v534_v8, %v526_v54  ;;  %v572_v12 = vperm.slane %v2280_v23, 0  ;;  %v592_v62 = vperm.slane %v2281_v33, 0  ;;  %v593_v1 = vperm.slane %v2281_v33, 1  ;;  %v2286_v23 = vld [vmem:[%s3656_s1 + $0x84] ss:$8 sm:$0x3] }
  0xfd   : > { %v521_v3 = vadd.f32 %v519_v16, %v501_v21  ;;  %v539_v46 = vadd.f32 %v537_v32, %v520_v44  ;;  %v627_v50 = vsel %vm623_vm12, 0.0, %v2892_v14  ;;  %v650_v48 = vperm.slane %v2284_v9, 0 }
  0xfe   : > { %v576_v4 = vmul.f32 %v572_v12, %v568_v61  ;;  %v670_v32 = vperm.slane %v2285_v52, 0  ;;  %vm1091_vm9 = vcmask 7168  }
  0xff   : > { %953 = vrot.lane.b32.xlu1 %v2661_v34, %s2544_s3  ;;  %951 = vrot.lane.b32.xlu0 %v2656_v31, %s2544_s3  ;;  %s2553_s3 = smov 114  }
 0x100   : > { %970 = vrot.lane.b32.xlu2 %v2651_v26, %s2545_s21 }
 0x101   : > { %v544_v47 = vpop.permute.xlu1 %543  ;;  %v542_v43 = vpop.permute.xlu0 %541 }
 0x102   : > { %v2924_v60 = vpop.permute.xlu2 %641  ;;  %v546_v24 = vsel %vm545_vm10, %v542_v43, %v544_v47  ;;  %v549_v39 = vsel %vm545_vm10, 0.0, %v542_v43  ;;  %v540_v47 = vadd.f32 %v538_v7, %v521_v3  ;;  %v671_v7 = vperm.slane %v2285_v52, 1 }
 0x103   : > { %v558_v41 = vmul.f32 %v554_v38, %v546_v24  ;;  %v557_v43 = vmul.f32 %v553_v27, %v549_v39 }
 0x105   : > { %v560_v45 = vadd.f32 %v558_v41, %v540_v47  ;;  %v559_v37 = vadd.f32 %v557_v43, %v539_v46 }
 0x107   : > { %990 = vrot.lane.b32.xlu1 %v2656_v31, %s2545_s21  ;;  %972 = vrot.lane.b32.xlu0 %v2649_v25, %s2545_s21  ;;  %v578_v40 = vadd.f32 %v576_v4, %v559_v37 }
 0x108   : > { %992 = vrot.lane.b32.xlu2 %v2661_v34, %s2545_s21  ;;  %s2551_s21 = smov 125  }
 0x109   : > { %v581_v17 = vpop.permute.xlu1 %580  ;;  %v564_v18 = vpop.permute.xlu0 %563 }
 0x10a   : > { %v2955_v19 = vpop.permute.xlu2 %678  ;;  %v565_v30 = vsel %vm545_vm10, %v2827_v10, %v564_v18  ;;  %v588_v56 = vsel %vm584_vm11, 0.0, %v581_v17  ;;  %v585_v53 = vsel %vm584_vm11, %v581_v17, %v2858_v35  ;;  %v2283_v10 = vld [vmem:[%s3656_s1 + $0x13] ss:$8 sm:$0x3]  ;;  %v651_v17 = vperm.slane %v2284_v9, 1 }
 0x10b   : > { %v577_v51 = vmul.f32 %v573_v36, %v565_v30  ;;  %v596_v11 = vmul.f32 %v592_v62, %v588_v56  ;;  %v597_v28 = vmul.f32 %v593_v1, %v585_v53  ;;  %v632_v29 = vperm.slane %v2283_v10, 1  ;;  %v2287_v62 = vld [vmem:[%s3656_s1 + $0x15] ss:$8 sm:$0x3] }
 0x10c   : > { %v631_v13 = vperm.slane %v2283_v10, 0  ;;  %v689_v36 = vperm.slane %v2286_v23, 0  ;;  %v685_v41 = vsel %vm662_vm13, 0.0, %v2955_v19  ;;  %v690_v56 = vperm.slane %v2286_v23, 1 }
 0x10d   : > { %v579_v5 = vadd.f32 %v577_v51, %v560_v45  ;;  %v598_v38 = vadd.f32 %v596_v11, %v578_v40  ;;  %v2289_v11 = vld [vmem:[%s3656_s1 + $0x16] ss:$8 sm:$0x3]  ;;  %vm1152_vm10 = vcmask 1039360  }
 0x10f   : > { %1011 = vrot.lane.b32.xlu1 %v2649_v25, %s2546_s4  ;;  %1009 = vrot.lane.b32.xlu0 %v2651_v26, %s2546_s4  ;;  %v599_v15 = vadd.f32 %v597_v28, %v579_v5  ;;  %v2288_v28 = vld [vmem:[%s3656_s1 + $0x85] ss:$8 sm:$0x3] }
 0x110   : > { %1029 = vrot.lane.b32.xlu2 %v2656_v31, %s2546_s4  ;;  %v728_v40 = vperm.slane %v2288_v28, 0 }
 0x111   : > { %v603_v59 = vpop.permute.xlu1 %602  ;;  %v601_v55 = vpop.permute.xlu0 %600 }
 0x112   : > { %v2983_v63 = vpop.permute.xlu2 %699  ;;  %v604_v57 = vsel %vm584_vm11, %v601_v55, %v603_v59  ;;  %v607_v6 = vsel %vm584_vm11, 0.0, %v601_v55  ;;  %v693_v59 = vmul.f32 %v689_v36, %v685_v41  ;;  %vm1191_vm11 = vcmask 1031168  }
 0x113   : > { %v616_v35 = vmul.f32 %v612_v2, %v604_v57  ;;  %v615_v49 = vmul.f32 %v611_v58, %v607_v6  ;;  %v709_v2 = vperm.slane %v2287_v62, 0  ;;  %v710_v57 = vperm.slane %v2287_v62, 1 }
 0x115   : > { %v618_v22 = vadd.f32 %v616_v35, %v599_v15  ;;  %v617_v3 = vadd.f32 %v615_v49, %v598_v38  ;;  %v729_v15 = vperm.slane %v2288_v28, 1 }
 0x117   : > { %1048 = vrot.lane.b32.xlu1 %v2651_v26, %s2547_s17  ;;  %1031 = vrot.lane.b32.xlu0 %v2661_v34, %s2546_s4  ;;  %s2549_s4 = smov 127  }
 0x118   : > { %1050 = vrot.lane.b32.xlu2 %v2649_v25, %s2547_s17 }
 0x119   : > { %v640_v16 = vpop.permute.xlu1 %639  ;;  %v622_v18 = vpop.permute.xlu0 %621 }
 0x11a   : > { %v643_v20 = vsel %vm623_vm12, %v640_v16, %v2924_v60  ;;  %v624_v21 = vsel %vm623_vm12, %v2892_v14, %v622_v18  ;;  %v3008_v8 = vpop.permute.xlu2 %736  ;;  %v646_v24 = vsel %vm623_vm12, 0.0, %v640_v16  ;;  %v635_v60 = vmul.f32 %v631_v13, %v627_v50 }
 0x11b   : > { %v636_v54 = vmul.f32 %v632_v29, %v624_v21  ;;  %v655_v27 = vmul.f32 %v651_v17, %v643_v20  ;;  %v654_v39 = vmul.f32 %v650_v48, %v646_v24  ;;  %v744_v49 = vsel %vm740_vm15, 0.0, %v3008_v8  ;;  %v2290_v48 = vld [vmem:[%s3656_s1 + $0x86] ss:$8 sm:$0x3] }
 0x11c   : > { %v637_v33 = vadd.f32 %v635_v60, %v617_v3  ;;  %v767_v52 = vperm.slane %v2290_v48, 0  ;;  %v749_v60 = vperm.slane %v2289_v11, 1  ;;  %vm1230_vm12 = vcmask 1022976  }
 0x11d   : > { %v638_v14 = vadd.f32 %v636_v54, %v618_v22 }
 0x11e   : > { %v656_v51 = vadd.f32 %v654_v39, %v637_v33  ;;  %v2292_v33 = vld [vmem:[%s3656_s1 + $0x87] ss:$8 sm:$0x3] }
 0x11f   : > { %v657_v30 = vadd.f32 %v655_v27, %v638_v14  ;;  %1070 = vrot.lane.b32.xlu1 %v2661_v34, %s2547_s17  ;;  %1068 = vrot.lane.b32.xlu0 %v2656_v31, %s2547_s17  ;;  %v768_v27 = vperm.slane %v2290_v48, 1  ;;  %s2558_s17 = smov 109  }
 0x120   : > { %1087 = vrot.lane.b32.xlu2 %v2651_v26, %s2548_s25 }
 0x121   : > { %v661_v12 = vpop.permute.xlu1 %660  ;;  %v659_v42 = vpop.permute.xlu0 %658 }
 0x122   : > { %v663_v44 = vsel %vm662_vm13, %v659_v42, %v661_v12  ;;  %v666_v47 = vsel %vm662_vm13, 0.0, %v659_v42  ;;  %v759_v43 = vpop.permute.xlu2 %758  ;;  %v2291_v12 = vld [vmem:[%s3656_s1 + $0x17] ss:$8 sm:$0x3] }
 0x123   : > { %v674_v55 = vmul.f32 %v670_v32, %v666_v47  ;;  %v675_v61 = vmul.f32 %v671_v7, %v663_v44 }
 0x125   : > { %v676_v46 = vadd.f32 %v674_v55, %v656_v51  ;;  %v677_v45 = vadd.f32 %v675_v61, %v657_v30  ;;  %v787_v51 = vperm.slane %v2291_v12, 0 }
 0x127   : > { %v695_v1 = vadd.f32 %v693_v59, %v676_v46  ;;  %1107 = vrot.lane.b32.xlu1 %v2656_v31, %s2548_s25  ;;  %1089 = vrot.lane.b32.xlu0 %v2649_v25, %s2548_s25  ;;  %v788_v59 = vperm.slane %v2291_v12, 1 }
 0x128   : > { %1109 = vrot.lane.b32.xlu2 %v2661_v34, %s2548_s25  ;;  %s2570_s25 = smov 79  }
 0x129   : > { %v698_v53 = vpop.permute.xlu1 %697  ;;  %v681_v4 = vpop.permute.xlu0 %680 }
 0x12a   : > { %v705_v37 = vsel %vm701_vm14, 0.0, %v698_v53  ;;  %v702_v5 = vsel %vm701_vm14, %v698_v53, %v2983_v63  ;;  %v682_v10 = vsel %vm662_vm13, %v2955_v19, %v681_v4  ;;  %v3037_v58 = vpop.permute.xlu2 %795  ;;  %v748_v19 = vperm.slane %v2289_v11, 0 }
 0x12b   : > { %v713_v6 = vmul.f32 %v709_v2, %v705_v37  ;;  %v694_v9 = vmul.f32 %v690_v56, %v682_v10  ;;  %v714_v29 = vmul.f32 %v710_v57, %v702_v5  ;;  %v802_v55 = vsel %vm779_vm1, 0.0, %v3037_v58  ;;  %v2293_v57 = vld [vmem:[%s3656_s1 + $0x20] ss:$8 sm:$0x3] }
 0x12c   : > { %v752_v21 = vmul.f32 %v748_v19, %v744_v49  ;;  %v826_v10 = vperm.slane %v2293_v57, 0  ;;  %v827_v11 = vperm.slane %v2293_v57, 1  ;;  %v2294_v49 = vld [vmem:[%s3656_s1 + $0x90] ss:$8 sm:$0x3]  ;;  %vm1269_vm13 = vcmask 941056  }
 0x12d   : > { %v715_v35 = vadd.f32 %v713_v6, %v695_v1  ;;  %v696_v13 = vadd.f32 %v694_v9, %v677_v45  ;;  %v807_v6 = vperm.slane %v2292_v33, 1 }
 0x12f   : > { %v716_v63 = vadd.f32 %v714_v29, %v696_v13  ;;  %1150 = vrot.lane.b32.xlu1 %v2649_v25, %s2549_s4  ;;  %1148 = vrot.lane.b32.xlu0 %v2651_v26, %s2549_s4 }
 0x130   : > { %1168 = vrot.lane.b32.xlu2 %v2656_v31, %s2549_s4 }
 0x131   : > { %v720_v16 = vpop.permute.xlu1 %719  ;;  %v718_v17 = vpop.permute.xlu0 %717 }
 0x132   : > { %v721_v18 = vsel %vm701_vm14, %v718_v17, %v720_v16  ;;  %v724_v50 = vsel %vm701_vm14, 0.0, %v718_v17  ;;  %v817_v20 = vpop.permute.xlu2 %816  ;;  %vm1308_vm14 = vcmask 932864  }
 0x133   : > { %v732_v38 = vmul.f32 %v728_v40, %v724_v50  ;;  %v733_v22 = vmul.f32 %v729_v15, %v721_v18  ;;  %v2295_v15 = vld [vmem:[%s3656_s1 + $0x21] ss:$8 sm:$0x3] }
 0x135   : > { %v734_v54 = vadd.f32 %v732_v38, %v715_v35  ;;  %v735_v23 = vadd.f32 %v733_v22, %v716_v63 }
 0x137   : > { %v754_v24 = vadd.f32 %v752_v21, %v734_v54  ;;  %1187 = vrot.lane.b32.xlu1 %v2651_v26, %s2550_s7  ;;  %1170 = vrot.lane.b32.xlu0 %v2661_v34, %s2549_s4  ;;  %v846_v21 = vperm.slane %v2294_v49, 1  ;;  %s2557_s4 = smov 110  }
 0x138   : > { %1189 = vrot.lane.b32.xlu2 %v2649_v25, %s2550_s7 }
 0x139   : > { %v757_v3 = vpop.permute.xlu1 %756  ;;  %v739_v14 = vpop.permute.xlu0 %738 }
 0x13a   : > { %v763_v36 = vsel %vm740_vm15, 0.0, %v757_v3  ;;  %v760_v39 = vsel %vm740_vm15, %v757_v3, %v759_v43  ;;  %v741_v30 = vsel %vm740_vm15, %v3008_v8, %v739_v14  ;;  %v3062_v32 = vpop.permute.xlu2 %853  ;;  %v806_v8 = vperm.slane %v2292_v33, 0 }
 0x13b   : > { %v771_v7 = vmul.f32 %v767_v52, %v763_v36  ;;  %v753_v41 = vmul.f32 %v749_v60, %v741_v30  ;;  %v772_v44 = vmul.f32 %v768_v27, %v760_v39  ;;  %v861_v38 = vsel %vm857_vm3, 0.0, %v3062_v32  ;;  %v2296_v27 = vld [vmem:[%s3656_s1 + $0x91] ss:$8 sm:$0x3] }
 0x13c   : > { %v810_v2 = vmul.f32 %v806_v8, %v802_v55  ;;  %v884_v30 = vperm.slane %v2296_v27, 0  ;;  %v885_v33 = vperm.slane %v2296_v27, 1  ;;  %v2297_v55 = vld [vmem:[%s3656_s1 + $0x22] ss:$8 sm:$0x3]  ;;  %vm1347_vm15 = vcmask 924672  }
 0x13d   : > { %v773_v42 = vadd.f32 %v771_v7, %v754_v24  ;;  %v755_v47 = vadd.f32 %v753_v41, %v735_v23  ;;  %v866_v7 = vperm.slane %v2295_v15, 1 }
 0x13f   : > { %v774_v43 = vadd.f32 %v772_v44, %v755_v47  ;;  %1209 = vrot.lane.b32.xlu1 %v2661_v34, %s2550_s7  ;;  %1207 = vrot.lane.b32.xlu0 %v2656_v31, %s2550_s7 }
 0x140   : > { %1226 = vrot.lane.b32.xlu2 %v2651_v26, %s2551_s21 }
 0x141   : > { %v778_v61 = vpop.permute.xlu1 %777  ;;  %v776_v62 = vpop.permute.xlu0 %775 }
 0x142   : > { %v780_v46 = vsel %vm779_vm1, %v776_v62, %v778_v61  ;;  %v783_v45 = vsel %vm779_vm1, 0.0, %v776_v62  ;;  %v876_v1 = vpop.permute.xlu2 %875 }
 0x143   : > { %v791_v56 = vmul.f32 %v787_v51, %v783_v45  ;;  %v792_v53 = vmul.f32 %v788_v59, %v780_v46  ;;  %v2298_v59 = vld [vmem:[%s3656_s1 + $0x92] ss:$8 sm:$0x3] }
 0x145   : > { %v793_v4 = vadd.f32 %v791_v56, %v773_v42  ;;  %v794_v37 = vadd.f32 %v792_v53, %v774_v43 }
 0x147   : > { %v812_v5 = vadd.f32 %v810_v2, %v793_v4  ;;  %1246 = vrot.lane.b32.xlu1 %v2656_v31, %s2551_s21  ;;  %1228 = vrot.lane.b32.xlu0 %v2649_v25, %s2551_s21  ;;  %v905_v2 = vperm.slane %v2297_v55, 1 }
 0x148   : > { %1248 = vrot.lane.b32.xlu2 %v2661_v34, %s2551_s21 }
 0x149   : > { %v815_v9 = vpop.permute.xlu1 %814  ;;  %v798_v28 = vpop.permute.xlu0 %797 }
 0x14a   : > { %v822_v35 = vsel %vm818_vm2, 0.0, %v815_v9  ;;  %v819_v29 = vsel %vm818_vm2, %v815_v9, %v817_v20  ;;  %v799_v13 = vsel %vm779_vm1, %v3037_v58, %v798_v28  ;;  %v3087_v63 = vpop.permute.xlu2 %912  ;;  %v865_v58 = vperm.slane %v2295_v15, 0 }
 0x14b   : > { %v830_v19 = vmul.f32 %v826_v10, %v822_v35  ;;  %v811_v40 = vmul.f32 %v807_v6, %v799_v13  ;;  %v831_v17 = vmul.f32 %v827_v11, %v819_v29  ;;  %v845_v20 = vperm.slane %v2294_v49, 0  ;;  %v2299_v11 = vld [vmem:[%s3656_s1 + $0x23] ss:$8 sm:$0x3] }
 0x14c   : > { %v869_v52 = vmul.f32 %v865_v58, %v861_v38  ;;  %v919_v56 = vsel %vm896_vm4, 0.0, %v3087_v63  ;;  %v943_v13 = vperm.slane %v2299_v11, 0  ;;  %v944_v15 = vperm.slane %v2299_v11, 1  ;;  %v2300_v38 = vld [vmem:[%s3656_s1 + $0x93] ss:$8 sm:$0x3] }
 0x14d   : > { %v832_v16 = vadd.f32 %v830_v19, %v812_v5  ;;  %v813_v18 = vadd.f32 %v811_v40, %v794_v37  ;;  %v924_v19 = vperm.slane %v2298_v59, 1  ;;  %vm1386_vm1 = vcmask 916480  }
 0x14f   : > { %v833_v50 = vadd.f32 %v831_v17, %v813_v18  ;;  %1267 = vrot.lane.b32.xlu1 %v2649_v25, %s2552_s28  ;;  %1265 = vrot.lane.b32.xlu0 %v2651_v26, %s2552_s28 }
 0x150   : > { %1285 = vrot.lane.b32.xlu2 %v2656_v31, %s2552_s28 }
 0x151   : > { %v837_v22 = vpop.permute.xlu1 %836  ;;  %v835_v48 = vpop.permute.xlu0 %834 }
 0x152   : > { %v838_v54 = vsel %vm818_vm2, %v835_v48, %v837_v22  ;;  %v841_v23 = vsel %vm818_vm2, 0.0, %v835_v48  ;;  %v934_v24 = vpop.permute.xlu2 %933  ;;  %vm1425_vm2 = vcmask 908288  }
 0x153   : > { %v849_v60 = vmul.f32 %v845_v20, %v841_v23  ;;  %v850_v3 = vmul.f32 %v846_v21, %v838_v54  ;;  %v2301_v21 = vld [vmem:[%s3656_s1 + $0x24] ss:$8 sm:$0x3] }
 0x155   : > { %v851_v14 = vadd.f32 %v849_v60, %v832_v16  ;;  %v852_v36 = vadd.f32 %v850_v3, %v833_v50 }
 0x157   : > { %v871_v39 = vadd.f32 %v869_v52, %v851_v14  ;;  %1304 = vrot.lane.b32.xlu1 %v2651_v26, %s2553_s3  ;;  %1287 = vrot.lane.b32.xlu0 %v2661_v34, %s2552_s28  ;;  %v963_v52 = vperm.slane %v2300_v38, 1 }
 0x158   : > { %1306 = vrot.lane.b32.xlu2 %v2649_v25, %s2553_s3 }
 0x159   : > { %v874_v41 = vpop.permute.xlu1 %873  ;;  %v856_v12 = vpop.permute.xlu0 %855 }
 0x15a   : > { %v880_v42 = vsel %vm857_vm3, 0.0, %v874_v41  ;;  %v877_v44 = vsel %vm857_vm3, %v874_v41, %v876_v1  ;;  %v858_v47 = vsel %vm857_vm3, %v3062_v32, %v856_v12  ;;  %v3112_v43 = vpop.permute.xlu2 %970  ;;  %v923_v32 = vperm.slane %v2298_v59, 0 }
 0x15b   : > { %v888_v8 = vmul.f32 %v884_v30, %v880_v42  ;;  %v870_v51 = vmul.f32 %v866_v7, %v858_v47  ;;  %v889_v62 = vmul.f32 %v885_v33, %v877_v44  ;;  %v904_v1 = vperm.slane %v2297_v55, 0  ;;  %v2302_v33 = vld [vmem:[%s3656_s1 + $0x94] ss:$8 sm:$0x3] }
 0x15c   : > { %v927_v10 = vmul.f32 %v923_v32, %v919_v56  ;;  %v978_v60 = vsel %vm974_vm6, 0.0, %v3112_v43  ;;  %v1001_v47 = vperm.slane %v2302_v33, 0  ;;  %v1002_v59 = vperm.slane %v2302_v33, 1  ;;  %v2303_v56 = vld [vmem:[%s3656_s1 + $0x25] ss:$8 sm:$0x3] }
 0x15d   : > { %v890_v61 = vadd.f32 %v888_v8, %v871_v39  ;;  %v872_v46 = vadd.f32 %v870_v51, %v852_v36  ;;  %v983_v8 = vperm.slane %v2301_v21, 1  ;;  %vm1464_vm3 = vcmask 900096  }
 0x15f   : > { %v891_v45 = vadd.f32 %v889_v62, %v872_v46  ;;  %1326 = vrot.lane.b32.xlu1 %v2661_v34, %s2553_s3  ;;  %1324 = vrot.lane.b32.xlu0 %v2656_v31, %s2553_s3 }
 0x160   : > { %1343 = vrot.lane.b32.xlu2 %v2651_v26, %s2554_s8 }
 0x161   : > { %v895_v53 = vpop.permute.xlu1 %894  ;;  %v893_v57 = vpop.permute.xlu0 %892 }
 0x162   : > { %v897_v4 = vsel %vm896_vm4, %v893_v57, %v895_v53  ;;  %v900_v37 = vsel %vm896_vm4, 0.0, %v893_v57  ;;  %v993_v5 = vpop.permute.xlu2 %992 }
 0x163   : > { %v908_v6 = vmul.f32 %v904_v1, %v900_v37  ;;  %v909_v9 = vmul.f32 %v905_v2, %v897_v4  ;;  %v2304_v2 = vld [vmem:[%s3656_s1 + $0x95] ss:$8 sm:$0x3] }
 0x165   : > { %v910_v28 = vadd.f32 %v908_v6, %v890_v61  ;;  %v911_v35 = vadd.f32 %v909_v9, %v891_v45 }
 0x167   : > { %v929_v29 = vadd.f32 %v927_v10, %v910_v28  ;;  %1363 = vrot.lane.b32.xlu1 %v2656_v31, %s2554_s8  ;;  %1345 = vrot.lane.b32.xlu0 %v2649_v25, %s2554_s8  ;;  %v1022_v10 = vperm.slane %v2303_v56, 1 }
 0x168   : > { %1365 = vrot.lane.b32.xlu2 %v2661_v34, %s2554_s8  ;;  %s2481_s8 = scalar_lea.hbm %s3657_s2, 16 }
 0x169   : > { %v932_v40 = vpop.permute.xlu1 %931  ;;  %v915_v49 = vpop.permute.xlu0 %914 }
 0x16a   : > { %v939_v16 = vsel %vm935_vm5, 0.0, %v932_v40  ;;  %v936_v17 = vsel %vm935_vm5, %v932_v40, %v934_v24  ;;  %v916_v18 = vsel %vm896_vm4, %v3087_v63, %v915_v49  ;;  %v3137_v50 = vpop.permute.xlu2 %1029  ;;  %v982_v63 = vperm.slane %v2301_v21, 0 }
 0x16b   : > { %v947_v58 = vmul.f32 %v943_v13, %v939_v16  ;;  %v928_v20 = vmul.f32 %v924_v19, %v916_v18  ;;  %v948_v48 = vmul.f32 %v944_v15, %v936_v17  ;;  %v962_v24 = vperm.slane %v2300_v38, 0  ;;  %v2305_v15 = vld [vmem:[%s3656_s1 + $0x26] ss:$8 sm:$0x3] }
 0x16c   : > { %v986_v30 = vmul.f32 %v982_v63, %v978_v60  ;;  %v1036_v6 = vsel %vm1013_vm7, 0.0, %v3137_v50  ;;  %v1060_v18 = vperm.slane %v2305_v15, 0  ;;  %v1061_v21 = vperm.slane %v2305_v15, 1  ;;  %v2306_v60 = vld [vmem:[%s3656_s1 + $0x96] ss:$8 sm:$0x3] }
 0x16d   : > { %v949_v22 = vadd.f32 %v947_v58, %v929_v29  ;;  %v930_v54 = vadd.f32 %v928_v20, %v911_v35  ;;  %v1041_v58 = vperm.slane %v2304_v2, 1  ;;  %vm1503_vm4 = vcmask 891904  }
 0x16f   : > { %v950_v23 = vadd.f32 %v948_v48, %v930_v54  ;;  %1384 = vrot.lane.b32.xlu1 %v2649_v25, %s2555_s24  ;;  %1382 = vrot.lane.b32.xlu0 %v2651_v26, %s2555_s24 }
 0x170   : > { %1402 = vrot.lane.b32.xlu2 %v2656_v31, %s2555_s24 }
 0x171   : > { %v954_v3 = vpop.permute.xlu1 %953  ;;  %v952_v27 = vpop.permute.xlu0 %951 }
 0x172   : > { %v955_v14 = vsel %vm935_vm5, %v952_v27, %v954_v3  ;;  %v958_v36 = vsel %vm935_vm5, 0.0, %v952_v27  ;;  %v1051_v39 = vpop.permute.xlu2 %1050  ;;  %vm1542_vm5 = vcmask 809984  }
 0x173   : > { %v966_v7 = vmul.f32 %v962_v24, %v958_v36  ;;  %v967_v41 = vmul.f32 %v963_v52, %v955_v14  ;;  %v2307_v52 = vld [vmem:[%s3656_s1 + $0x27] ss:$8 sm:$0x3] }
 0x175   : > { %v968_v12 = vadd.f32 %v966_v7, %v949_v22  ;;  %v969_v42 = vadd.f32 %v967_v41, %v950_v23 }
 0x177   : > { %v988_v44 = vadd.f32 %v986_v30, %v968_v12  ;;  %1421 = vrot.lane.b32.xlu1 %v2651_v26, %s2556_s27  ;;  %1404 = vrot.lane.b32.xlu0 %v2661_v34, %s2555_s24  ;;  %v1080_v30 = vperm.slane %v2306_v60, 1 }
 0x178   : > { %1423 = vrot.lane.b32.xlu2 %v2649_v25, %s2556_s27 }
 0x179   : > { %v991_v51 = vpop.permute.xlu1 %990  ;;  %v973_v55 = vpop.permute.xlu0 %972 }
 0x17a   : > { %v997_v61 = vsel %vm974_vm6, 0.0, %v991_v51  ;;  %v994_v62 = vsel %vm974_vm6, %v991_v51, %v993_v5  ;;  %v975_v46 = vsel %vm974_vm6, %v3112_v43, %v973_v55  ;;  %v3162_v45 = vpop.permute.xlu2 %1087  ;;  %v1040_v43 = vperm.slane %v2304_v2, 0  ;;  %v2309_v55 = vld [vmem:[%s3656_s1 + $0x30] ss:$8 sm:$0x3] }
 0x17b   : > { %v1005_v32 = vmul.f32 %v1001_v47, %v997_v61  ;;  %v987_v1 = vmul.f32 %v983_v8, %v975_v46  ;;  %v1006_v57 = vmul.f32 %v1002_v59, %v994_v62  ;;  %v1021_v5 = vperm.slane %v2303_v56, 0  ;;  %v2308_v59 = vld [vmem:[%s3656_s1 + $0x97] ss:$8 sm:$0x3] }
 0x17c   : > { %v1044_v13 = vmul.f32 %v1040_v43, %v1036_v6  ;;  %v1095_v7 = vsel %vm1091_vm9, 0.0, %v3162_v45  ;;  %v2310_v46 = vld [vmem:[%s3656_s1 + $0xa0] ss:$8 sm:$0x3]  ;;  %v1129_v2 = vperm.slane %v2309_v55, 0  ;;  %v1100_v56 = vperm.slane %v2307_v52, 1 }
 0x17d   : > { %v1007_v53 = vadd.f32 %v1005_v32, %v988_v44  ;;  %v989_v4 = vadd.f32 %v987_v1, %v969_v42  ;;  %v1118_v1 = vperm.slane %v2308_v59, 0  ;;  %v1141_v6 = vperm.slane %v2310_v46, 1 }
 0x17e   : > { %vm1581_vm6 = vcmask 801792  }
 0x17f   : > { %v1008_v37 = vadd.f32 %v1006_v57, %v989_v4  ;;  %1443 = vrot.lane.b32.xlu1 %v2661_v34, %s2556_s27  ;;  %1441 = vrot.lane.b32.xlu0 %v2656_v31, %s2556_s27  ;;  %s2559_s27 = smov 99   ;;  %v1119_v4 = vperm.slane %v2308_v59, 1 }
 0x180   : > { %1460 = vrot.lane.b32.xlu2 %v2651_v26, %s2557_s4 }
 0x181   : > { %v1012_v9 = vpop.permute.xlu1 %1011  ;;  %v1010_v11 = vpop.permute.xlu0 %1009 }
 0x182   : > { %v1014_v28 = vsel %vm1013_vm7, %v1010_v11, %v1012_v9  ;;  %v1017_v35 = vsel %vm1013_vm7, 0.0, %v1010_v11  ;;  %v3177_v29 = vpop.permute.xlu2 %1109 }
 0x183   : > { %v1025_v19 = vmul.f32 %v1021_v5, %v1017_v35  ;;  %v1026_v40 = vmul.f32 %v1022_v10, %v1014_v28  ;;  %v1133_v35 = vmul.f32 %v1129_v2, %v2651_v26 }
 0x185   : > { %v1027_v49 = vadd.f32 %v1025_v19, %v1007_v53  ;;  %v1028_v16 = vadd.f32 %v1026_v40, %v1008_v37  ;;  %v1140_v53 = vperm.slane %v2310_v46, 0  ;;  %v1130_v37 = vperm.slane %v2309_v55, 1  ;;  %v2311_v19 = vld [vmem:[%s3656_s1 + $0x31] ss:$8 sm:$0x3] }
 0x186   : > { %v2314_v46 = vld [vmem:[%s3656_s1 + $0xa2] ss:$8 sm:$0x3] }
 0x187   : > { %v1046_v17 = vadd.f32 %v1044_v13, %v1027_v49  ;;  %1480 = vrot.lane.b32.xlu1 %v2656_v31, %s2557_s4  ;;  %1462 = vrot.lane.b32.xlu0 %v2649_v25, %s2557_s4  ;;  %v1134_v49 = vmul.f32 %v1130_v37, %v2649_v25 }
 0x188   : > { %1482 = vrot.lane.b32.xlu2 %v2661_v34, %s2557_s4 }
 0x189   : > { %v1049_v20 = vpop.permute.xlu1 %1048  ;;  %v1032_v38 = vpop.permute.xlu0 %1031 }
 0x18a   : > { %v1056_v22 = vsel %vm1052_vm8, 0.0, %v1049_v20  ;;  %v1053_v48 = vsel %vm1052_vm8, %v1049_v20, %v1051_v39  ;;  %v1033_v54 = vsel %vm1013_vm7, %v3137_v50, %v1032_v38  ;;  %v3189_v23 = vpop.permute.xlu2 %1168  ;;  %v1099_v50 = vperm.slane %v2307_v52, 0 }
 0x18b   : > { %v1064_v63 = vmul.f32 %v1060_v18, %v1056_v22  ;;  %v1045_v24 = vmul.f32 %v1041_v58, %v1033_v54  ;;  %v1065_v27 = vmul.f32 %v1061_v21, %v1053_v48  ;;  %v1079_v39 = vperm.slane %v2306_v60, 0 }
 0x18c   : > { %v1103_v47 = vmul.f32 %v1099_v50, %v1095_v7  ;;  %v1161_v58 = vperm.slane %v2311_v19, 1  ;;  %v1160_v20 = vperm.slane %v2311_v19, 0  ;;  %v2313_v50 = vld [vmem:[%s3656_s1 + $0x32] ss:$8 sm:$0x3]  ;;  %vm1620_vm7 = vcmask 793600  }
 0x18d   : > { %v1066_v3 = vadd.f32 %v1064_v63, %v1046_v17  ;;  %v1047_v14 = vadd.f32 %v1045_v24, %v1028_v16  ;;  %v1145_v17 = vmul.f32 %v1141_v6, %v2661_v34 }
 0x18f   : > { %v1067_v36 = vadd.f32 %v1065_v27, %v1047_v14  ;;  %1501 = vrot.lane.b32.xlu1 %v2649_v25, %s2558_s17  ;;  %1499 = vrot.lane.b32.xlu0 %v2651_v26, %s2558_s17  ;;  %v2312_v27 = vld [vmem:[%s3656_s1 + $0xa1] ss:$8 sm:$0x3] }
 0x190   : > { %1519 = vrot.lane.b32.xlu2 %v2656_v31, %s2558_s17  ;;  %v1180_v7 = vperm.slane %v2312_v27, 1 }
 0x191   : > { %v1071_v41 = vpop.permute.xlu1 %1070  ;;  %v1069_v33 = vpop.permute.xlu0 %1068 }
 0x192   : > { %v1072_v12 = vsel %vm1052_vm8, %v1069_v33, %v1071_v41  ;;  %v1075_v42 = vsel %vm1052_vm8, 0.0, %v1069_v33  ;;  %v3204_v44 = vpop.permute.xlu2 %1189  ;;  %vm1659_vm8 = vcmask 785408  }
 0x193   : > { %v1083_v8 = vmul.f32 %v1079_v39, %v1075_v42  ;;  %v1084_v51 = vmul.f32 %v1080_v30, %v1072_v12  ;;  %v1200_v39 = vperm.slane %v2313_v50, 1  ;;  %v1179_v30 = vperm.slane %v2312_v27, 0 }
 0x194   : > { %v1195_v41 = vsel %vm1191_vm11, %v3204_v44, 0.0  ;;  %v1199_v12 = vperm.slane %v2313_v50, 0 }
 0x195   : > { %v1085_v61 = vadd.f32 %v1083_v8, %v1066_v3  ;;  %v1086_v62 = vadd.f32 %v1084_v51, %v1067_v36  ;;  %v1204_v55 = vmul.f32 %v1200_v39, %v1195_v41  ;;  %v2318_v41 = vld [vmem:[%s3656_s1 + $0xa4] ss:$8 sm:$0x3] }
 0x197   : > { %v1105_v32 = vadd.f32 %v1103_v47, %v1085_v61  ;;  %1538 = vrot.lane.b32.xlu1 %v2651_v26, %s2559_s27  ;;  %1521 = vrot.lane.b32.xlu0 %v2661_v34, %s2558_s17 }
 0x198   : > { %1540 = vrot.lane.b32.xlu2 %v2649_v25, %s2559_s27 }
 0x199   : > { %v1108_v57 = vpop.permute.xlu1 %1107  ;;  %v1090_v43 = vpop.permute.xlu0 %1089 }
 0x19a   : > { %v1114_v5 = vsel %vm1091_vm9, 0.0, %v1108_v57  ;;  %v1111_v10 = vsel %vm1091_vm9, %v1108_v57, %v3177_v29  ;;  %v1092_v9 = vsel %vm1091_vm9, %v3162_v45, %v1090_v43  ;;  %v3225_v11 = vpop.permute.xlu2 %1226  ;;  %v1144_v29 = vmul.f32 %v1140_v53, %v2656_v31 }
 0x19b   : > { %v1122_v28 = vmul.f32 %v1118_v1, %v1114_v5  ;;  %v1104_v13 = vmul.f32 %v1100_v56, %v1092_v9  ;;  %v1123_v15 = vmul.f32 %v1119_v4, %v1111_v10  ;;  %v2315_v9 = vld [vmem:[%s3656_s1 + $0x33] ss:$8 sm:$0x3]  ;;  %vm1698_vm9 = vcmask 777216  }
 0x19d   : > { %v1124_v40 = vadd.f32 %v1122_v28, %v1105_v32  ;;  %v1106_v16 = vadd.f32 %v1104_v13, %v1086_v62  ;;  %v2316_v13 = vld [vmem:[%s3656_s1 + $0xa3] ss:$8 sm:$0x3] }
 0x19e   : > { %v1258_v19 = vperm.slane %v2316_v13, 1 }
 0x19f   : > { %v1135_v45 = vadd.f32 %v1133_v35, %v1124_v40  ;;  %v1125_v18 = vadd.f32 %v1123_v15, %v1106_v16  ;;  %1560 = vrot.lane.b32.xlu1 %v2661_v34, %s2559_s27  ;;  %1558 = vrot.lane.b32.xlu0 %v2656_v31, %s2559_s27  ;;  %v1238_v40 = vperm.slane %v2315_v9, 0  ;;  %v1239_v15 = vperm.slane %v2315_v9, 1 }
 0x1a0   : > { %1577 = vrot.lane.b32.xlu2 %v2651_v26, %s2560_s30 }
 0x1a1   : > { %v1136_v21 = vadd.f32 %v1134_v49, %v1125_v18  ;;  %v1151_v38 = vpop.permute.xlu1 %1150  ;;  %v1149_v22 = vpop.permute.xlu0 %1148  ;;  %v1146_v24 = vadd.f32 %v1144_v29, %v1135_v45  ;;  %v1257_v29 = vperm.slane %v2316_v13, 0 }
 0x1a2   : > { %v1156_v48 = vsel %vm1152_vm10, %v1151_v38, 0.0  ;;  %v1153_v54 = vsel %vm1152_vm10, %v1149_v22, %v1151_v38  ;;  %v3241_v63 = vpop.permute.xlu2 %1248 }
 0x1a3   : > { %v1147_v52 = vadd.f32 %v1145_v17, %v1136_v21  ;;  %v1165_v60 = vmul.f32 %v1161_v58, %v1156_v48  ;;  %v1164_v3 = vmul.f32 %v1160_v20, %v1153_v54  ;;  %v1253_v49 = vsel %vm1230_vm12, %v3241_v63, 0.0  ;;  %v2317_v48 = vld [vmem:[%s3656_s1 + $0x34] ss:$8 sm:$0x3] }
 0x1a4   : > { %v1262_v21 = vmul.f32 %v1258_v19, %v1253_v49  ;;  %v2321_v49 = vld [vmem:[%s3656_s1 + $0x36] ss:$8 sm:$0x3] }
 0x1a5   : > { %v1167_v14 = vadd.f32 %v1165_v60, %v1147_v52  ;;  %v1166_v36 = vadd.f32 %v1164_v3, %v1146_v24  ;;  %v1277_v60 = vperm.slane %v2317_v48, 0 }
 0x1a7   : > { %1597 = vrot.lane.b32.xlu1 %v2656_v31, %s2560_s30  ;;  %1579 = vrot.lane.b32.xlu0 %v2649_v25, %s2560_s30 }
 0x1a8   : > { %1599 = vrot.lane.b32.xlu2 %v2661_v34, %s2560_s30  ;;  %s2571_s30 = smov 78  }
 0x1a9   : > { %v1188_v33 = vpop.permute.xlu1 %1187  ;;  %v1171_v42 = vpop.permute.xlu0 %1170 }
 0x1aa   : > { %v1192_v47 = vsel %vm1191_vm11, %v1188_v33, %v3204_v44  ;;  %v1172_v8 = vsel %vm1152_vm10, %v3189_v23, %v1171_v42  ;;  %v1175_v51 = vsel %vm1152_vm10, %v1171_v42, 0.0  ;;  %v3259_v59 = vpop.permute.xlu2 %1285  ;;  %v1219_v23 = vperm.slane %v2314_v46, 1  ;;  %v2319_v42 = vld [vmem:[%s3656_s1 + $0x35] ss:$8 sm:$0x3] }
 0x1ab   : > { %v1183_v61 = vmul.f32 %v1179_v30, %v1172_v8  ;;  %v1184_v62 = vmul.f32 %v1180_v7, %v1175_v51  ;;  %v1203_v32 = vmul.f32 %v1199_v12, %v1192_v47  ;;  %v1218_v44 = vperm.slane %v2314_v46, 0 }
 0x1ac   : > { %v1317_v47 = vperm.slane %v2319_v42, 1  ;;  %v1296_v8 = vperm.slane %v2318_v41, 0  ;;  %v1297_v51 = vperm.slane %v2318_v41, 1  ;;  %vm1737_vm10 = vcmask 769024  }
 0x1ad   : > { %v1185_v1 = vadd.f32 %v1183_v61, %v1166_v36  ;;  %v1186_v2 = vadd.f32 %v1184_v62, %v1167_v14  ;;  %v1316_v62 = vperm.slane %v2319_v42, 0 }
 0x1af   : > { %v1205_v56 = vadd.f32 %v1203_v32, %v1185_v1  ;;  %v1206_v53 = vadd.f32 %v1204_v55, %v1186_v2  ;;  %1618 = vrot.lane.b32.xlu1 %v2649_v25, %s2561_s14  ;;  %1616 = vrot.lane.b32.xlu0 %v2651_v26, %s2561_s14 }
 0x1b0   : > { %1636 = vrot.lane.b32.xlu2 %v2656_v31, %s2561_s14 }
 0x1b1   : > { %v1210_v57 = vpop.permute.xlu1 %1209  ;;  %v1208_v4 = vpop.permute.xlu0 %1207 }
 0x1b2   : > { %v1214_v37 = vsel %vm1191_vm11, %v1210_v57, 0.0  ;;  %v1211_v43 = vsel %vm1191_vm11, %v1208_v4, %v1210_v57  ;;  %v1307_v5 = vpop.permute.xlu2 %1306  ;;  %v2320_v57 = vld [vmem:[%s3656_s1 + $0xa5] ss:$8 sm:$0x3]  ;;  %vm1776_vm11 = vcmask 760832  }
 0x1b3   : > { %v1223_v10 = vmul.f32 %v1219_v23, %v1214_v37  ;;  %v1222_v6 = vmul.f32 %v1218_v44, %v1211_v43  ;;  %v1312_v55 = vsel %vm1308_vm14, %v1307_v5, 0.0 }
 0x1b5   : > { %v1225_v28 = vadd.f32 %v1223_v10, %v1206_v53  ;;  %v1224_v35 = vadd.f32 %v1222_v6, %v1205_v56  ;;  %v1321_v53 = vmul.f32 %v1317_v47, %v1312_v55  ;;  %v1335_v10 = vperm.slane %v2320_v57, 0  ;;  %v2324_v55 = vld [vmem:[%s3656_s1 + $0xa7] ss:$8 sm:$0x3] }
 0x1b7   : > { %1655 = vrot.lane.b32.xlu1 %v2651_v26, %s2562_s23  ;;  %1638 = vrot.lane.b32.xlu0 %v2661_v34, %s2561_s14  ;;  %s2569_s14 = smov 80  }
 0x1b8   : > { %1657 = vrot.lane.b32.xlu2 %v2649_v25, %s2562_s23 }
 0x1b9   : > { %v1247_v16 = vpop.permute.xlu1 %1246  ;;  %v1229_v17 = vpop.permute.xlu0 %1228 }
 0x1ba   : > { %v1250_v45 = vsel %vm1230_vm12, %v1247_v16, %v3241_v63  ;;  %v1231_v18 = vsel %vm1230_vm12, %v3225_v11, %v1229_v17  ;;  %v1234_v58 = vsel %vm1230_vm12, %v1229_v17, 0.0  ;;  %v3281_v20 = vpop.permute.xlu2 %1343  ;;  %v1278_v63 = vperm.slane %v2317_v48, 1  ;;  %v2322_v17 = vld [vmem:[%s3656_s1 + $0xa6] ss:$8 sm:$0x3] }
 0x1bb   : > { %v1242_v38 = vmul.f32 %v1238_v40, %v1231_v18  ;;  %v1243_v22 = vmul.f32 %v1239_v15, %v1234_v58  ;;  %v1261_v54 = vmul.f32 %v1257_v29, %v1250_v45  ;;  %v1375_v45 = vperm.slane %v2322_v17, 1 }
 0x1bc   : > { %v1355_v18 = vperm.slane %v2321_v49, 0  ;;  %v1356_v58 = vperm.slane %v2321_v49, 1  ;;  %vm1815_vm12 = vcmask 678912  }
 0x1bd   : > { %v1244_v24 = vadd.f32 %v1242_v38, %v1224_v35  ;;  %v1245_v52 = vadd.f32 %v1243_v22, %v1225_v28  ;;  %v1374_v22 = vperm.slane %v2322_v17, 0 }
 0x1bf   : > { %1677 = vrot.lane.b32.xlu1 %v2661_v34, %s2562_s23  ;;  %1675 = vrot.lane.b32.xlu0 %v2656_v31, %s2562_s23  ;;  %v1264_v11 = vadd.f32 %v1262_v21, %v1245_v52  ;;  %v1263_v3 = vadd.f32 %v1261_v54, %v1244_v24  ;;  %s134_s23 = sand.u32 1, %s2515_s10  }
 0x1c0   : > { %1696 = vrot.lane.b32.xlu2 %v2649_v25, %s2563_s26  ;;  %s3617_s24 = sshll.u32 %s134_s23, 3  ;;  %s2132_s3 = scalar_lea.sflag [#allocation3], %s134_s23 }
 0x1c1   : > { %v1268_v27 = vpop.permute.xlu1 %1267  ;;  %v1266_v14 = vpop.permute.xlu0 %1265 }
 0x1c2   : > { %v1273_v36 = vsel %vm1269_vm13, %v1268_v27, 0.0  ;;  %v1270_v50 = vsel %vm1269_vm13, %v1266_v14, %v1268_v27  ;;  %v1366_v39 = vpop.permute.xlu2 %1365  ;;  %v2323_v27 = vld [vmem:[%s3656_s1 + $0x37] ss:$8 sm:$0x3] }
 0x1c3   : > { %v1282_v30 = vmul.f32 %v1278_v63, %v1273_v36  ;;  %v1281_v7 = vmul.f32 %v1277_v60, %v1270_v50  ;;  %v1370_v21 = vsel %vm1347_vm15, %v1366_v39, 0.0 }
 0x1c5   : > { %v1284_v33 = vadd.f32 %v1282_v30, %v1264_v11  ;;  %v1283_v12 = vadd.f32 %v1281_v7, %v1263_v3  ;;  %v1379_v11 = vmul.f32 %v1375_v45, %v1370_v21  ;;  %v1394_v30 = vperm.slane %v2323_v27, 0  ;;  %v2327_v21 = vld [vmem:[%s3656_s1 + $0x41] ss:$8 sm:$0x3] }
 0x1c7   : > { %1716 = vrot.lane.b32.xlu1 %v2661_v34, %s2563_s26  ;;  %1694 = vrot.lane.b32.xlu0 %v2651_v26, %s2563_s26 }
 0x1c8   : > { %1714 = vrot.lane.b32.xlu2 %v2656_v31, %s2563_s26 }
 0x1c9   : > { %v1305_v61 = vpop.permute.xlu1 %1304  ;;  %v1288_v46 = vpop.permute.xlu0 %1287 }
 0x1ca   : > { %v1309_v32 = vsel %vm1308_vm14, %v1305_v61, %v1307_v5  ;;  %v1289_v1 = vsel %vm1269_vm13, %v3259_v59, %v1288_v46  ;;  %v1292_v2 = vsel %vm1269_vm13, %v1288_v46, 0.0  ;;  %v3305_v56 = vpop.permute.xlu2 %1402  ;;  %v1336_v59 = vperm.slane %v2320_v57, 1  ;;  %v2325_v46 = vld [vmem:[%s3656_s1 + $0x40] ss:$8 sm:$0x3] }
 0x1cb   : > { %v1300_v23 = vmul.f32 %v1296_v8, %v1289_v1  ;;  %v1301_v44 = vmul.f32 %v1297_v51, %v1292_v2  ;;  %v1320_v4 = vmul.f32 %v1316_v62, %v1309_v32  ;;  %v1434_v32 = vperm.slane %v2325_v46, 1 }
 0x1cc   : > { %v1413_v1 = vperm.slane %v2324_v55, 0  ;;  %v1414_v2 = vperm.slane %v2324_v55, 1  ;;  %vm1854_vm13 = vcmask 670720  }
 0x1cd   : > { %v1302_v37 = vadd.f32 %v1300_v23, %v1283_v12  ;;  %v1303_v43 = vadd.f32 %v1301_v44, %v1284_v33  ;;  %v1433_v44 = vperm.slane %v2325_v46, 0 }
 0x1cf   : > { %1733 = vrot.lane.b32.xlu1 %v2651_v26, %s2564_s5  ;;  %1735 = vrot.lane.b32.xlu0 %v2649_v25, %s2564_s5  ;;  %v1323_v5 = vadd.f32 %v1321_v53, %v1303_v43  ;;  %v1322_v6 = vadd.f32 %v1320_v4, %v1302_v37 }
 0x1d0   : > { %1755 = vrot.lane.b32.xlu2 %v2661_v34, %s2564_s5 }
 0x1d1   : > { %v1327_v9 = vpop.permute.xlu1 %1326  ;;  %v1325_v28 = vpop.permute.xlu0 %1324 }
 0x1d2   : > { %v1331_v35 = vsel %vm1308_vm14, %v1327_v9, 0.0  ;;  %v1328_v13 = vsel %vm1308_vm14, %v1325_v28, %v1327_v9  ;;  %v1424_v19 = vpop.permute.xlu2 %1423  ;;  %v2326_v9 = vld [vmem:[%s3656_s1 + $0xb0] ss:$8 sm:$0x3]  ;;  %vm1893_vm14 = vcmask 662528  }
 0x1d3   : > { %v1340_v40 = vmul.f32 %v1336_v59, %v1331_v35  ;;  %v1339_v15 = vmul.f32 %v1335_v10, %v1328_v13  ;;  %v1429_v53 = vsel %vm1425_vm2, %v1424_v19, 0.0 }
 0x1d5   : > { %v1342_v16 = vadd.f32 %v1340_v40, %v1323_v5  ;;  %v1341_v29 = vadd.f32 %v1339_v15, %v1322_v6  ;;  %v1438_v5 = vmul.f32 %v1434_v32, %v1429_v53  ;;  %v1452_v40 = vperm.slane %v2326_v9, 0  ;;  %v2330_v53 = vld [vmem:[%s3656_s1 + $0xb2] ss:$8 sm:$0x3] }
 0x1d7   : > { %1774 = vrot.lane.b32.xlu1 %v2649_v25, %s2565_s16  ;;  %1753 = vrot.lane.b32.xlu0 %v2656_v31, %s2564_s5  ;;  %s2572_s5 = smov 77  }
 0x1d8   : > { %1772 = vrot.lane.b32.xlu2 %v2651_v26, %s2565_s16 }
 0x1d9   : > { %v1364_v38 = vpop.permute.xlu1 %1363  ;;  %v1346_v48 = vpop.permute.xlu0 %1345 }
 0x1da   : > { %v1367_v54 = vsel %vm1347_vm15, %v1364_v38, %v1366_v39  ;;  %v1348_v24 = vsel %vm1347_vm15, %v3281_v20, %v1346_v48  ;;  %v1351_v52 = vsel %vm1347_vm15, %v1346_v48, 0.0  ;;  %v3325_v63 = vpop.permute.xlu2 %1460  ;;  %v1395_v39 = vperm.slane %v2323_v27, 1  ;;  %v2328_v48 = vld [vmem:[%s3656_s1 + $0xb1] ss:$8 sm:$0x3] }
 0x1db   : > { %v1359_v60 = vmul.f32 %v1355_v18, %v1348_v24  ;;  %v1360_v3 = vmul.f32 %v1356_v58, %v1351_v52  ;;  %v1378_v14 = vmul.f32 %v1374_v22, %v1367_v54  ;;  %v1492_v54 = vperm.slane %v2328_v48, 1 }
 0x1dc   : > { %v1472_v24 = vperm.slane %v2327_v21, 0  ;;  %v1473_v52 = vperm.slane %v2327_v21, 1  ;;  %vm1932_vm15 = vcmask 654336  }
 0x1dd   : > { %v1361_v36 = vadd.f32 %v1359_v60, %v1341_v29  ;;  %v1362_v50 = vadd.f32 %v1360_v3, %v1342_v16  ;;  %v1491_v3 = vperm.slane %v2328_v48, 0 }
 0x1df   : > { %1792 = vrot.lane.b32.xlu1 %v2656_v31, %s2565_s16  ;;  %1794 = vrot.lane.b32.xlu0 %v2661_v34, %s2565_s16  ;;  %v1381_v20 = vadd.f32 %v1379_v11, %v1362_v50  ;;  %v1380_v7 = vadd.f32 %v1378_v14, %v1361_v36 }
 0x1e0   : > { %1813 = vrot.lane.b32.xlu2 %v2649_v25, %s2566_s22 }
 0x1e1   : > { %v1385_v41 = vpop.permute.xlu1 %1384  ;;  %v1383_v33 = vpop.permute.xlu0 %1382 }
 0x1e2   : > { %v1390_v12 = vsel %vm1386_vm1, %v1385_v41, 0.0  ;;  %v1387_v42 = vsel %vm1386_vm1, %v1383_v33, %v1385_v41  ;;  %v1483_v47 = vpop.permute.xlu2 %1482  ;;  %v2329_v41 = vld [vmem:[%s3656_s1 + $0x42] ss:$8 sm:$0x3] }
 0x1e3   : > { %v1399_v8 = vmul.f32 %v1395_v39, %v1390_v12  ;;  %v1398_v51 = vmul.f32 %v1394_v30, %v1387_v42  ;;  %v1487_v11 = vsel %vm1464_vm3, %v1483_v47, 0.0 }
 0x1e5   : > { %v1401_v61 = vadd.f32 %v1399_v8, %v1381_v20  ;;  %v1400_v62 = vadd.f32 %v1398_v51, %v1380_v7  ;;  %v1496_v20 = vmul.f32 %v1492_v54, %v1487_v11  ;;  %v1511_v8 = vperm.slane %v2329_v41, 0  ;;  %v2333_v11 = vld [vmem:[%s3656_s1 + $0x44] ss:$8 sm:$0x3] }
 0x1e7   : > { %1833 = vrot.lane.b32.xlu1 %v2661_v34, %s2566_s22  ;;  %1811 = vrot.lane.b32.xlu0 %v2651_v26, %s2566_s22 }
 0x1e8   : > { %1831 = vrot.lane.b32.xlu2 %v2656_v31, %s2566_s22 }
 0x1e9   : > { %v1422_v23 = vpop.permute.xlu1 %1421  ;;  %v1405_v57 = vpop.permute.xlu0 %1404 }
 0x1ea   : > { %v1426_v4 = vsel %vm1425_vm2, %v1422_v23, %v1424_v19  ;;  %v1406_v37 = vsel %vm1386_vm1, %v3305_v56, %v1405_v57  ;;  %v1409_v43 = vsel %vm1386_vm1, %v1405_v57, 0.0  ;;  %v3349_v59 = vpop.permute.xlu2 %1519  ;;  %v1453_v56 = vperm.slane %v2326_v9, 1  ;;  %v2331_v57 = vld [vmem:[%s3656_s1 + $0x43] ss:$8 sm:$0x3] }
 0x1eb   : > { %v1417_v10 = vmul.f32 %v1413_v1, %v1406_v37  ;;  %v1418_v6 = vmul.f32 %v1414_v2, %v1409_v43  ;;  %v1437_v28 = vmul.f32 %v1433_v44, %v1426_v4  ;;  %v1551_v4 = vperm.slane %v2331_v57, 1 }
 0x1ec   : > { %v1530_v37 = vperm.slane %v2330_v53, 0  ;;  %v1531_v43 = vperm.slane %v2330_v53, 1  ;;  %vm1971_vm1 = vcmask 646144  }
 0x1ed   : > { %v1419_v35 = vadd.f32 %v1417_v10, %v1400_v62  ;;  %v1420_v13 = vadd.f32 %v1418_v6, %v1401_v61  ;;  %v1550_v6 = vperm.slane %v2331_v57, 0 }
 0x1ef   : > { %1850 = vrot.lane.b32.xlu1 %v2651_v26, %s2567_s29  ;;  %1852 = vrot.lane.b32.xlu0 %v2649_v25, %s2567_s29  ;;  %v1440_v19 = vadd.f32 %v1438_v5, %v1420_v13  ;;  %v1439_v15 = vadd.f32 %v1437_v28, %v1419_v35 }
 0x1f0   : > { %1872 = vrot.lane.b32.xlu2 %v2661_v34, %s2567_s29 }
 0x1f1   : > { %v1444_v49 = vpop.permute.xlu1 %1443  ;;  %v1442_v16 = vpop.permute.xlu0 %1441 }
 0x1f2   : > { %v1448_v29 = vsel %vm1425_vm2, %v1444_v49, 0.0  ;;  %v1445_v17 = vsel %vm1425_vm2, %v1442_v16, %v1444_v49  ;;  %v1541_v45 = vpop.permute.xlu2 %1540  ;;  %v2332_v49 = vld [vmem:[%s3656_s1 + $0xb3] ss:$8 sm:$0x3]  ;;  %vm2010_vm2 = vcmask 637952  }
 0x1f3   : > { %v1457_v18 = vmul.f32 %v1453_v56, %v1448_v29  ;;  %v1456_v58 = vmul.f32 %v1452_v40, %v1445_v17  ;;  %v1546_v5 = vsel %vm1542_vm5, %v1541_v45, 0.0 }
 0x1f5   : > { %v1459_v38 = vadd.f32 %v1457_v18, %v1440_v19  ;;  %v1458_v22 = vadd.f32 %v1456_v58, %v1439_v15  ;;  %v1555_v19 = vmul.f32 %v1551_v4, %v1546_v5  ;;  %v1569_v18 = vperm.slane %v2332_v49, 0  ;;  %v2336_v5 = vld [vmem:[%s3656_s1 + $0xb5] ss:$8 sm:$0x3] }
 0x1f7   : > { %1891 = vrot.lane.b32.xlu1 %v2649_v25, %s2568_s6  ;;  %1870 = vrot.lane.b32.xlu0 %v2656_v31, %s2567_s29 }
 0x1f8   : > { %1889 = vrot.lane.b32.xlu2 %v2651_v26, %s2568_s6 }
 0x1f9   : > { %v1481_v60 = vpop.permute.xlu1 %1480  ;;  %v1463_v27 = vpop.permute.xlu0 %1462 }
 0x1fa   : > { %v1484_v14 = vsel %vm1464_vm3, %v1481_v60, %v1483_v47  ;;  %v1465_v36 = vsel %vm1464_vm3, %v3325_v63, %v1463_v27  ;;  %v1468_v50 = vsel %vm1464_vm3, %v1463_v27, 0.0  ;;  %v3369_v39 = vpop.permute.xlu2 %1577  ;;  %v1512_v47 = vperm.slane %v2329_v41, 1  ;;  %v2334_v27 = vld [vmem:[%s3656_s1 + $0xb4] ss:$8 sm:$0x3] }
 0x1fb   : > { %v1476_v30 = vmul.f32 %v1472_v24, %v1465_v36  ;;  %v1477_v7 = vmul.f32 %v1473_v52, %v1468_v50  ;;  %v1495_v33 = vmul.f32 %v1491_v3, %v1484_v14  ;;  %v1609_v14 = vperm.slane %v2334_v27, 1 }
 0x1fc   : > { %v1589_v36 = vperm.slane %v2333_v11, 0  ;;  %v1590_v50 = vperm.slane %v2333_v11, 1  ;;  %vm2049_vm3 = vcmask 629760  }
 0x1fd   : > { %v1478_v12 = vadd.f32 %v1476_v30, %v1458_v22  ;;  %v1479_v42 = vadd.f32 %v1477_v7, %v1459_v38  ;;  %v1608_v7 = vperm.slane %v2334_v27, 0 }
 0x1ff   : > { %1909 = vrot.lane.b32.xlu1 %v2656_v31, %s2568_s6  ;;  %1911 = vrot.lane.b32.xlu0 %v2661_v34, %s2568_s6  ;;  %v1498_v63 = vadd.f32 %v1496_v20, %v1479_v42  ;;  %v1497_v51 = vadd.f32 %v1495_v33, %v1478_v12 }
 0x200   : > { %1930 = vrot.lane.b32.xlu2 %v2649_v25, %s2569_s14 }
 0x201   : > { %v1502_v55 = vpop.permute.xlu1 %1501  ;;  %v1500_v61 = vpop.permute.xlu0 %1499 }
 0x202   : > { %v1507_v62 = vsel %vm1503_vm4, %v1502_v55, 0.0  ;;  %v1504_v46 = vsel %vm1503_vm4, %v1500_v61, %v1502_v55  ;;  %v1600_v32 = vpop.permute.xlu2 %1599  ;;  %v2335_v55 = vld [vmem:[%s3656_s1 + $0x45] ss:$8 sm:$0x3] }
 0x203   : > { %v1516_v1 = vmul.f32 %v1512_v47, %v1507_v62  ;;  %v1515_v2 = vmul.f32 %v1511_v8, %v1504_v46  ;;  %v1604_v20 = vsel %vm1581_vm6, %v1600_v32, 0.0 }
 0x205   : > { %v1518_v23 = vadd.f32 %v1516_v1, %v1498_v63  ;;  %v1517_v44 = vadd.f32 %v1515_v2, %v1497_v51  ;;  %v1613_v63 = vmul.f32 %v1609_v14, %v1604_v20  ;;  %v1628_v1 = vperm.slane %v2335_v55, 0 }
 0x207   : > { %1950 = vrot.lane.b32.xlu1 %v2661_v34, %s2569_s14  ;;  %1928 = vrot.lane.b32.xlu0 %v2651_v26, %s2569_s14 }
 0x208   : > { %1948 = vrot.lane.b32.xlu2 %v2656_v31, %s2569_s14 }
 0x209   : > { %v1539_v10 = vpop.permute.xlu1 %1538  ;;  %v1522_v9 = vpop.permute.xlu0 %1521 }
 0x20a   : > { %v1543_v28 = vsel %vm1542_vm5, %v1539_v10, %v1541_v45  ;;  %v1523_v35 = vsel %vm1503_vm4, %v3349_v59, %v1522_v9  ;;  %v1526_v13 = vsel %vm1503_vm4, %v1522_v9, 0.0  ;;  %v3393_v56 = vpop.permute.xlu2 %1636  ;;  %v1570_v59 = vperm.slane %v2332_v49, 1 }
 0x20b   : > { %v1534_v40 = vmul.f32 %v1530_v37, %v1523_v35  ;;  %v1535_v15 = vmul.f32 %v1531_v43, %v1526_v13  ;;  %v1554_v16 = vmul.f32 %v1550_v6, %v1543_v28  ;;  %v1647_v28 = vperm.slane %v2336_v5, 0 }
 0x20c   : > { %v1648_v35 = vperm.slane %v2336_v5, 1 }
 0x20d   : > { %v1536_v29 = vadd.f32 %v1534_v40, %v1517_v44  ;;  %v1537_v17 = vadd.f32 %v1535_v15, %v1518_v23 }
 0x20f   : > { %1967 = vrot.lane.b32.xlu1 %v2651_v26, %s2570_s25  ;;  %1969 = vrot.lane.b32.xlu0 %v2649_v25, %s2570_s25  ;;  %v1557_v45 = vadd.f32 %v1555_v19, %v1537_v17  ;;  %v1556_v58 = vadd.f32 %v1554_v16, %v1536_v29 }
 0x210   : > { %1989 = vrot.lane.b32.xlu2 %v2661_v34, %s2570_s25 }
 0x211   : > { %v1561_v21 = vpop.permute.xlu1 %1560  ;;  %v1559_v38 = vpop.permute.xlu0 %1558 }
 0x212   : > { %v1565_v22 = vsel %vm1542_vm5, %v1561_v21, 0.0  ;;  %v1562_v48 = vsel %vm1542_vm5, %v1559_v38, %v1561_v21  ;;  %v1658_v54 = vpop.permute.xlu2 %1657 }
 0x213   : > { %v1574_v24 = vmul.f32 %v1570_v59, %v1565_v22  ;;  %v1573_v52 = vmul.f32 %v1569_v18, %v1562_v48  ;;  %v1663_v13 = vsel %vm1659_vm8, %v1658_v54, 0.0 }
 0x215   : > { %v1576_v60 = vadd.f32 %v1574_v24, %v1557_v45  ;;  %v1575_v3 = vadd.f32 %v1573_v52, %v1556_v58  ;;  %v2338_v45 = vld [vmem:[%s3656_s1 + $0xb6] ss:$8 sm:$0x3] }
 0x216   : > { %v1686_v48 = vperm.slane %v2338_v45, 0 }
 0x217   : > { %2008 = vrot.lane.b32.xlu1 %v2649_v25, %s2571_s30  ;;  %1987 = vrot.lane.b32.xlu0 %v2656_v31, %s2570_s25  ;;  %s2365_s25 = sshll.u32 %s2609_s13, 3  ;;  %s136_s13 = scalar_lea.vmem [#allocation2], %s3617_s24 }
 0x218   : > { %2006 = vrot.lane.b32.xlu2 %v2651_v26, %s2571_s30  ;;  %s2143_s28 = scalar_lea.hbm %s3657_s2, %s2365_s25  ;;  %s2145_s29 = sshll.u32 %s136_s13, 4  ;;  %s2146_s29 = int_to_ptr.vmem [resolvable:$true] %s2145_s29 }
 0x219   : > { %v1598_v30 = vpop.permute.xlu1 %1597  ;;  %v1580_v41 = vpop.permute.xlu0 %1579 }
 0x21a   : > { %v1601_v33 = vsel %vm1581_vm6, %v1598_v30, %v1600_v32  ;;  %v1582_v12 = vsel %vm1581_vm6, %v3369_v39, %v1580_v41  ;;  %v1585_v42 = vsel %vm1581_vm6, %v1580_v41, 0.0  ;;  %v3413_v47 = vpop.permute.xlu2 %1696  ;;  %v1629_v32 = vperm.slane %v2335_v55, 1 }
 0x21b   : > { %v1593_v8 = vmul.f32 %v1589_v36, %v1582_v12  ;;  %v1594_v51 = vmul.f32 %v1590_v50, %v1585_v42  ;;  %v1612_v61 = vmul.f32 %v1608_v7, %v1601_v33  ;;  %v1702_v24 = vsel %vm1698_vm9, %v3413_v47, 0.0 }
 0x21d   : > { %v1595_v62 = vadd.f32 %v1593_v8, %v1575_v3  ;;  %v1596_v46 = vadd.f32 %v1594_v51, %v1576_v60 }
 0x21f   : > { %2026 = vrot.lane.b32.xlu1 %v2656_v31, %s2571_s30  ;;  %2028 = vrot.lane.b32.xlu0 %v2661_v34, %s2571_s30  ;;  %v1615_v39 = vadd.f32 %v1613_v63, %v1596_v46  ;;  %v1614_v2 = vadd.f32 %v1612_v61, %v1595_v62  ;;  %s2147_s30 = sshll.u32 %s2143_s28, 4  ;;  %s2148_s30 = int_to_ptr.hbm [resolvable:$true] %s2147_s30 }
 0x220   : > { %2047 = vrot.lane.b32.xlu2 %v2649_v25, %s2572_s5  ;;  %v2337_v25 = vld [vmem:[%s3656_s1 + $0x46] ss:$8 sm:$0x3]  ;;  %s2475_s4 = sshra.s32 %s2148_s30, 4  ;;  %s2476_s4 = int_to_ptr.hbm [resolvable:$true] %s2475_s4 }
 0x221   : > { %v1619_v53 = vpop.permute.xlu1 %1618  ;;  %v1617_v23 = vpop.permute.xlu0 %1616  ;;  %v1668_v9 = vperm.slane %v2337_v25, 1  ;;  %v1667_v40 = vperm.slane %v2337_v25, 0  ;;  %v2342_v25 = vld [vmem:[%s3656_s1 + $0xc0] ss:$8 sm:$0x3]  ;;  %p2482_p0 = scmp.lt.s32.totalorder %s2476_s4, %s3657_s2 }
 0x222   : > { %v1624_v44 = vsel %vm1620_vm7, %v1619_v53, 0.0  ;;  %v1621_v57 = vsel %vm1620_vm7, %v1617_v23, %v1619_v53  ;;  %v3423_v4 = vpop.permute.xlu2 %1714 }
 0x223   : > { %v1633_v37 = vmul.f32 %v1629_v32, %v1624_v44  ;;  %v1632_v43 = vmul.f32 %v1628_v1, %v1621_v57 }
 0x225   : > { %v1635_v10 = vadd.f32 %v1633_v37, %v1615_v39  ;;  %v1634_v6 = vadd.f32 %v1632_v43, %v1614_v2  ;;  %v2340_v37 = vld [vmem:[%s3656_s1 + $0xb7] ss:$8 sm:$0x3]  ;;  %v2341_v43 = vld [vmem:[%s3656_s1 + $0x50] ss:$8 sm:$0x3] }
 0x227   : > { %2067 = vrot.lane.b32.xlu1 %v2661_v34, %s2572_s5  ;;  %2045 = vrot.lane.b32.xlu0 %v2651_v26, %s2572_s5  ;;  %v1672_v26 = vmul.f32 %v1668_v9, %v1663_v13  ;;  %v1746_v9 = vperm.slane %v2341_v43, 1 }
 0x228   : > { %2065 = vrot.lane.b32.xlu2 %v2656_v31, %s2572_s5  ;;  %v2339_v31 = vld [vmem:[%s3656_s1 + $0x47] ss:$8 sm:$0x3]  ;;  %s2477_s5 = scalar_lea.hbm %s2476_s4, 8 }
 0x229   : > { %v1656_v19 = vpop.permute.xlu1 %1655  ;;  %v1639_v15 = vpop.permute.xlu0 %1638  ;;  %v1707_v22 = vperm.slane %v2339_v31, 1  ;;  %v1706_v41 = vperm.slane %v2339_v31, 0  ;;  %p2478_p11 = scmp.ne.s32.totalorder %s2476_s4, %s2477_s5  ;;  %p2483_p1 = scmp.lt.s32.totalorder %s2481_s8, %s2477_s5 }
 0x22a   : > { %v1660_v49 = vsel %vm1659_vm8, %v1656_v19, %v1658_v54  ;;  %v1640_v16 = vsel %vm1620_vm7, %v3393_v56, %v1639_v15  ;;  %v1643_v34 = vsel %vm1620_vm7, %v1639_v15, 0.0  ;;  %v3439_v29 = vpop.permute.xlu2 %1755  ;;  %v1687_v56 = vperm.slane %v2338_v45, 1  ;;  %v2344_v45 = vld [vmem:[%s3656_s1 + $0xc1] ss:$8 sm:$0x3] }
 0x22b   : > { %v1651_v17 = vmul.f32 %v1647_v28, %v1640_v16  ;;  %v1652_v59 = vmul.f32 %v1648_v35, %v1643_v34  ;;  %v1671_v18 = vmul.f32 %v1667_v40, %v1660_v49  ;;  %v1711_v36 = vmul.f32 %v1707_v22, %v1702_v24  ;;  %v2343_v49 = vld [vmem:[%s3656_s1 + $0x51] ss:$8 sm:$0x3]  ;;  %v2345_v24 = vld [vmem:[%s3656_s1 + $0x52] ss:$8 sm:$0x3]  ;;  %p2479_p12 = pnand %p2478_p11, %p2626_p5  ;;  %p2484_p2 = por %p2483_p1, %p2482_p0 }
 0x22c   : > { %v1725_v40 = vperm.slane %v2340_v37, 0  ;;  %v1765_v15 = vperm.slane %v2342_v25, 1  ;;  %v1760_v16 = vsel %vm1737_vm10, %v3439_v29, 0.0  ;;  %v1745_v34 = vperm.slane %v2341_v43, 0 }
 0x22d   : > { %v1653_v58 = vadd.f32 %v1651_v17, %v1634_v6  ;;  %v1654_v21 = vadd.f32 %v1652_v59, %v1635_v10  ;;  %v1726_v10 = vperm.slane %v2340_v37, 1  ;;  %v1823_v43 = vperm.slane %v2345_v24, 0  ;;  %p2480_p13 = pneg %p2479_p12 }
 0x22f   : > { %v1674_v38 = vadd.f32 %v1672_v26, %v1654_v21  ;;  %v1673_v54 = vadd.f32 %v1671_v18, %v1653_v58  ;;  %v1785_v18 = vperm.slane %v2343_v49, 1  ;;  %v1764_v58 = vperm.slane %v2342_v25, 0  ;;  %p2485_p3 = pnand %p2484_p2, %p2480_p13 }
 0x230   : > { %v1769_v21 = vmul.f32 %v1765_v15, %v1760_v16 }
 0x231   : > { %v1678_v52 = vpop.permute.xlu1 %1677  ;;  %v1676_v11 = vpop.permute.xlu0 %1675 }
 0x232   : > { %v1682_v60 = vsel %vm1659_vm8, %v1678_v52, 0.0  ;;  %v1679_v3 = vsel %vm1659_vm8, %v1676_v11, %v1678_v52  ;;  %v3451_v27 = vpop.permute.xlu2 %1772  ;;  %v1804_v52 = vperm.slane %v2344_v45, 1 }
 0x233   : > { %v1691_v14 = vmul.f32 %v1687_v56, %v1682_v60  ;;  %v1690_v50 = vmul.f32 %v1686_v48, %v1679_v3 }
 0x235   : > { %v1693_v20 = vadd.f32 %v1691_v14, %v1674_v38  ;;  %v1692_v30 = vadd.f32 %v1690_v50, %v1673_v54 }
 0x237   : > { %v1713_v7 = vadd.f32 %v1711_v36, %v1693_v20  ;;  %v1784_v20 = vperm.slane %v2343_v49, 0 }
 0x239   : > { %v1717_v33 = vpop.permute.xlu1 %1716  ;;  %v1695_v12 = vpop.permute.xlu0 %1694 }
 0x23a   : > { %v1699_v42 = vsel %vm1698_vm9, %v1695_v12, %v3413_v47  ;;  %v3455_v8 = vpop.permute.xlu2 %1813  ;;  %v1721_v6 = vsel %vm1698_vm9, %v1717_v33, 0.0  ;;  %v1718_v17 = vsel %vm1698_vm9, %v3423_v4, %v1717_v33 }
 0x23b   : > { %v1710_v63 = vmul.f32 %v1706_v41, %v1699_v42  ;;  %v1730_v35 = vmul.f32 %v1726_v10, %v1721_v6  ;;  %v1729_v48 = vmul.f32 %v1725_v40, %v1718_v17  ;;  %v1819_v12 = vsel %vm1815_vm12, %v3455_v8, 0.0  ;;  %v2349_v17 = vld [vmem:[%s3656_s1 + $0x54] ss:$8 sm:$0x3] }
 0x23d   : > { %v1712_v51 = vadd.f32 %v1710_v63, %v1692_v30  ;;  %v1732_v31 = vadd.f32 %v1730_v35, %v1713_v7  ;;  %v1824_v30 = vperm.slane %v2345_v24, 1  ;;  %v1803_v7 = vperm.slane %v2344_v45, 0 }
 0x23f   : > { %v1731_v60 = vadd.f32 %v1729_v48, %v1712_v51  ;;  %v1828_v10 = vmul.f32 %v1824_v30, %v1819_v12  ;;  %v2352_v30 = vld [vmem:[%s3656_s1 + $0xc5] ss:$8 sm:$0x3] }
 0x241   : > { %v1734_v55 = vpop.permute.xlu1 %1733  ;;  %v1736_v61 = vpop.permute.xlu0 %1735 }
 0x242   : > { %v3457_v62 = vpop.permute.xlu2 %1831  ;;  %v1741_v28 = vsel %vm1737_vm10, %v1736_v61, 0.0  ;;  %v1738_v59 = vsel %vm1737_vm10, %v1734_v55, %v1736_v61  ;;  %v2347_v61 = vld [vmem:[%s3656_s1 + $0x53] ss:$8 sm:$0x3] }
 0x243   : > { %v1750_v26 = vmul.f32 %v1746_v9, %v1741_v28  ;;  %v1749_v54 = vmul.f32 %v1745_v34, %v1738_v59  ;;  %v1863_v9 = vperm.slane %v2347_v61, 1 }
 0x245   : > { %v1752_v4 = vadd.f32 %v1750_v26, %v1732_v31  ;;  %v1751_v41 = vadd.f32 %v1749_v54, %v1731_v60  ;;  %v1862_v26 = vperm.slane %v2347_v61, 0  ;;  %v1902_v54 = vperm.slane %v2349_v17, 1 }
 0x247   : > { %v1771_v33 = vadd.f32 %v1769_v21, %v1752_v4 }
 0x249   : > { %v1775_v46 = vpop.permute.xlu1 %1774  ;;  %v1754_v32 = vpop.permute.xlu0 %1753 }
 0x24a   : > { %v3459_v39 = vpop.permute.xlu2 %1872  ;;  %v1780_v56 = vsel %vm1776_vm11, %v1775_v46, 0.0  ;;  %v1757_v38 = vsel %vm1737_vm10, %v1754_v32, %v3439_v29  ;;  %v2346_v29 = vld [vmem:[%s3656_s1 + $0xc2] ss:$8 sm:$0x3]  ;;  %v1777_v63 = vsel %vm1776_vm11, %v3451_v27, %v1775_v46 }
 0x24b   : > { %v1789_v3 = vmul.f32 %v1785_v18, %v1780_v56  ;;  %v1768_v14 = vmul.f32 %v1764_v58, %v1757_v38  ;;  %v1843_v55 = vperm.slane %v2346_v29, 1  ;;  %v1788_v27 = vmul.f32 %v1784_v20, %v1777_v63  ;;  %v2350_v56 = vld [vmem:[%s3656_s1 + $0xc4] ss:$8 sm:$0x3] }
 0x24c   : > { %v1842_v49 = vperm.slane %v2346_v29, 0  ;;  %v1877_v31 = vsel %vm1854_vm13, %v3459_v39, 0.0 }
 0x24d   : > { %v1791_v32 = vadd.f32 %v1789_v3, %v1771_v33  ;;  %v1770_v37 = vadd.f32 %v1768_v14, %v1751_v41  ;;  %v1920_v33 = vperm.slane %v2350_v56, 0 }
 0x24f   : > { %v1790_v40 = vadd.f32 %v1788_v27, %v1770_v37  ;;  %v1960_v37 = vperm.slane %v2352_v30, 1 }
 0x251   : > { %v1793_v1 = vpop.permute.xlu1 %1792  ;;  %v1795_v2 = vpop.permute.xlu0 %1794 }
 0x252   : > { %v3465_v44 = vpop.permute.xlu2 %1889  ;;  %v1799_v11 = vsel %vm1776_vm11, %v1795_v2, 0.0  ;;  %v1796_v51 = vsel %vm1776_vm11, %v1793_v1, %v1795_v2  ;;  %v2348_v2 = vld [vmem:[%s3656_s1 + $0xc3] ss:$8 sm:$0x3] }
 0x253   : > { %v1808_v42 = vmul.f32 %v1804_v52, %v1799_v11  ;;  %v1807_v46 = vmul.f32 %v1803_v7, %v1796_v51  ;;  %v1881_v4 = vperm.slane %v2348_v2, 0  ;;  %v1901_v7 = vperm.slane %v2349_v17, 0 }
 0x255   : > { %v1810_v1 = vadd.f32 %v1808_v42, %v1791_v32  ;;  %v1809_v59 = vadd.f32 %v1807_v46, %v1790_v40 }
 0x257   : > { %v1830_v45 = vadd.f32 %v1828_v10, %v1810_v1 }
 0x259   : > { %v3461_v53 = vpop.permute.xlu1 %1833  ;;  %v3463_v23 = vpop.permute.xlu0 %1811 }
 0x25a   : > { %v3477_v5 = vpop.permute.xlu2 %1930  ;;  %v1838_v6 = vsel %vm1815_vm12, %v3461_v53, 0.0  ;;  %v1816_v25 = vsel %vm1815_vm12, %v3463_v23, %v3455_v8  ;;  %v1882_v23 = vperm.slane %v2348_v2, 1  ;;  %v1835_v58 = vsel %vm1815_vm12, %v3457_v62, %v3461_v53 }
 0x25b   : > { %v1847_v15 = vmul.f32 %v1843_v55, %v1838_v6  ;;  %v1827_v16 = vmul.f32 %v1823_v43, %v1816_v25  ;;  %v1846_v53 = vmul.f32 %v1842_v49, %v1835_v58  ;;  %v1936_v63 = vsel %vm1932_vm15, %v3477_v5, 0.0  ;;  %v2353_v43 = vld [vmem:[%s3656_s1 + $0x56] ss:$8 sm:$0x3] }
 0x25c   : > { %v1886_v24 = vmul.f32 %v1882_v23, %v1877_v31  ;;  %v1979_v17 = vperm.slane %v2353_v43, 0 }
 0x25d   : > { %v1849_v38 = vadd.f32 %v1847_v15, %v1830_v45  ;;  %v1829_v48 = vadd.f32 %v1827_v16, %v1809_v59  ;;  %v1959_v15 = vperm.slane %v2352_v30, 0 }
 0x25f   : > { %v1848_v14 = vadd.f32 %v1846_v53, %v1829_v48 }
 0x261   : > { %v3467_v47 = vpop.permute.xlu1 %1850  ;;  %v3469_v57 = vpop.permute.xlu0 %1852 }
 0x262   : > { %v3502_v22 = vpop.permute.xlu2 %1948  ;;  %v1858_v28 = vsel %vm1854_vm13, %v3469_v57, 0.0  ;;  %v1855_v21 = vsel %vm1854_vm13, %v3467_v47, %v3469_v57  ;;  %v2351_v47 = vld [vmem:[%s3656_s1 + $0x55] ss:$8 sm:$0x3]  ;;  %v1921_v57 = vperm.slane %v2350_v56, 1 }
 0x263   : > { %v1867_v18 = vmul.f32 %v1863_v9, %v1858_v28  ;;  %v1866_v11 = vmul.f32 %v1862_v26, %v1855_v21  ;;  %v1941_v41 = vperm.slane %v2351_v47, 1  ;;  %v1940_v25 = vperm.slane %v2351_v47, 0  ;;  %v2356_v21 = vld [vmem:[%s3656_s1 + $0xc7] ss:$8 sm:$0x3] }
 0x265   : > { %v1869_v60 = vadd.f32 %v1867_v18, %v1849_v38  ;;  %v1868_v12 = vadd.f32 %v1866_v11, %v1848_v14  ;;  %v1945_v27 = vmul.f32 %v1941_v41, %v1936_v63 }
 0x267   : > { %v1888_v42 = vadd.f32 %v1886_v24, %v1869_v60  ;;  %v2038_v60 = vperm.slane %v2356_v21, 1 }
 0x269   : > { %v3484_v13 = vpop.permute.xlu1 %1891  ;;  %v3486_v19 = vpop.permute.xlu0 %1870 }
 0x26a   : > { %v3533_v35 = vpop.permute.xlu2 %1989  ;;  %v1897_v52 = vsel %vm1893_vm14, %v3484_v13, 0.0  ;;  %v1874_v62 = vsel %vm1854_vm13, %v3486_v19, %v3459_v39  ;;  %v1894_v61 = vsel %vm1893_vm14, %v3465_v44, %v3484_v13 }
 0x26b   : > { %v1906_v29 = vmul.f32 %v1902_v54, %v1897_v52  ;;  %v1885_v20 = vmul.f32 %v1881_v4, %v1874_v62  ;;  %v1905_v13 = vmul.f32 %v1901_v7, %v1894_v61  ;;  %v1994_v45 = vsel %vm1971_vm1, %v3533_v35, 0.0 }
 0x26d   : > { %v1908_v10 = vadd.f32 %v1906_v29, %v1888_v42  ;;  %v1887_v6 = vadd.f32 %v1885_v20, %v1868_v12  ;;  %v2358_v12 = vld [vmem:[%s3656_s1 + $0xd0] ss:$8 sm:$0x3] }
 0x26f   : > { %v1907_v28 = vadd.f32 %v1905_v13, %v1887_v6  ;;  %v2076_v13 = vperm.slane %v2358_v12, 0 }
 0x271   : > { %v3511_v36 = vpop.permute.xlu1 %1909  ;;  %v3513_v50 = vpop.permute.xlu0 %1911 }
 0x272   : > { %v1916_v3 = vsel %vm1893_vm14, %v3513_v50, 0.0  ;;  %v3566_v55 = vpop.permute.xlu2 %2006  ;;  %v1913_v32 = vsel %vm1893_vm14, %v3511_v36, %v3513_v50  ;;  %v2354_v36 = vld [vmem:[%s3656_s1 + $0xc6] ss:$8 sm:$0x3]  ;;  %v1980_v50 = vperm.slane %v2353_v43, 1 }
 0x273   : > { %v1925_v51 = vmul.f32 %v1921_v57, %v1916_v3  ;;  %v1924_v1 = vmul.f32 %v1920_v33, %v1913_v32  ;;  %v1999_v26 = vperm.slane %v2354_v36, 1  ;;  %v1998_v54 = vperm.slane %v2354_v36, 0 }
 0x275   : > { %v1927_v2 = vadd.f32 %v1925_v51, %v1908_v10  ;;  %v2003_v24 = vmul.f32 %v1999_v26, %v1994_v45 }
 0x277   : > { %v1947_v59 = vadd.f32 %v1945_v27, %v1927_v2 }
 0x279   : > { %v3535_v34 = vpop.permute.xlu1 %1950  ;;  %v1929_v8 = vpop.permute.xlu0 %1928 }
 0x27a   : > { %v1955_v46 = vsel %vm1932_vm15, %v3535_v34, 0.0  ;;  %v1933_v44 = vsel %vm1932_vm15, %v1929_v8, %v3477_v5  ;;  %v2355_v5 = vld [vmem:[%s3656_s1 + $0x57] ss:$8 sm:$0x3]  ;;  %v1926_v8 = vadd.f32 %v1924_v1, %v1907_v28  ;;  %v1952_v18 = vsel %vm1932_vm15, %v3502_v22, %v3535_v34  ;;  %v2048_v4 = vpop.permute.xlu2 %2047 }
 0x27b   : > { %v1964_v40 = vmul.f32 %v1960_v37, %v1955_v46  ;;  %v1944_v49 = vmul.f32 %v1940_v25, %v1933_v44  ;;  %v2019_v48 = vperm.slane %v2355_v5, 1  ;;  %v1963_v53 = vmul.f32 %v1959_v15, %v1952_v18  ;;  %v2357_v34 = vld [vmem:[%s3656_s1 + $0x60] ss:$8 sm:$0x3] }
 0x27c   : > { %v2018_v20 = vperm.slane %v2355_v5, 0  ;;  %v2058_v30 = vperm.slane %v2357_v34, 1  ;;  %v2053_v41 = vsel %vm2049_vm3, %v2048_v4, 0.0  ;;  %v2077_v37 = vperm.slane %v2358_v12, 1 }
 0x27d   : > { %v1966_v56 = vadd.f32 %v1964_v40, %v1947_v59  ;;  %v1946_v38 = vadd.f32 %v1944_v49, %v1926_v8  ;;  %v2057_v27 = vperm.slane %v2357_v34, 0 }
 0x27e   : > { %v2062_v32 = vmul.f32 %v2058_v30, %v2053_v41 }
 0x27f   : > { %v1965_v47 = vadd.f32 %v1963_v53, %v1946_v38 }
 0x281   : > { %v1968_v39 = vpop.permute.xlu1 %1967  ;;  %v1970_v19 = vpop.permute.xlu0 %1969 }
 0x282   : > { %v1975_v9 = vsel %vm1971_vm1, %v1970_v19, 0.0  ;;  %v1972_v58 = vsel %vm1971_vm1, %v1968_v39, %v1970_v19  ;;  %v2037_v39 = vperm.slane %v2356_v21, 0  ;;  %v2066_v25 = vpop.permute.xlu2 %2065 }
 0x283   : > { %v1984_v31 = vmul.f32 %v1980_v50, %v1975_v9  ;;  %v1983_v11 = vmul.f32 %v1979_v17, %v1972_v58 }
 0x285   : > { %v1986_v22 = vadd.f32 %v1984_v31, %v1966_v56 }
 0x287   : > { %v2005_v7 = vadd.f32 %v2003_v24, %v1986_v22 }
 0x289   : > { %v2009_v16 = vpop.permute.xlu1 %2008  ;;  %v1988_v23 = vpop.permute.xlu0 %1987 }
 0x28a   : > { %v2014_v52 = vsel %vm2010_vm2, %v2009_v16, 0.0  ;;  %v1991_v62 = vsel %vm1971_vm1, %v1988_v23, %v3533_v35  ;;  %v1985_v35 = vadd.f32 %v1983_v11, %v1965_v47  ;;  %v2011_v42 = vsel %vm2010_vm2, %v3566_v55, %v2009_v16 }
 0x28b   : > { %v2023_v57 = vmul.f32 %v2019_v48, %v2014_v52  ;;  %v2002_v3 = vmul.f32 %v1998_v54, %v1991_v62  ;;  %v2022_v43 = vmul.f32 %v2018_v20, %v2011_v42 }
 0x28d   : > { %v2025_v51 = vadd.f32 %v2023_v57, %v2005_v7  ;;  %v2004_v61 = vadd.f32 %v2002_v3, %v1985_v35 }
 0x28f   : > { %v2024_v46 = vadd.f32 %v2022_v43, %v2004_v61 }
 0x291   : > { %v2027_v14 = vpop.permute.xlu1 %2026  ;;  %v2029_v29 = vpop.permute.xlu0 %2028 }
 0x292   : > { %v2033_v19 = vsel %vm2010_vm2, %v2029_v29, 0.0  ;;  %v2030_v63 = vsel %vm2010_vm2, %v2027_v14, %v2029_v29 }
 0x293   : > { %v2042_v33 = vmul.f32 %v2038_v60, %v2033_v19  ;;  %v2041_v10 = vmul.f32 %v2037_v39, %v2030_v63 }
 0x295   : > { %v2044_v6 = vadd.f32 %v2042_v33, %v2025_v51  ;;  %v2043_v50 = vadd.f32 %v2041_v10, %v2024_v46 }
 0x297   : > { %v2064_v9 = vadd.f32 %v2062_v32, %v2044_v6 }
 0x299   : > { %v2068_v44 = vpop.permute.xlu1 %2067  ;;  %v2046_v1 = vpop.permute.xlu0 %2045 }
 0x29a   : > { %v2072_v2 = vsel %vm2049_vm3, %v2068_v44, 0.0  ;;  %v2069_v36 = vsel %vm2049_vm3, %v2066_v25, %v2068_v44  ;;  %v2050_v55 = vsel %vm2049_vm3, %v2046_v1, %v2048_v4 }
 0x29b   : > { %v2081_v28 = vmul.f32 %v2077_v37, %v2072_v2  ;;  %v2061_v40 = vmul.f32 %v2057_v27, %v2050_v55  ;;  %v2080_v49 = vmul.f32 %v2076_v13, %v2069_v36 }
 0x29d   : > { %v2083_v15 = vadd.f32 %v2081_v28, %v2064_v9  ;;  %v2063_v16 = vadd.f32 %v2061_v40, %v2043_v50 }
 0x29f   : > { %v2085_v23 = vsub.f32 0.0, %v2083_v15  ;;  %v2082_v26 = vadd.f32 %v2080_v49, %v2063_v16 }
 0x2a1   : > { %v2088_v17 = vmul.f32 1.442695, %v2085_v23  ;;  %v2084_v5 = vsub.f32 0.0, %v2082_v26 }
 0x2a3   : > { %2453 = vpow2.f32 %v2088_v17  ;;  %v2086_v8 = vmul.f32 1.442695, %v2084_v5 }
 0x2a5   : > { %2455 = vpow2.f32 %v2086_v8 }
 0x2a9   : > { %v2454_v59 = vpop.eup %2453 }
 0x2aa   : > { %v2091_v45 = vadd.f32 1.0, %v2454_v59 }
 0x2ab   : > { %v2456_v31 = vpop.eup %2455 }
 0x2ac   : > { %2457 = vrcp.f32 %v2091_v45  ;;  %v2090_v18 = vadd.f32 1.0, %v2456_v31  ;;  %v2118_v54 = vand.u32 2147483648, %v2091_v45  ;;  %v2116_v52 = vand.u32 2147483647, %v2091_v45 }
 0x2ad   : > { %vm2112_vm5 = vweird.f32 %v2091_v45 }
 0x2ae   : > { %2459 = vrcp.f32 %v2090_v18  ;;  %v2103_v62 = vand.u32 2147483648, %v2090_v18  ;;  %v2101_v11 = vand.u32 2147483647, %v2090_v18  ;;  %v2119_v34 = vor.u32 1.1754944e-38, %v2118_v54 }
 0x2af   : > { %vm2097_vm8 = vweird.f32 %v2090_v18  ;;  %vm2117_vm9 = vcmp.eq.f32.partialorder %v2116_v52, 8.507059e+37 }
 0x2b0   : > { %v2104_v57 = vor.u32 1.1754944e-38, %v2103_v62  ;;  %vm2102_vm11 = vcmp.eq.f32.partialorder %v2101_v11, 8.507059e+37 }
 0x2b2   : > { %v2458_v58 = vpop.eup %2457 }
 0x2b3   : > { %v2108_v21 = vmul.f32 %v2458_v58, %v2091_v45  ;;  %vm2113_vm4 = vweird.f32 %v2458_v58 }
 0x2b4   : > { %v2460_v56 = vpop.eup %2459  ;;  %vm2114_vm7 = vmor %vm2112_vm5, %vm2113_vm4 }
 0x2b5   : > { %v2109_v38 = vsub.f32 1.0, %v2108_v21  ;;  %v2093_v48 = vmul.f32 %v2460_v56, %v2090_v18  ;;  %vm2098_vm6 = vweird.f32 %v2460_v56 }
 0x2b6   : > { %vm2099_vm10 = vmor %vm2097_vm8, %vm2098_vm6 }
 0x2b7   : > { %v2094_v4 = vsub.f32 1.0, %v2093_v48  ;;  %v2110_v24 = vmul.f32 %v2458_v58, %v2109_v38 }
 0x2b9   : > { %v2095_v53 = vmul.f32 %v2460_v56, %v2094_v4  ;;  %v2111_v22 = vadd.f32 %v2458_v58, %v2110_v24 }
 0x2bb   : > { %v2096_v60 = vadd.f32 %v2460_v56, %v2095_v53  ;;  %v2115_v47 = vsel %vm2114_vm7, %v2458_v58, %v2111_v22 }
 0x2bc   : > { %v2120_v3 = vsel %vm2117_vm9, %v2119_v34, %v2115_v47 }
 0x2bd   : > { %v2100_v14 = vsel %vm2099_vm10, %v2460_v56, %v2096_v60  ;;  %v2123_v29 = vperm.slane %v2120_v3, 0 }
 0x2be   : > { %v2105_v20 = vsel %vm2102_vm11, %v2104_v57, %v2100_v14 }
 0x2bf   : > { %v2122_v30 = vperm.slane %v2105_v20, 0  ;;  %v2126_v39 = vrot.slane %v2123_v29, 4 }
 0x2c1   : > { %v2127_v19 = vsel %vm149_vm0, %v2122_v30, %v2126_v39 }
 0x2c2   : > { %v2129_v35 = vmul.f32 %v2127_v19, %v2641_v0 }
 0x2c4   : > { %2130 = vst [vmem:[%s136_s13] sm:$0xff] %v2129_v35 }
 0x2c5   : > { %2488 = shalt.err (!%p2485_p3)
}
 0x2c6   : > { %2366 = dma.vmem_to_hbm [thread:$0]  (%p2626_p5), %s2146_s29, 128, %s2148_s30, %s2132_s3  }
 0x2c7 PF: > { %p2372_p4 = scmp.ge.s32.totalorder %s2523_s12, 2  ;;  %s2159_s17 = sand.u32 1, %s2511_s9  }
 0x2c8   : > { %s2160_s21 = scalar_lea.sflag [#allocation3], %s2159_s17 }
 0x2c9   : > { %p2369_p7 = pnand %p2372_p4, %p2630_p6 }
 0x2cb   : > { %p2370_p8 = pneg %p2369_p7 }
 0x2cd   : > { %2506 = dma.done.wait (%p2370_p8), %s2160_s21, 128  }
 0x2ce   : > { %2508 = vsyncadd (%p2370_p8), %s2160_s21, 4294967168  ;;  %p12_p9 = scmp.ge.s32.totalorder %s2613_s15, 4   ;;  %s3660_s9 = smov %s2515_s10 }
 0x2cf   : > { %s3661_s10 = smov %s2519_s11  ;;  %s3662_s11 = smov %s2624_s18 }
 0x2d0   : > { %s3663_s12 = smov %s2613_s15  ;;  %14 = sbr.rel (!%p12_p9) target bundleno = 3 (0x3), region = 160 }
 0x2d5   :  { %2166 = vsyncpa [#allocation3], 1 }
 0x2d6   :  { %2168 = vsyncpa [#allocation3 + $0x1], 1 }

</bundles_post_ra>
